<compile_context>
chip_gen: v6e
topology: v6e:2x2x1
jax: 0.10.0
libtpu: 0.0.40
codegen_flags: <defaults>
</compile_context>

<pallas_src>
import math

import jax
import jax.numpy as jnp
from jax.experimental import pallas as pl
from jax.experimental.pallas import tpu as pltpu

D_MODEL = 32
N_HEADS = 4
D_HEAD = D_MODEL // N_HEADS
D_FF = 64
N_LAYERS = 2
SRC_VOCAB = 16
TGT_VOCAB = 16
MAX_LEN = 64
EPS = 1e-6
MASK_SCALE = 1e9
LANE = 128          # every packed weight segment is padded to one 128-lane tile

# Row / segment indices inside the packed slabs (see init_params()).
# Encoder matrix slab segments:   0:Wqkv  1:Wo  2:W1  3:W2^T
# Encoder vector slab rows:       0:ln1_g 1:ln1_b 2:bqkv 3:bo 4:ln2_g 5:ln2_b 6:b1 7:b2
# Decoder matrix slab segments:   0:SaWqkv 1:SaWo 2:CaWq 3:CaWkv 4:CaWo 5:W1 6:W2^T
# Decoder vector slab rows:       0:ln1_g 1:ln1_b 2:sa_bqkv 3:sa_bo 4:ln2_g 5:ln2_b
#                                 6:ca_bq 7:ca_bkv 8:ca_bo 9:ln3_g 10:ln3_b 11:b1 12:b2
ENC_VEC_ROWS = 8
DEC_VEC_ROWS = 16   # 13 used, padded to 16 sublanes


# ---------------------------------------------------------------------------
# In-kernel building blocks (pure functions on VMEM-resident values)
# ---------------------------------------------------------------------------
def _layer_norm(x, g, b):
    # Annotated-Transformer LayerNorm: unbiased std (ddof=1), normalize by (std + eps).
    mean = jnp.mean(x, axis=-1, keepdims=True)
    var = jnp.sum((x - mean) ** 2, axis=-1, keepdims=True) * (1.0 / (D_MODEL - 1))
    inv = pl.reciprocal(jnp.sqrt(var) + EPS, approx=True)
    return g * (x - mean) * inv + b


def _embed(ids_col, lut, pe_rows):
    """Token gather as a one-hot matmul on the MXU (vocab is tiny) + PE add.

    ids_col: (L, 1) int32, lut: (V, D) f32, pe_rows: (L, D) f32.
    Kept in f32: the gather is semantically a copy of the embedding table.
    """
    L = ids_col.shape[0]
    V = lut.shape[0]
    onehot = (ids_col == jax.lax.broadcasted_iota(jnp.int32, (L, V), 1)).astype(jnp.float32)
    x = jnp.dot(onehot, lut, preferred_element_type=jnp.float32)
    return x * math.sqrt(D_MODEL) + pe_rows      # Embeddings * sqrt(d) + PositionalEncoding


def _mha_out(qm, q_off, kvm, k_off, v_off, wo, mask_add):
    """Multi-head attention with heads folded into the output projection.

        out = sum_h softmax(q_h k_h^T / sqrt(d_h) + mask_add) @ (v_h @ Wo[h])

    Mathematically identical to concat(head_h) @ Wo but with NO per-head concat.
    qm/kvm are f32 activation slabs (q at q_off, k at k_off, v at v_off);
    wo is the bf16 (D, D) output projection; mask_add is the hoisted additive mask.
    """
    scale = 1.0 / math.sqrt(D_HEAD)
    qm16 = qm.astype(jnp.bfloat16)
    kvm16 = qm16 if kvm is qm else kvm.astype(jnp.bfloat16)
    out = None
    for h in range(N_HEADS):                      # static unroll (N_HEADS = 4)
        lo = h * D_HEAD
        hi = lo + D_HEAD
        q_h = qm16[:, q_off + lo:q_off + hi]      # (Lq, dh)
        k_h = kvm16[:, k_off + lo:k_off + hi]     # (Lk, dh)
        v_h = kvm16[:, v_off + lo:v_off + hi]     # (Lk, dh)
        s = jax.lax.dot_general(q_h, k_h, (((1,), (1,)), ((), ())),
                                preferred_element_type=jnp.float32) * scale + mask_add
        s = s - jnp.max(s, axis=-1, keepdims=True)
        e = jnp.exp(s)
        # NOTE: approx reciprocal; a fully-masked key row (sum==0) would blow up,
        # but that is unreachable with the pad/causal masks used by this model.
        p = e * pl.reciprocal(jnp.sum(e, axis=-1, keepdims=True), approx=True)
        vw_h = jnp.dot(v_h, wo[lo:hi, :], preferred_element_type=jnp.float32)   # (Lk, D)
        acc = jnp.dot(p.astype(jnp.bfloat16), vw_h.astype(jnp.bfloat16),
                      preferred_element_type=jnp.float32)                       # (Lq, D)
        out = acc if out is None else out + acc
    return out


def _self_attn(x, y, wqkv, bqkv, wo, bo, mask_add):
    # Fused QKV projection: one (L, D) @ (D, 3D) MXU op.
    qkv = jnp.dot(y.astype(jnp.bfloat16), wqkv, preferred_element_type=jnp.float32) + bqkv
    return x + _mha_out(qkv, 0, qkv, D_MODEL, 2 * D_MODEL, wo, mask_add) + bo


def _cross_attn(x, y, mem16, wq, bq, wkv, bkv, wo, bo, mask_add):
    q = jnp.dot(y.astype(jnp.bfloat16), wq, preferred_element_type=jnp.float32) + bq
    kv = jnp.dot(mem16, wkv, preferred_element_type=jnp.float32) + bkv     # (Ls, 2D), fused K/V
    return x + _mha_out(q, 0, kv, 0, D_MODEL, wo, mask_add) + bo


def _ffn(x, y, w1, b1, w2t, b2):
    h = jnp.maximum(jnp.dot(y.astype(jnp.bfloat16), w1,
                            preferred_element_type=jnp.float32) + b1, 0.0)
    # w2 is stored transposed (D, D_FF) so it packs into the 32-row slab; A @ B^T matmul.
    out = jax.lax.dot_general(h.astype(jnp.bfloat16), w2t, (((1,), (1,)), ((), ())),
                              preferred_element_type=jnp.float32)
    return x + out + b2


# ---------------------------------------------------------------------------
# The fused encoder+decoder kernel (one grid step = one batch element)
# ---------------------------------------------------------------------------
def _encdec_kernel(src_ids_ref, tgt_ids_ref, smask_ref, tmask_ref,
                   src_lut_ref, tgt_lut_ref, pe_ref,
                   enc_mat_ref, enc_vec_ref, dec_mat_ref, dec_vec_ref,
                   lnf_ref, o_ref):
    Ls = smask_ref.shape[-1]
    Lt = tmask_ref.shape[-1]
    D = D_MODEL

    # Additive masks, hoisted once per batch element (reused by every head / layer).
    smask_add = (smask_ref[0] - 1.0) * MASK_SCALE        # (1, Ls)
    tmask_add = (tmask_ref[0] - 1.0) * MASK_SCALE        # (Lt, Lt)

    # ---------------- encoder stack ----------------
    x = _embed(src_ids_ref[0], src_lut_ref[...], pe_ref[0:Ls, :])
    for l in range(N_LAYERS):                            # static unroll, weights stay in VMEM
        y = _layer_norm(x, enc_vec_ref[l, 0:1, 0:D], enc_vec_ref[l, 1:2, 0:D])
        x = _self_attn(x, y,
                       enc_mat_ref[l, 0, :, 0:3 * D], enc_vec_ref[l, 2:3, 0:3 * D],
                       enc_mat_ref[l, 1, :, 0:D], enc_vec_ref[l, 3:4, 0:D],
                       smask_add)
        y = _layer_norm(x, enc_vec_ref[l, 4:5, 0:D], enc_vec_ref[l, 5:6, 0:D])
        x = _ffn(x, y,
                 enc_mat_ref[l, 2, :, 0:D_FF], enc_vec_ref[l, 6:7, 0:D_FF],
                 enc_mat_ref[l, 3, :, 0:D_FF], enc_vec_ref[l, 7:8, 0:D])
    # Final encoder LayerNorm -> "memory"; kept local, never written to HBM.
    mem16 = _layer_norm(x, lnf_ref[0:1, :], lnf_ref[1:2, :]).astype(jnp.bfloat16)

    # ---------------- decoder stack ----------------
    x = _embed(tgt_ids_ref[0], tgt_lut_ref[...], pe_ref[0:Lt, :])
    for l in range(N_LAYERS):
        y = _layer_norm(x, dec_vec_ref[l, 0:1, 0:D], dec_vec_ref[l, 1:2, 0:D])
        x = _self_attn(x, y,
                       dec_mat_ref[l, 0, :, 0:3 * D], dec_vec_ref[l, 2:3, 0:3 * D],
                       dec_mat_ref[l, 1, :, 0:D], dec_vec_ref[l, 3:4, 0:D],
                       tmask_add)
        y = _layer_norm(x, dec_vec_ref[l, 4:5, 0:D], dec_vec_ref[l, 5:6, 0:D])
        x = _cross_attn(x, y, mem16,
                        dec_mat_ref[l, 2, :, 0:D], dec_vec_ref[l, 6:7, 0:D],
                        dec_mat_ref[l, 3, :, 0:2 * D], dec_vec_ref[l, 7:8, 0:2 * D],
                        dec_mat_ref[l, 4, :, 0:D], dec_vec_ref[l, 8:9, 0:D],
                        smask_add)
        y = _layer_norm(x, dec_vec_ref[l, 9:10, 0:D], dec_vec_ref[l, 10:11, 0:D])
        x = _ffn(x, y,
                 dec_mat_ref[l, 5, :, 0:D_FF], dec_vec_ref[l, 11:12, 0:D_FF],
                 dec_mat_ref[l, 6, :, 0:D_FF], dec_vec_ref[l, 12:13, 0:D])
    o_ref[0] = _layer_norm(x, lnf_ref[2:3, :], lnf_ref[3:4, :])


# ---------------------------------------------------------------------------
# pallas_call wrapper
# ---------------------------------------------------------------------------
def encoder_decoder_forward(params, src, tgt, src_mask, tgt_mask):
    """EncoderDecoder.forward: decode(encode(src, src_mask), src_mask, tgt, tgt_mask).
    NOTE: the generator is held by the module but not invoked by forward()."""
    B, Ls = src.shape
    _, Lt = tgt.shape
    src_ids = src.astype(jnp.int32).reshape(B, Ls, 1)
    tgt_ids = tgt.astype(jnp.int32).reshape(B, Lt, 1)
    smask = src_mask.astype(jnp.float32).reshape(B, 1, Ls)
    tmask = tgt_mask.astype(jnp.float32).reshape(B, Lt, Lt)

    def full(a):
        nd = a.ndim
        return pl.BlockSpec(a.shape, lambda b, _nd=nd: (0,) * _nd)

    in_specs = [
        pl.BlockSpec((1, Ls, 1), lambda b: (b, 0, 0)),     # src token ids (per batch)
        pl.BlockSpec((1, Lt, 1), lambda b: (b, 0, 0)),     # tgt token ids (per batch)
        pl.BlockSpec((1, 1, Ls), lambda b: (b, 0, 0)),     # src mask      (per batch)
        pl.BlockSpec((1, Lt, Lt), lambda b: (b, 0, 0)),    # tgt mask      (per batch)
        full(params["src_lut"]), full(params["tgt_lut"]), full(params["pe"]),
        full(params["enc_mat"]), full(params["enc_vec"]),
        full(params["dec_mat"]), full(params["dec_vec"]),
        full(params["lnf"]),
    ]
    return pl.pallas_call(
        _encdec_kernel,
        out_shape=jax.ShapeDtypeStruct((B, Lt, D_MODEL), jnp.float32),
        grid=(B,),
        in_specs=in_specs,
        out_specs=pl.BlockSpec((1, Lt, D_MODEL), lambda b: (b, 0, 0)),
        compiler_params=pltpu.CompilerParams(dimension_semantics=("parallel",)),
    )(src_ids, tgt_ids, smask, tmask,
      params["src_lut"], params["tgt_lut"], params["pe"],
      params["enc_mat"], params["enc_vec"],
      params["dec_mat"], params["dec_vec"], params["lnf"])


# ---------------------------------------------------------------------------
# Deterministic parameter initialization + packing into the kernel slabs
# ---------------------------------------------------------------------------
def _linear(key, fan_in, fan_out):
    kw, kb = jax.random.split(key)
    lim = 1.0 / math.sqrt(fan_in)
    w = jax.random.uniform(kw, (fan_in, fan_out), jnp.float32, -lim, lim)
    b = jax.random.uniform(kb, (fan_out,), jnp.float32, -lim, lim)
    return w, b


def _pad_lanes(a, width=LANE):
    return jnp.pad(a, [(0, 0)] * (a.ndim - 1) + [(0, width - a.shape[-1])])


def _pack_mats(mats):
    """Stack (D_MODEL, w<=128) matrices into an (n, D_MODEL, 128) bf16 slab; each
    matrix occupies its own 128-lane segment so in-kernel slices are tile-aligned."""
    return jnp.stack([_pad_lanes(m) for m in mats]).astype(jnp.bfloat16)


def _pack_vecs(vecs, rows):
    """Stack 1-D params into a (rows, 128) f32 slab (one row per parameter)."""
    v = jnp.stack([_pad_lanes(x) for x in vecs])
    return jnp.pad(v, ((0, rows - v.shape[0]), (0, 0)))


def positional_encoding(max_len, d_model):
    pos = jnp.arange(max_len, dtype=jnp.float32)[:, None]
    div = jnp.exp(jnp.arange(0, d_model, 2, dtype=jnp.float32)
                  * -(math.log(10000.0) / d_model))
    pe = jnp.zeros((max_len, d_model), jnp.float32)
    pe = pe.at[:, 0::2].set(jnp.sin(pos * div))
    pe = pe.at[:, 1::2].set(jnp.cos(pos * div))
    return pe


def subsequent_mask(L):
    return jnp.tril(jnp.ones((L, L), jnp.float32))


def init_params(key):
    ks = jax.random.split(key, 4)
    ones = jnp.ones((D_MODEL,), jnp.float32)
    zeros = jnp.zeros((D_MODEL,), jnp.float32)

    def _mha(key):
        kq, kk, kv, ko = jax.random.split(key, 4)
        wq, bq = _linear(kq, D_MODEL, D_MODEL)
        wk, bk = _linear(kk, D_MODEL, D_MODEL)
        wv, bv = _linear(kv, D_MODEL, D_MODEL)
        wo, bo = _linear(ko, D_MODEL, D_MODEL)
        return wq, bq, wk, bk, wv, bv, wo, bo

    enc_mat, enc_vec = [], []
    for k in jax.random.split(ks[0], N_LAYERS):
        ka, kf1, kf2 = jax.random.split(k, 3)
        wq, bq, wk, bk, wv, bv, wo, bo = _mha(ka)
        w1, b1 = _linear(kf1, D_MODEL, D_FF)
        w2, b2 = _linear(kf2, D_FF, D_MODEL)
        wqkv = jnp.concatenate([wq, wk, wv], axis=1)
        bqkv = jnp.concatenate([bq, bk, bv])
        enc_mat.append(_pack_mats([wqkv, wo, w1, w2.T]))
        enc_vec.append(_pack_vecs([ones, zeros, bqkv, bo, ones, zeros, b1, b2],
                                  ENC_VEC_ROWS))

    dec_mat, dec_vec = [], []
    for k in jax.random.split(ks[1], N_LAYERS):
        ksa, kca, kf1, kf2 = jax.random.split(k, 4)
        swq, sbq, swk, sbk, swv, sbv, swo, sbo = _mha(ksa)
        cwq, cbq, cwk, cbk, cwv, cbv, cwo, cbo = _mha(kca)
        w1, b1 = _linear(kf1, D_MODEL, D_FF)
        w2, b2 = _linear(kf2, D_FF, D_MODEL)
        sa_wqkv = jnp.concatenate([swq, swk, swv], axis=1)
        sa_bqkv = jnp.concatenate([sbq, sbk, sbv])
        ca_wkv = jnp.concatenate([cwk, cwv], axis=1)
        ca_bkv = jnp.concatenate([cbk, cbv])
        dec_mat.append(_pack_mats([sa_wqkv, swo, cwq, ca_wkv, cwo, w1, w2.T]))
        dec_vec.append(_pack_vecs([ones, zeros, sa_bqkv, sbo, ones, zeros,
                                   cbq, ca_bkv, cbo, ones, zeros, b1, b2],
                                  DEC_VEC_ROWS))

    return {
        "src_lut": 0.02 * jax.random.normal(ks[2], (SRC_VOCAB, D_MODEL), jnp.float32),
        "tgt_lut": 0.02 * jax.random.normal(ks[3], (TGT_VOCAB, D_MODEL), jnp.float32),
        "pe": positional_encoding(MAX_LEN, D_MODEL),
        "enc_mat": jnp.stack(enc_mat),          # (N_LAYERS, 4, 32, 128) bf16
        "enc_vec": jnp.stack(enc_vec),          # (N_LAYERS, 8, 128)  f32
        "dec_mat": jnp.stack(dec_mat),          # (N_LAYERS, 7, 32, 128) bf16
        "dec_vec": jnp.stack(dec_vec),          # (N_LAYERS, 16, 128) f32
        "lnf": jnp.stack([ones, zeros, ones, zeros]),   # enc LN, dec LN (4, 32) f32
    }


if __name__ == "__main__":
    B, LS, LT = 2, 8, 8
    root = jax.random.PRNGKey(0)
    kp, ksrc, ktgt = jax.random.split(root, 3)

    params = init_params(kp)
    src = jax.random.randint(ksrc, (B, LS), 1, SRC_VOCAB)
    tgt = jax.random.randint(ktgt, (B, LT), 1, TGT_VOCAB)

    # src_mask: (B, 1, Ls) ~ (src != pad).unsqueeze(-2); all-ones here (no padding).
    src_mask = jnp.ones((B, 1, LS), jnp.float32)
    # tgt_mask: (B, Lt, Lt) ~ pad-mask & subsequent (causal) mask.
    tgt_mask = jnp.broadcast_to(subsequent_mask(LT)[None], (B, LT, LT)).astype(jnp.float32)

    fwd = jax.jit(encoder_decoder_forward)
    out = fwd(params, src, tgt, src_mask, tgt_mask)
    out = jax.block_until_ready(out)
    assert out.shape == (B, LT, D_MODEL), out.shape
    assert bool(jnp.all(jnp.isfinite(out)))
    print("KERNEL_OK")
</pallas_src>

<mosaic_0001>
module attributes {stable_mosaic.version = 11 : i64} {
  func.func @_encdec_kernel(%arg0: i32, %arg1: memref<1x8x1xi32, #tpu.memory_space<vmem>>, %arg2: memref<1x8x1xi32, #tpu.memory_space<vmem>>, %arg3: memref<1x1x8xf32, #tpu.memory_space<vmem>>, %arg4: memref<1x8x8xf32, #tpu.memory_space<vmem>>, %arg5: memref<16x32xf32, #tpu.memory_space<vmem>>, %arg6: memref<16x32xf32, #tpu.memory_space<vmem>>, %arg7: memref<64x32xf32, #tpu.memory_space<vmem>>, %arg8: memref<2x4x32x128xbf16, #tpu.memory_space<vmem>>, %arg9: memref<2x8x128xf32, #tpu.memory_space<vmem>>, %arg10: memref<2x7x32x128xbf16, #tpu.memory_space<vmem>>, %arg11: memref<2x16x128xf32, #tpu.memory_space<vmem>>, %arg12: memref<4x32xf32, #tpu.memory_space<vmem>>, %arg13: memref<1x8x32xf32, #tpu.memory_space<vmem>>) attributes {dimension_semantics = [#tpu.dimension_semantics<parallel>], iteration_bounds = array<i64: 2>, scalar_prefetch = 0 : i64, scratch_operands = 0 : i64, tpu.core_type = #tpu.core_type<tc>, window_params = [{transform_indices = @transform_0, window_bounds = array<i64: 1, 8, 1>}, {transform_indices = @transform_1, window_bounds = array<i64: 1, 8, 1>}, {transform_indices = @transform_2, window_bounds = array<i64: 1, 1, 8>}, {transform_indices = @transform_3, window_bounds = array<i64: 1, 8, 8>}, {pipeline_mode = #tpu.pipeline_mode<synchronous>, transform_indices = @transform_4, window_bounds = array<i64: 16, 32>}, {pipeline_mode = #tpu.pipeline_mode<synchronous>, transform_indices = @transform_5, window_bounds = array<i64: 16, 32>}, {pipeline_mode = #tpu.pipeline_mode<synchronous>, transform_indices = @transform_6, window_bounds = array<i64: 64, 32>}, {pipeline_mode = #tpu.pipeline_mode<synchronous>, transform_indices = @transform_7, window_bounds = array<i64: 2, 4, 32, 128>}, {pipeline_mode = #tpu.pipeline_mode<synchronous>, transform_indices = @transform_8, window_bounds = array<i64: 2, 8, 128>}, {pipeline_mode = #tpu.pipeline_mode<synchronous>, transform_indices = @transform_9, window_bounds = array<i64: 2, 7, 32, 128>}, {pipeline_mode = #tpu.pipeline_mode<synchronous>, transform_indices = @transform_10, window_bounds = array<i64: 2, 16, 128>}, {pipeline_mode = #tpu.pipeline_mode<synchronous>, transform_indices = @transform_11, window_bounds = array<i64: 4, 32>}, {transform_indices = @transform_12, window_bounds = array<i64: 1, 8, 32>}]} {
    %c0 = arith.constant 0 : index
    %c0_0 = arith.constant 0 : index
    %c0_1 = arith.constant 0 : index
    %0 = vector.load %arg3[%c0, %c0_0, %c0_1] : memref<1x1x8xf32, #tpu.memory_space<vmem>>, vector<1x1x8xf32>
    %1 = vector.shape_cast %0 : vector<1x1x8xf32> to vector<1x8xf32>
    %cst = arith.constant 1.000000e+00 : f32
    %2 = vector.broadcast %cst : f32 to vector<1x8xf32>
    %3 = arith.subf %1, %2 : vector<1x8xf32>
    %cst_2 = arith.constant 1.000000e+09 : f32
    %4 = vector.broadcast %cst_2 : f32 to vector<1x8xf32>
    %5 = arith.mulf %3, %4 : vector<1x8xf32>
    %c0_3 = arith.constant 0 : index
    %c0_4 = arith.constant 0 : index
    %c0_5 = arith.constant 0 : index
    %6 = vector.load %arg4[%c0_3, %c0_4, %c0_5] : memref<1x8x8xf32, #tpu.memory_space<vmem>>, vector<1x8x8xf32>
    %7 = vector.shape_cast %6 : vector<1x8x8xf32> to vector<8x8xf32>
    %cst_6 = arith.constant 1.000000e+00 : f32
    %8 = vector.broadcast %cst_6 : f32 to vector<8x8xf32>
    %9 = arith.subf %7, %8 : vector<8x8xf32>
    %cst_7 = arith.constant 1.000000e+09 : f32
    %10 = vector.broadcast %cst_7 : f32 to vector<8x8xf32>
    %11 = arith.mulf %9, %10 : vector<8x8xf32>
    %c0_8 = arith.constant 0 : index
    %c0_9 = arith.constant 0 : index
    %c0_10 = arith.constant 0 : index
    %12 = vector.load %arg1[%c0_8, %c0_9, %c0_10] : memref<1x8x1xi32, #tpu.memory_space<vmem>>, vector<1x8x1xi32>
    %13 = vector.shape_cast %12 : vector<1x8x1xi32> to vector<8x1xi32>
    %c0_11 = arith.constant 0 : index
    %c0_12 = arith.constant 0 : index
    %14 = vector.load %arg5[%c0_11, %c0_12] : memref<16x32xf32, #tpu.memory_space<vmem>>, vector<16x32xf32>
    %c0_13 = arith.constant 0 : index
    %c0_14 = arith.constant 0 : index
    %15 = vector.load %arg7[%c0_13, %c0_14] : memref<64x32xf32, #tpu.memory_space<vmem>>, vector<8x32xf32>
    %16 = tpu.iota {dimensions = array<i32: 1>} : vector<8x16xi32>
    %17 = vector.broadcast %13 : vector<8x1xi32> to vector<8x16xi32>
    %18 = arith.cmpi eq, %17, %16 : vector<8x16xi32>
    %19 = arith.extui %18 : vector<8x16xi1> to vector<8x16xi32>
    %20 = arith.sitofp %19 : vector<8x16xi32> to vector<8x16xf32>
    %cst_15 = arith.constant dense<0.000000e+00> : vector<8x32xf32>
    %21 = tpu.matmul %20, %14, %cst_15 {dimension_numbers = #tpu.dot_dimension_numbers<[1], [0], [0], [1], [0, 0, 1, 1], [], []>} : vector<8x16xf32>, vector<16x32xf32>, vector<8x32xf32> -> vector<8x32xf32>
    %cst_16 = arith.constant 5.65685415 : f32
    %22 = vector.broadcast %cst_16 : f32 to vector<8x32xf32>
    %23 = arith.mulf %21, %22 : vector<8x32xf32>
    %24 = arith.addf %23, %15 : vector<8x32xf32>
    %c0_17 = arith.constant 0 : index
    %c0_18 = arith.constant 0 : index
    %c0_19 = arith.constant 0 : index
    %25 = vector.load %arg9[%c0_17, %c0_18, %c0_19] : memref<2x8x128xf32, #tpu.memory_space<vmem>>, vector<1x1x32xf32>
    %26 = vector.shape_cast %25 : vector<1x1x32xf32> to vector<1x32xf32>
    %c0_20 = arith.constant 0 : index
    %c1 = arith.constant 1 : index
    %c0_21 = arith.constant 0 : index
    %27 = vector.load %arg9[%c0_20, %c1, %c0_21] : memref<2x8x128xf32, #tpu.memory_space<vmem>>, vector<1x1x32xf32>
    %28 = vector.shape_cast %27 : vector<1x1x32xf32> to vector<1x32xf32>
    %cst_22 = arith.constant dense<0.000000e+00> : vector<8xf32>
    %29 = vector.multi_reduction <add>, %24, %cst_22 [1] : vector<8x32xf32> to vector<8xf32>
    %30 = vector.shape_cast %29 : vector<8xf32> to vector<8x1xf32>
    %cst_23 = arith.constant 3.200000e+01 : f32
    %31 = vector.broadcast %cst_23 : f32 to vector<8x1xf32>
    %32 = arith.divf %30, %31 : vector<8x1xf32>
    %33 = vector.broadcast %32 : vector<8x1xf32> to vector<8x32xf32>
    %34 = arith.subf %24, %33 : vector<8x32xf32>
    %35 = arith.mulf %34, %34 : vector<8x32xf32>
    %cst_24 = arith.constant dense<0.000000e+00> : vector<8xf32>
    %36 = vector.multi_reduction <add>, %35, %cst_24 [1] : vector<8x32xf32> to vector<8xf32>
    %37 = vector.shape_cast %36 : vector<8xf32> to vector<8x1xf32>
    %cst_25 = arith.constant 0.0322580636 : f32
    %38 = vector.broadcast %cst_25 : f32 to vector<8x1xf32>
    %39 = arith.mulf %37, %38 : vector<8x1xf32>
    %40 = math.sqrt %39 : vector<8x1xf32>
    %cst_26 = arith.constant 9.99999997E-7 : f32
    %41 = vector.broadcast %cst_26 : f32 to vector<8x1xf32>
    %42 = arith.addf %40, %41 : vector<8x1xf32>
    %43 = tpu.reciprocal %42 {approx = true} : vector<8x1xf32> -> vector<8x1xf32>
    %44 = vector.broadcast %32 : vector<8x1xf32> to vector<8x32xf32>
    %45 = arith.subf %24, %44 : vector<8x32xf32>
    %46 = vector.broadcast %26 : vector<1x32xf32> to vector<8x32xf32>
    %47 = arith.mulf %46, %45 : vector<8x32xf32>
    %48 = vector.broadcast %43 : vector<8x1xf32> to vector<8x32xf32>
    %49 = arith.mulf %47, %48 : vector<8x32xf32>
    %50 = vector.broadcast %28 : vector<1x32xf32> to vector<8x32xf32>
    %51 = arith.addf %49, %50 : vector<8x32xf32>
    %c0_27 = arith.constant 0 : index
    %c0_28 = arith.constant 0 : index
    %c0_29 = arith.constant 0 : index
    %c0_30 = arith.constant 0 : index
    %52 = vector.load %arg8[%c0_27, %c0_28, %c0_29, %c0_30] : memref<2x4x32x128xbf16, #tpu.memory_space<vmem>>, vector<1x1x32x96xbf16>
    %53 = vector.shape_cast %52 : vector<1x1x32x96xbf16> to vector<32x96xbf16>
    %c0_31 = arith.constant 0 : index
    %c2 = arith.constant 2 : index
    %c0_32 = arith.constant 0 : index
    %54 = vector.load %arg9[%c0_31, %c2, %c0_32] : memref<2x8x128xf32, #tpu.memory_space<vmem>>, vector<1x1x96xf32>
    %55 = vector.shape_cast %54 : vector<1x1x96xf32> to vector<1x96xf32>
    %c0_33 = arith.constant 0 : index
    %c1_34 = arith.constant 1 : index
    %c0_35 = arith.constant 0 : index
    %c0_36 = arith.constant 0 : index
    %56 = vector.load %arg8[%c0_33, %c1_34, %c0_35, %c0_36] : memref<2x4x32x128xbf16, #tpu.memory_space<vmem>>, vector<1x1x32x32xbf16>
    %57 = vector.shape_cast %56 : vector<1x1x32x32xbf16> to vector<32x32xbf16>
    %c0_37 = arith.constant 0 : index
    %c3 = arith.constant 3 : index
    %c0_38 = arith.constant 0 : index
    %58 = vector.load %arg9[%c0_37, %c3, %c0_38] : memref<2x8x128xf32, #tpu.memory_space<vmem>>, vector<1x1x32xf32>
    %59 = vector.shape_cast %58 : vector<1x1x32xf32> to vector<1x32xf32>
    %60 = arith.truncf %51 : vector<8x32xf32> to vector<8x32xbf16>
    %cst_39 = arith.constant dense<0.000000e+00> : vector<8x96xf32>
    %61 = tpu.matmul %60, %53, %cst_39 {dimension_numbers = #tpu.dot_dimension_numbers<[1], [0], [0], [1], [0, 0, 1, 1], [], []>} : vector<8x32xbf16>, vector<32x96xbf16>, vector<8x96xf32> -> vector<8x96xf32>
    %62 = vector.broadcast %55 : vector<1x96xf32> to vector<8x96xf32>
    %63 = arith.addf %61, %62 : vector<8x96xf32>
    %64 = arith.truncf %63 : vector<8x96xf32> to vector<8x96xbf16>
    %65 = vector.extract_strided_slice %64 {offsets = [0, 0], sizes = [8, 8], strides = [1, 1]} : vector<8x96xbf16> to vector<8x8xbf16>
    %66 = vector.extract_strided_slice %64 {offsets = [0, 32], sizes = [8, 8], strides = [1, 1]} : vector<8x96xbf16> to vector<8x8xbf16>
    %67 = vector.extract_strided_slice %64 {offsets = [0, 64], sizes = [8, 8], strides = [1, 1]} : vector<8x96xbf16> to vector<8x8xbf16>
    %cst_40 = arith.constant dense<0.000000e+00> : vector<8x8xf32>
    %68 = tpu.matmul %65, %66, %cst_40 {dimension_numbers = #tpu.dot_dimension_numbers<[1], [1], [0], [0], [0, 0, 1, 0], [], []>} : vector<8x8xbf16>, vector<8x8xbf16>, vector<8x8xf32> -> vector<8x8xf32>
    %cst_41 = arith.constant 0.353553385 : f32
    %69 = vector.broadcast %cst_41 : f32 to vector<8x8xf32>
    %70 = arith.mulf %68, %69 : vector<8x8xf32>
    %71 = vector.broadcast %5 : vector<1x8xf32> to vector<8x8xf32>
    %72 = arith.addf %70, %71 : vector<8x8xf32>
    %cst_42 = arith.constant dense<0xFF800000> : vector<8xf32>
    %73 = vector.multi_reduction <maximumf>, %72, %cst_42 [1] : vector<8x8xf32> to vector<8xf32>
    %74 = vector.shape_cast %73 : vector<8xf32> to vector<8x1xf32>
    %75 = vector.broadcast %74 : vector<8x1xf32> to vector<8x8xf32>
    %76 = arith.subf %72, %75 : vector<8x8xf32>
    %77 = math.exp %76 : vector<8x8xf32>
    %cst_43 = arith.constant dense<0.000000e+00> : vector<8xf32>
    %78 = vector.multi_reduction <add>, %77, %cst_43 [1] : vector<8x8xf32> to vector<8xf32>
    %79 = vector.shape_cast %78 : vector<8xf32> to vector<8x1xf32>
    %80 = tpu.reciprocal %79 {approx = true} : vector<8x1xf32> -> vector<8x1xf32>
    %81 = vector.broadcast %80 : vector<8x1xf32> to vector<8x8xf32>
    %82 = arith.mulf %77, %81 : vector<8x8xf32>
    %83 = vector.extract_strided_slice %57 {offsets = [0, 0], sizes = [8, 32], strides = [1, 1]} : vector<32x32xbf16> to vector<8x32xbf16>
    %cst_44 = arith.constant dense<0.000000e+00> : vector<8x32xf32>
    %84 = tpu.matmul %67, %83, %cst_44 {dimension_numbers = #tpu.dot_dimension_numbers<[1], [0], [0], [1], [0, 0, 1, 1], [], []>} : vector<8x8xbf16>, vector<8x32xbf16>, vector<8x32xf32> -> vector<8x32xf32>
    %85 = arith.truncf %82 : vector<8x8xf32> to vector<8x8xbf16>
    %86 = arith.truncf %84 : vector<8x32xf32> to vector<8x32xbf16>
    %cst_45 = arith.constant dense<0.000000e+00> : vector<8x32xf32>
    %87 = tpu.matmul %85, %86, %cst_45 {dimension_numbers = #tpu.dot_dimension_numbers<[1], [0], [0], [1], [0, 0, 1, 1], [], []>} : vector<8x8xbf16>, vector<8x32xbf16>, vector<8x32xf32> -> vector<8x32xf32>
    %88 = vector.extract_strided_slice %64 {offsets = [0, 8], sizes = [8, 8], strides = [1, 1]} : vector<8x96xbf16> to vector<8x8xbf16>
    %89 = vector.extract_strided_slice %64 {offsets = [0, 40], sizes = [8, 8], strides = [1, 1]} : vector<8x96xbf16> to vector<8x8xbf16>
    %90 = vector.extract_strided_slice %64 {offsets = [0, 72], sizes = [8, 8], strides = [1, 1]} : vector<8x96xbf16> to vector<8x8xbf16>
    %cst_46 = arith.constant dense<0.000000e+00> : vector<8x8xf32>
    %91 = tpu.matmul %88, %89, %cst_46 {dimension_numbers = #tpu.dot_dimension_numbers<[1], [1], [0], [0], [0, 0, 1, 0], [], []>} : vector<8x8xbf16>, vector<8x8xbf16>, vector<8x8xf32> -> vector<8x8xf32>
    %cst_47 = arith.constant 0.353553385 : f32
    %92 = vector.broadcast %cst_47 : f32 to vector<8x8xf32>
    %93 = arith.mulf %91, %92 : vector<8x8xf32>
    %94 = vector.broadcast %5 : vector<1x8xf32> to vector<8x8xf32>
    %95 = arith.addf %93, %94 : vector<8x8xf32>
    %cst_48 = arith.constant dense<0xFF800000> : vector<8xf32>
    %96 = vector.multi_reduction <maximumf>, %95, %cst_48 [1] : vector<8x8xf32> to vector<8xf32>
    %97 = vector.shape_cast %96 : vector<8xf32> to vector<8x1xf32>
    %98 = vector.broadcast %97 : vector<8x1xf32> to vector<8x8xf32>
    %99 = arith.subf %95, %98 : vector<8x8xf32>
    %100 = math.exp %99 : vector<8x8xf32>
    %cst_49 = arith.constant dense<0.000000e+00> : vector<8xf32>
    %101 = vector.multi_reduction <add>, %100, %cst_49 [1] : vector<8x8xf32> to vector<8xf32>
    %102 = vector.shape_cast %101 : vector<8xf32> to vector<8x1xf32>
    %103 = tpu.reciprocal %102 {approx = true} : vector<8x1xf32> -> vector<8x1xf32>
    %104 = vector.broadcast %103 : vector<8x1xf32> to vector<8x8xf32>
    %105 = arith.mulf %100, %104 : vector<8x8xf32>
    %106 = vector.extract_strided_slice %57 {offsets = [8, 0], sizes = [8, 32], strides = [1, 1]} : vector<32x32xbf16> to vector<8x32xbf16>
    %cst_50 = arith.constant dense<0.000000e+00> : vector<8x32xf32>
    %107 = tpu.matmul %90, %106, %cst_50 {dimension_numbers = #tpu.dot_dimension_numbers<[1], [0], [0], [1], [0, 0, 1, 1], [], []>} : vector<8x8xbf16>, vector<8x32xbf16>, vector<8x32xf32> -> vector<8x32xf32>
    %108 = arith.truncf %105 : vector<8x8xf32> to vector<8x8xbf16>
    %109 = arith.truncf %107 : vector<8x32xf32> to vector<8x32xbf16>
    %cst_51 = arith.constant dense<0.000000e+00> : vector<8x32xf32>
    %110 = tpu.matmul %108, %109, %cst_51 {dimension_numbers = #tpu.dot_dimension_numbers<[1], [0], [0], [1], [0, 0, 1, 1], [], []>} : vector<8x8xbf16>, vector<8x32xbf16>, vector<8x32xf32> -> vector<8x32xf32>
    %111 = arith.addf %87, %110 : vector<8x32xf32>
    %112 = vector.extract_strided_slice %64 {offsets = [0, 16], sizes = [8, 8], strides = [1, 1]} : vector<8x96xbf16> to vector<8x8xbf16>
    %113 = vector.extract_strided_slice %64 {offsets = [0, 48], sizes = [8, 8], strides = [1, 1]} : vector<8x96xbf16> to vector<8x8xbf16>
    %114 = vector.extract_strided_slice %64 {offsets = [0, 80], sizes = [8, 8], strides = [1, 1]} : vector<8x96xbf16> to vector<8x8xbf16>
    %cst_52 = arith.constant dense<0.000000e+00> : vector<8x8xf32>
    %115 = tpu.matmul %112, %113, %cst_52 {dimension_numbers = #tpu.dot_dimension_numbers<[1], [1], [0], [0], [0, 0, 1, 0], [], []>} : vector<8x8xbf16>, vector<8x8xbf16>, vector<8x8xf32> -> vector<8x8xf32>
    %cst_53 = arith.constant 0.353553385 : f32
    %116 = vector.broadcast %cst_53 : f32 to vector<8x8xf32>
    %117 = arith.mulf %115, %116 : vector<8x8xf32>
    %118 = vector.broadcast %5 : vector<1x8xf32> to vector<8x8xf32>
    %119 = arith.addf %117, %118 : vector<8x8xf32>
    %cst_54 = arith.constant dense<0xFF800000> : vector<8xf32>
    %120 = vector.multi_reduction <maximumf>, %119, %cst_54 [1] : vector<8x8xf32> to vector<8xf32>
    %121 = vector.shape_cast %120 : vector<8xf32> to vector<8x1xf32>
    %122 = vector.broadcast %121 : vector<8x1xf32> to vector<8x8xf32>
    %123 = arith.subf %119, %122 : vector<8x8xf32>
    %124 = math.exp %123 : vector<8x8xf32>
    %cst_55 = arith.constant dense<0.000000e+00> : vector<8xf32>
    %125 = vector.multi_reduction <add>, %124, %cst_55 [1] : vector<8x8xf32> to vector<8xf32>
    %126 = vector.shape_cast %125 : vector<8xf32> to vector<8x1xf32>
    %127 = tpu.reciprocal %126 {approx = true} : vector<8x1xf32> -> vector<8x1xf32>
    %128 = vector.broadcast %127 : vector<8x1xf32> to vector<8x8xf32>
    %129 = arith.mulf %124, %128 : vector<8x8xf32>
    %130 = vector.extract_strided_slice %57 {offsets = [16, 0], sizes = [8, 32], strides = [1, 1]} : vector<32x32xbf16> to vector<8x32xbf16>
    %cst_56 = arith.constant dense<0.000000e+00> : vector<8x32xf32>
    %131 = tpu.matmul %114, %130, %cst_56 {dimension_numbers = #tpu.dot_dimension_numbers<[1], [0], [0], [1], [0, 0, 1, 1], [], []>} : vector<8x8xbf16>, vector<8x32xbf16>, vector<8x32xf32> -> vector<8x32xf32>
    %132 = arith.truncf %129 : vector<8x8xf32> to vector<8x8xbf16>
    %133 = arith.truncf %131 : vector<8x32xf32> to vector<8x32xbf16>
    %cst_57 = arith.constant dense<0.000000e+00> : vector<8x32xf32>
    %134 = tpu.matmul %132, %133, %cst_57 {dimension_numbers = #tpu.dot_dimension_numbers<[1], [0], [0], [1], [0, 0, 1, 1], [], []>} : vector<8x8xbf16>, vector<8x32xbf16>, vector<8x32xf32> -> vector<8x32xf32>
    %135 = arith.addf %111, %134 : vector<8x32xf32>
    %136 = vector.extract_strided_slice %64 {offsets = [0, 24], sizes = [8, 8], strides = [1, 1]} : vector<8x96xbf16> to vector<8x8xbf16>
    %137 = vector.extract_strided_slice %64 {offsets = [0, 56], sizes = [8, 8], strides = [1, 1]} : vector<8x96xbf16> to vector<8x8xbf16>
    %138 = vector.extract_strided_slice %64 {offsets = [0, 88], sizes = [8, 8], strides = [1, 1]} : vector<8x96xbf16> to vector<8x8xbf16>
    %cst_58 = arith.constant dense<0.000000e+00> : vector<8x8xf32>
    %139 = tpu.matmul %136, %137, %cst_58 {dimension_numbers = #tpu.dot_dimension_numbers<[1], [1], [0], [0], [0, 0, 1, 0], [], []>} : vector<8x8xbf16>, vector<8x8xbf16>, vector<8x8xf32> -> vector<8x8xf32>
    %cst_59 = arith.constant 0.353553385 : f32
    %140 = vector.broadcast %cst_59 : f32 to vector<8x8xf32>
    %141 = arith.mulf %139, %140 : vector<8x8xf32>
    %142 = vector.broadcast %5 : vector<1x8xf32> to vector<8x8xf32>
    %143 = arith.addf %141, %142 : vector<8x8xf32>
    %cst_60 = arith.constant dense<0xFF800000> : vector<8xf32>
    %144 = vector.multi_reduction <maximumf>, %143, %cst_60 [1] : vector<8x8xf32> to vector<8xf32>
    %145 = vector.shape_cast %144 : vector<8xf32> to vector<8x1xf32>
    %146 = vector.broadcast %145 : vector<8x1xf32> to vector<8x8xf32>
    %147 = arith.subf %143, %146 : vector<8x8xf32>
    %148 = math.exp %147 : vector<8x8xf32>
    %cst_61 = arith.constant dense<0.000000e+00> : vector<8xf32>
    %149 = vector.multi_reduction <add>, %148, %cst_61 [1] : vector<8x8xf32> to vector<8xf32>
    %150 = vector.shape_cast %149 : vector<8xf32> to vector<8x1xf32>
    %151 = tpu.reciprocal %150 {approx = true} : vector<8x1xf32> -> vector<8x1xf32>
    %152 = vector.broadcast %151 : vector<8x1xf32> to vector<8x8xf32>
    %153 = arith.mulf %148, %152 : vector<8x8xf32>
    %154 = vector.extract_strided_slice %57 {offsets = [24, 0], sizes = [8, 32], strides = [1, 1]} : vector<32x32xbf16> to vector<8x32xbf16>
    %cst_62 = arith.constant dense<0.000000e+00> : vector<8x32xf32>
    %155 = tpu.matmul %138, %154, %cst_62 {dimension_numbers = #tpu.dot_dimension_numbers<[1], [0], [0], [1], [0, 0, 1, 1], [], []>} : vector<8x8xbf16>, vector<8x32xbf16>, vector<8x32xf32> -> vector<8x32xf32>
    %156 = arith.truncf %153 : vector<8x8xf32> to vector<8x8xbf16>
    %157 = arith.truncf %155 : vector<8x32xf32> to vector<8x32xbf16>
    %cst_63 = arith.constant dense<0.000000e+00> : vector<8x32xf32>
    %158 = tpu.matmul %156, %157, %cst_63 {dimension_numbers = #tpu.dot_dimension_numbers<[1], [0], [0], [1], [0, 0, 1, 1], [], []>} : vector<8x8xbf16>, vector<8x32xbf16>, vector<8x32xf32> -> vector<8x32xf32>
    %159 = arith.addf %135, %158 : vector<8x32xf32>
    %160 = arith.addf %24, %159 : vector<8x32xf32>
    %161 = vector.broadcast %59 : vector<1x32xf32> to vector<8x32xf32>
    %162 = arith.addf %160, %161 : vector<8x32xf32>
    %c0_64 = arith.constant 0 : index
    %c4 = arith.constant 4 : index
    %c0_65 = arith.constant 0 : index
    %163 = vector.load %arg9[%c0_64, %c4, %c0_65] : memref<2x8x128xf32, #tpu.memory_space<vmem>>, vector<1x1x32xf32>
    %164 = vector.shape_cast %163 : vector<1x1x32xf32> to vector<1x32xf32>
    %c0_66 = arith.constant 0 : index
    %c5 = arith.constant 5 : index
    %c0_67 = arith.constant 0 : index
    %165 = vector.load %arg9[%c0_66, %c5, %c0_67] : memref<2x8x128xf32, #tpu.memory_space<vmem>>, vector<1x1x32xf32>
    %166 = vector.shape_cast %165 : vector<1x1x32xf32> to vector<1x32xf32>
    %cst_68 = arith.constant dense<0.000000e+00> : vector<8xf32>
    %167 = vector.multi_reduction <add>, %162, %cst_68 [1] : vector<8x32xf32> to vector<8xf32>
    %168 = vector.shape_cast %167 : vector<8xf32> to vector<8x1xf32>
    %cst_69 = arith.constant 3.200000e+01 : f32
    %169 = vector.broadcast %cst_69 : f32 to vector<8x1xf32>
    %170 = arith.divf %168, %169 : vector<8x1xf32>
    %171 = vector.broadcast %170 : vector<8x1xf32> to vector<8x32xf32>
    %172 = arith.subf %162, %171 : vector<8x32xf32>
    %173 = arith.mulf %172, %172 : vector<8x32xf32>
    %cst_70 = arith.constant dense<0.000000e+00> : vector<8xf32>
    %174 = vector.multi_reduction <add>, %173, %cst_70 [1] : vector<8x32xf32> to vector<8xf32>
    %175 = vector.shape_cast %174 : vector<8xf32> to vector<8x1xf32>
    %cst_71 = arith.constant 0.0322580636 : f32
    %176 = vector.broadcast %cst_71 : f32 to vector<8x1xf32>
    %177 = arith.mulf %175, %176 : vector<8x1xf32>
    %178 = math.sqrt %177 : vector<8x1xf32>
    %cst_72 = arith.constant 9.99999997E-7 : f32
    %179 = vector.broadcast %cst_72 : f32 to vector<8x1xf32>
    %180 = arith.addf %178, %179 : vector<8x1xf32>
    %181 = tpu.reciprocal %180 {approx = true} : vector<8x1xf32> -> vector<8x1xf32>
    %182 = vector.broadcast %170 : vector<8x1xf32> to vector<8x32xf32>
    %183 = arith.subf %162, %182 : vector<8x32xf32>
    %184 = vector.broadcast %164 : vector<1x32xf32> to vector<8x32xf32>
    %185 = arith.mulf %184, %183 : vector<8x32xf32>
    %186 = vector.broadcast %181 : vector<8x1xf32> to vector<8x32xf32>
    %187 = arith.mulf %185, %186 : vector<8x32xf32>
    %188 = vector.broadcast %166 : vector<1x32xf32> to vector<8x32xf32>
    %189 = arith.addf %187, %188 : vector<8x32xf32>
    %c0_73 = arith.constant 0 : index
    %c2_74 = arith.constant 2 : index
    %c0_75 = arith.constant 0 : index
    %c0_76 = arith.constant 0 : index
    %190 = vector.load %arg8[%c0_73, %c2_74, %c0_75, %c0_76] : memref<2x4x32x128xbf16, #tpu.memory_space<vmem>>, vector<1x1x32x64xbf16>
    %191 = vector.shape_cast %190 : vector<1x1x32x64xbf16> to vector<32x64xbf16>
    %c0_77 = arith.constant 0 : index
    %c6 = arith.constant 6 : index
    %c0_78 = arith.constant 0 : index
    %192 = vector.load %arg9[%c0_77, %c6, %c0_78] : memref<2x8x128xf32, #tpu.memory_space<vmem>>, vector<1x1x64xf32>
    %193 = vector.shape_cast %192 : vector<1x1x64xf32> to vector<1x64xf32>
    %c0_79 = arith.constant 0 : index
    %c3_80 = arith.constant 3 : index
    %c0_81 = arith.constant 0 : index
    %c0_82 = arith.constant 0 : index
    %194 = vector.load %arg8[%c0_79, %c3_80, %c0_81, %c0_82] : memref<2x4x32x128xbf16, #tpu.memory_space<vmem>>, vector<1x1x32x64xbf16>
    %195 = vector.shape_cast %194 : vector<1x1x32x64xbf16> to vector<32x64xbf16>
    %c0_83 = arith.constant 0 : index
    %c7 = arith.constant 7 : index
    %c0_84 = arith.constant 0 : index
    %196 = vector.load %arg9[%c0_83, %c7, %c0_84] : memref<2x8x128xf32, #tpu.memory_space<vmem>>, vector<1x1x32xf32>
    %197 = vector.shape_cast %196 : vector<1x1x32xf32> to vector<1x32xf32>
    %198 = arith.truncf %189 : vector<8x32xf32> to vector<8x32xbf16>
    %cst_85 = arith.constant dense<0.000000e+00> : vector<8x64xf32>
    %199 = tpu.matmul %198, %191, %cst_85 {dimension_numbers = #tpu.dot_dimension_numbers<[1], [0], [0], [1], [0, 0, 1, 1], [], []>} : vector<8x32xbf16>, vector<32x64xbf16>, vector<8x64xf32> -> vector<8x64xf32>
    %200 = vector.broadcast %193 : vector<1x64xf32> to vector<8x64xf32>
    %201 = arith.addf %199, %200 : vector<8x64xf32>
    %cst_86 = arith.constant 0.000000e+00 : f32
    %202 = vector.broadcast %cst_86 : f32 to vector<8x64xf32>
    %203 = arith.maximumf %201, %202 : vector<8x64xf32>
    %204 = arith.truncf %203 : vector<8x64xf32> to vector<8x64xbf16>
    %cst_87 = arith.constant dense<0.000000e+00> : vector<8x32xf32>
    %205 = tpu.matmul %204, %195, %cst_87 {dimension_numbers = #tpu.dot_dimension_numbers<[1], [1], [0], [0], [0, 0, 1, 0], [], []>} : vector<8x64xbf16>, vector<32x64xbf16>, vector<8x32xf32> -> vector<8x32xf32>
    %206 = arith.addf %162, %205 : vector<8x32xf32>
    %207 = vector.broadcast %197 : vector<1x32xf32> to vector<8x32xf32>
    %208 = arith.addf %206, %207 : vector<8x32xf32>
    %c1_88 = arith.constant 1 : index
    %c0_89 = arith.constant 0 : index
    %c0_90 = arith.constant 0 : index
    %209 = vector.load %arg9[%c1_88, %c0_89, %c0_90] : memref<2x8x128xf32, #tpu.memory_space<vmem>>, vector<1x1x32xf32>
    %210 = vector.shape_cast %209 : vector<1x1x32xf32> to vector<1x32xf32>
    %c1_91 = arith.constant 1 : index
    %c1_92 = arith.constant 1 : index
    %c0_93 = arith.constant 0 : index
    %211 = vector.load %arg9[%c1_91, %c1_92, %c0_93] : memref<2x8x128xf32, #tpu.memory_space<vmem>>, vector<1x1x32xf32>
    %212 = vector.shape_cast %211 : vector<1x1x32xf32> to vector<1x32xf32>
    %cst_94 = arith.constant dense<0.000000e+00> : vector<8xf32>
    %213 = vector.multi_reduction <add>, %208, %cst_94 [1] : vector<8x32xf32> to vector<8xf32>
    %214 = vector.shape_cast %213 : vector<8xf32> to vector<8x1xf32>
    %cst_95 = arith.constant 3.200000e+01 : f32
    %215 = vector.broadcast %cst_95 : f32 to vector<8x1xf32>
    %216 = arith.divf %214, %215 : vector<8x1xf32>
    %217 = vector.broadcast %216 : vector<8x1xf32> to vector<8x32xf32>
    %218 = arith.subf %208, %217 : vector<8x32xf32>
    %219 = arith.mulf %218, %218 : vector<8x32xf32>
    %cst_96 = arith.constant dense<0.000000e+00> : vector<8xf32>
    %220 = vector.multi_reduction <add>, %219, %cst_96 [1] : vector<8x32xf32> to vector<8xf32>
    %221 = vector.shape_cast %220 : vector<8xf32> to vector<8x1xf32>
    %cst_97 = arith.constant 0.0322580636 : f32
    %222 = vector.broadcast %cst_97 : f32 to vector<8x1xf32>
    %223 = arith.mulf %221, %222 : vector<8x1xf32>
    %224 = math.sqrt %223 : vector<8x1xf32>
    %cst_98 = arith.constant 9.99999997E-7 : f32
    %225 = vector.broadcast %cst_98 : f32 to vector<8x1xf32>
    %226 = arith.addf %224, %225 : vector<8x1xf32>
    %227 = tpu.reciprocal %226 {approx = true} : vector<8x1xf32> -> vector<8x1xf32>
    %228 = vector.broadcast %216 : vector<8x1xf32> to vector<8x32xf32>
    %229 = arith.subf %208, %228 : vector<8x32xf32>
    %230 = vector.broadcast %210 : vector<1x32xf32> to vector<8x32xf32>
    %231 = arith.mulf %230, %229 : vector<8x32xf32>
    %232 = vector.broadcast %227 : vector<8x1xf32> to vector<8x32xf32>
    %233 = arith.mulf %231, %232 : vector<8x32xf32>
    %234 = vector.broadcast %212 : vector<1x32xf32> to vector<8x32xf32>
    %235 = arith.addf %233, %234 : vector<8x32xf32>
    %c1_99 = arith.constant 1 : index
    %c0_100 = arith.constant 0 : index
    %c0_101 = arith.constant 0 : index
    %c0_102 = arith.constant 0 : index
    %236 = vector.load %arg8[%c1_99, %c0_100, %c0_101, %c0_102] : memref<2x4x32x128xbf16, #tpu.memory_space<vmem>>, vector<1x1x32x96xbf16>
    %237 = vector.shape_cast %236 : vector<1x1x32x96xbf16> to vector<32x96xbf16>
    %c1_103 = arith.constant 1 : index
    %c2_104 = arith.constant 2 : index
    %c0_105 = arith.constant 0 : index
    %238 = vector.load %arg9[%c1_103, %c2_104, %c0_105] : memref<2x8x128xf32, #tpu.memory_space<vmem>>, vector<1x1x96xf32>
    %239 = vector.shape_cast %238 : vector<1x1x96xf32> to vector<1x96xf32>
    %c1_106 = arith.constant 1 : index
    %c1_107 = arith.constant 1 : index
    %c0_108 = arith.constant 0 : index
    %c0_109 = arith.constant 0 : index
    %240 = vector.load %arg8[%c1_106, %c1_107, %c0_108, %c0_109] : memref<2x4x32x128xbf16, #tpu.memory_space<vmem>>, vector<1x1x32x32xbf16>
    %241 = vector.shape_cast %240 : vector<1x1x32x32xbf16> to vector<32x32xbf16>
    %c1_110 = arith.constant 1 : index
    %c3_111 = arith.constant 3 : index
    %c0_112 = arith.constant 0 : index
    %242 = vector.load %arg9[%c1_110, %c3_111, %c0_112] : memref<2x8x128xf32, #tpu.memory_space<vmem>>, vector<1x1x32xf32>
    %243 = vector.shape_cast %242 : vector<1x1x32xf32> to vector<1x32xf32>
    %244 = arith.truncf %235 : vector<8x32xf32> to vector<8x32xbf16>
    %cst_113 = arith.constant dense<0.000000e+00> : vector<8x96xf32>
    %245 = tpu.matmul %244, %237, %cst_113 {dimension_numbers = #tpu.dot_dimension_numbers<[1], [0], [0], [1], [0, 0, 1, 1], [], []>} : vector<8x32xbf16>, vector<32x96xbf16>, vector<8x96xf32> -> vector<8x96xf32>
    %246 = vector.broadcast %239 : vector<1x96xf32> to vector<8x96xf32>
    %247 = arith.addf %245, %246 : vector<8x96xf32>
    %248 = arith.truncf %247 : vector<8x96xf32> to vector<8x96xbf16>
    %249 = vector.extract_strided_slice %248 {offsets = [0, 0], sizes = [8, 8], strides = [1, 1]} : vector<8x96xbf16> to vector<8x8xbf16>
    %250 = vector.extract_strided_slice %248 {offsets = [0, 32], sizes = [8, 8], strides = [1, 1]} : vector<8x96xbf16> to vector<8x8xbf16>
    %251 = vector.extract_strided_slice %248 {offsets = [0, 64], sizes = [8, 8], strides = [1, 1]} : vector<8x96xbf16> to vector<8x8xbf16>
    %cst_114 = arith.constant dense<0.000000e+00> : vector<8x8xf32>
    %252 = tpu.matmul %249, %250, %cst_114 {dimension_numbers = #tpu.dot_dimension_numbers<[1], [1], [0], [0], [0, 0, 1, 0], [], []>} : vector<8x8xbf16>, vector<8x8xbf16>, vector<8x8xf32> -> vector<8x8xf32>
    %cst_115 = arith.constant 0.353553385 : f32
    %253 = vector.broadcast %cst_115 : f32 to vector<8x8xf32>
    %254 = arith.mulf %252, %253 : vector<8x8xf32>
    %255 = vector.broadcast %5 : vector<1x8xf32> to vector<8x8xf32>
    %256 = arith.addf %254, %255 : vector<8x8xf32>
    %cst_116 = arith.constant dense<0xFF800000> : vector<8xf32>
    %257 = vector.multi_reduction <maximumf>, %256, %cst_116 [1] : vector<8x8xf32> to vector<8xf32>
    %258 = vector.shape_cast %257 : vector<8xf32> to vector<8x1xf32>
    %259 = vector.broadcast %258 : vector<8x1xf32> to vector<8x8xf32>
    %260 = arith.subf %256, %259 : vector<8x8xf32>
    %261 = math.exp %260 : vector<8x8xf32>
    %cst_117 = arith.constant dense<0.000000e+00> : vector<8xf32>
    %262 = vector.multi_reduction <add>, %261, %cst_117 [1] : vector<8x8xf32> to vector<8xf32>
    %263 = vector.shape_cast %262 : vector<8xf32> to vector<8x1xf32>
    %264 = tpu.reciprocal %263 {approx = true} : vector<8x1xf32> -> vector<8x1xf32>
    %265 = vector.broadcast %264 : vector<8x1xf32> to vector<8x8xf32>
    %266 = arith.mulf %261, %265 : vector<8x8xf32>
    %267 = vector.extract_strided_slice %241 {offsets = [0, 0], sizes = [8, 32], strides = [1, 1]} : vector<32x32xbf16> to vector<8x32xbf16>
    %cst_118 = arith.constant dense<0.000000e+00> : vector<8x32xf32>
    %268 = tpu.matmul %251, %267, %cst_118 {dimension_numbers = #tpu.dot_dimension_numbers<[1], [0], [0], [1], [0, 0, 1, 1], [], []>} : vector<8x8xbf16>, vector<8x32xbf16>, vector<8x32xf32> -> vector<8x32xf32>
    %269 = arith.truncf %266 : vector<8x8xf32> to vector<8x8xbf16>
    %270 = arith.truncf %268 : vector<8x32xf32> to vector<8x32xbf16>
    %cst_119 = arith.constant dense<0.000000e+00> : vector<8x32xf32>
    %271 = tpu.matmul %269, %270, %cst_119 {dimension_numbers = #tpu.dot_dimension_numbers<[1], [0], [0], [1], [0, 0, 1, 1], [], []>} : vector<8x8xbf16>, vector<8x32xbf16>, vector<8x32xf32> -> vector<8x32xf32>
    %272 = vector.extract_strided_slice %248 {offsets = [0, 8], sizes = [8, 8], strides = [1, 1]} : vector<8x96xbf16> to vector<8x8xbf16>
    %273 = vector.extract_strided_slice %248 {offsets = [0, 40], sizes = [8, 8], strides = [1, 1]} : vector<8x96xbf16> to vector<8x8xbf16>
    %274 = vector.extract_strided_slice %248 {offsets = [0, 72], sizes = [8, 8], strides = [1, 1]} : vector<8x96xbf16> to vector<8x8xbf16>
    %cst_120 = arith.constant dense<0.000000e+00> : vector<8x8xf32>
    %275 = tpu.matmul %272, %273, %cst_120 {dimension_numbers = #tpu.dot_dimension_numbers<[1], [1], [0], [0], [0, 0, 1, 0], [], []>} : vector<8x8xbf16>, vector<8x8xbf16>, vector<8x8xf32> -> vector<8x8xf32>
    %cst_121 = arith.constant 0.353553385 : f32
    %276 = vector.broadcast %cst_121 : f32 to vector<8x8xf32>
    %277 = arith.mulf %275, %276 : vector<8x8xf32>
    %278 = vector.broadcast %5 : vector<1x8xf32> to vector<8x8xf32>
    %279 = arith.addf %277, %278 : vector<8x8xf32>
    %cst_122 = arith.constant dense<0xFF800000> : vector<8xf32>
    %280 = vector.multi_reduction <maximumf>, %279, %cst_122 [1] : vector<8x8xf32> to vector<8xf32>
    %281 = vector.shape_cast %280 : vector<8xf32> to vector<8x1xf32>
    %282 = vector.broadcast %281 : vector<8x1xf32> to vector<8x8xf32>
    %283 = arith.subf %279, %282 : vector<8x8xf32>
    %284 = math.exp %283 : vector<8x8xf32>
    %cst_123 = arith.constant dense<0.000000e+00> : vector<8xf32>
    %285 = vector.multi_reduction <add>, %284, %cst_123 [1] : vector<8x8xf32> to vector<8xf32>
    %286 = vector.shape_cast %285 : vector<8xf32> to vector<8x1xf32>
    %287 = tpu.reciprocal %286 {approx = true} : vector<8x1xf32> -> vector<8x1xf32>
    %288 = vector.broadcast %287 : vector<8x1xf32> to vector<8x8xf32>
    %289 = arith.mulf %284, %288 : vector<8x8xf32>
    %290 = vector.extract_strided_slice %241 {offsets = [8, 0], sizes = [8, 32], strides = [1, 1]} : vector<32x32xbf16> to vector<8x32xbf16>
    %cst_124 = arith.constant dense<0.000000e+00> : vector<8x32xf32>
    %291 = tpu.matmul %274, %290, %cst_124 {dimension_numbers = #tpu.dot_dimension_numbers<[1], [0], [0], [1], [0, 0, 1, 1], [], []>} : vector<8x8xbf16>, vector<8x32xbf16>, vector<8x32xf32> -> vector<8x32xf32>
    %292 = arith.truncf %289 : vector<8x8xf32> to vector<8x8xbf16>
    %293 = arith.truncf %291 : vector<8x32xf32> to vector<8x32xbf16>
    %cst_125 = arith.constant dense<0.000000e+00> : vector<8x32xf32>
    %294 = tpu.matmul %292, %293, %cst_125 {dimension_numbers = #tpu.dot_dimension_numbers<[1], [0], [0], [1], [0, 0, 1, 1], [], []>} : vector<8x8xbf16>, vector<8x32xbf16>, vector<8x32xf32> -> vector<8x32xf32>
    %295 = arith.addf %271, %294 : vector<8x32xf32>
    %296 = vector.extract_strided_slice %248 {offsets = [0, 16], sizes = [8, 8], strides = [1, 1]} : vector<8x96xbf16> to vector<8x8xbf16>
    %297 = vector.extract_strided_slice %248 {offsets = [0, 48], sizes = [8, 8], strides = [1, 1]} : vector<8x96xbf16> to vector<8x8xbf16>
    %298 = vector.extract_strided_slice %248 {offsets = [0, 80], sizes = [8, 8], strides = [1, 1]} : vector<8x96xbf16> to vector<8x8xbf16>
    %cst_126 = arith.constant dense<0.000000e+00> : vector<8x8xf32>
    %299 = tpu.matmul %296, %297, %cst_126 {dimension_numbers = #tpu.dot_dimension_numbers<[1], [1], [0], [0], [0, 0, 1, 0], [], []>} : vector<8x8xbf16>, vector<8x8xbf16>, vector<8x8xf32> -> vector<8x8xf32>
    %cst_127 = arith.constant 0.353553385 : f32
    %300 = vector.broadcast %cst_127 : f32 to vector<8x8xf32>
    %301 = arith.mulf %299, %300 : vector<8x8xf32>
    %302 = vector.broadcast %5 : vector<1x8xf32> to vector<8x8xf32>
    %303 = arith.addf %301, %302 : vector<8x8xf32>
    %cst_128 = arith.constant dense<0xFF800000> : vector<8xf32>
    %304 = vector.multi_reduction <maximumf>, %303, %cst_128 [1] : vector<8x8xf32> to vector<8xf32>
    %305 = vector.shape_cast %304 : vector<8xf32> to vector<8x1xf32>
    %306 = vector.broadcast %305 : vector<8x1xf32> to vector<8x8xf32>
    %307 = arith.subf %303, %306 : vector<8x8xf32>
    %308 = math.exp %307 : vector<8x8xf32>
    %cst_129 = arith.constant dense<0.000000e+00> : vector<8xf32>
    %309 = vector.multi_reduction <add>, %308, %cst_129 [1] : vector<8x8xf32> to vector<8xf32>
    %310 = vector.shape_cast %309 : vector<8xf32> to vector<8x1xf32>
    %311 = tpu.reciprocal %310 {approx = true} : vector<8x1xf32> -> vector<8x1xf32>
    %312 = vector.broadcast %311 : vector<8x1xf32> to vector<8x8xf32>
    %313 = arith.mulf %308, %312 : vector<8x8xf32>
    %314 = vector.extract_strided_slice %241 {offsets = [16, 0], sizes = [8, 32], strides = [1, 1]} : vector<32x32xbf16> to vector<8x32xbf16>
    %cst_130 = arith.constant dense<0.000000e+00> : vector<8x32xf32>
    %315 = tpu.matmul %298, %314, %cst_130 {dimension_numbers = #tpu.dot_dimension_numbers<[1], [0], [0], [1], [0, 0, 1, 1], [], []>} : vector<8x8xbf16>, vector<8x32xbf16>, vector<8x32xf32> -> vector<8x32xf32>
    %316 = arith.truncf %313 : vector<8x8xf32> to vector<8x8xbf16>
    %317 = arith.truncf %315 : vector<8x32xf32> to vector<8x32xbf16>
    %cst_131 = arith.constant dense<0.000000e+00> : vector<8x32xf32>
    %318 = tpu.matmul %316, %317, %cst_131 {dimension_numbers = #tpu.dot_dimension_numbers<[1], [0], [0], [1], [0, 0, 1, 1], [], []>} : vector<8x8xbf16>, vector<8x32xbf16>, vector<8x32xf32> -> vector<8x32xf32>
    %319 = arith.addf %295, %318 : vector<8x32xf32>
    %320 = vector.extract_strided_slice %248 {offsets = [0, 24], sizes = [8, 8], strides = [1, 1]} : vector<8x96xbf16> to vector<8x8xbf16>
    %321 = vector.extract_strided_slice %248 {offsets = [0, 56], sizes = [8, 8], strides = [1, 1]} : vector<8x96xbf16> to vector<8x8xbf16>
    %322 = vector.extract_strided_slice %248 {offsets = [0, 88], sizes = [8, 8], strides = [1, 1]} : vector<8x96xbf16> to vector<8x8xbf16>
    %cst_132 = arith.constant dense<0.000000e+00> : vector<8x8xf32>
    %323 = tpu.matmul %320, %321, %cst_132 {dimension_numbers = #tpu.dot_dimension_numbers<[1], [1], [0], [0], [0, 0, 1, 0], [], []>} : vector<8x8xbf16>, vector<8x8xbf16>, vector<8x8xf32> -> vector<8x8xf32>
    %cst_133 = arith.constant 0.353553385 : f32
    %324 = vector.broadcast %cst_133 : f32 to vector<8x8xf32>
    %325 = arith.mulf %323, %324 : vector<8x8xf32>
    %326 = vector.broadcast %5 : vector<1x8xf32> to vector<8x8xf32>
    %327 = arith.addf %325, %326 : vector<8x8xf32>
    %cst_134 = arith.constant dense<0xFF800000> : vector<8xf32>
    %328 = vector.multi_reduction <maximumf>, %327, %cst_134 [1] : vector<8x8xf32> to vector<8xf32>
    %329 = vector.shape_cast %328 : vector<8xf32> to vector<8x1xf32>
    %330 = vector.broadcast %329 : vector<8x1xf32> to vector<8x8xf32>
    %331 = arith.subf %327, %330 : vector<8x8xf32>
    %332 = math.exp %331 : vector<8x8xf32>
    %cst_135 = arith.constant dense<0.000000e+00> : vector<8xf32>
    %333 = vector.multi_reduction <add>, %332, %cst_135 [1] : vector<8x8xf32> to vector<8xf32>
    %334 = vector.shape_cast %333 : vector<8xf32> to vector<8x1xf32>
    %335 = tpu.reciprocal %334 {approx = true} : vector<8x1xf32> -> vector<8x1xf32>
    %336 = vector.broadcast %335 : vector<8x1xf32> to vector<8x8xf32>
    %337 = arith.mulf %332, %336 : vector<8x8xf32>
    %338 = vector.extract_strided_slice %241 {offsets = [24, 0], sizes = [8, 32], strides = [1, 1]} : vector<32x32xbf16> to vector<8x32xbf16>
    %cst_136 = arith.constant dense<0.000000e+00> : vector<8x32xf32>
    %339 = tpu.matmul %322, %338, %cst_136 {dimension_numbers = #tpu.dot_dimension_numbers<[1], [0], [0], [1], [0, 0, 1, 1], [], []>} : vector<8x8xbf16>, vector<8x32xbf16>, vector<8x32xf32> -> vector<8x32xf32>
    %340 = arith.truncf %337 : vector<8x8xf32> to vector<8x8xbf16>
    %341 = arith.truncf %339 : vector<8x32xf32> to vector<8x32xbf16>
    %cst_137 = arith.constant dense<0.000000e+00> : vector<8x32xf32>
    %342 = tpu.matmul %340, %341, %cst_137 {dimension_numbers = #tpu.dot_dimension_numbers<[1], [0], [0], [1], [0, 0, 1, 1], [], []>} : vector<8x8xbf16>, vector<8x32xbf16>, vector<8x32xf32> -> vector<8x32xf32>
    %343 = arith.addf %319, %342 : vector<8x32xf32>
    %344 = arith.addf %208, %343 : vector<8x32xf32>
    %345 = vector.broadcast %243 : vector<1x32xf32> to vector<8x32xf32>
    %346 = arith.addf %344, %345 : vector<8x32xf32>
    %c1_138 = arith.constant 1 : index
    %c4_139 = arith.constant 4 : index
    %c0_140 = arith.constant 0 : index
    %347 = vector.load %arg9[%c1_138, %c4_139, %c0_140] : memref<2x8x128xf32, #tpu.memory_space<vmem>>, vector<1x1x32xf32>
    %348 = vector.shape_cast %347 : vector<1x1x32xf32> to vector<1x32xf32>
    %c1_141 = arith.constant 1 : index
    %c5_142 = arith.constant 5 : index
    %c0_143 = arith.constant 0 : index
    %349 = vector.load %arg9[%c1_141, %c5_142, %c0_143] : memref<2x8x128xf32, #tpu.memory_space<vmem>>, vector<1x1x32xf32>
    %350 = vector.shape_cast %349 : vector<1x1x32xf32> to vector<1x32xf32>
    %cst_144 = arith.constant dense<0.000000e+00> : vector<8xf32>
    %351 = vector.multi_reduction <add>, %346, %cst_144 [1] : vector<8x32xf32> to vector<8xf32>
    %352 = vector.shape_cast %351 : vector<8xf32> to vector<8x1xf32>
    %cst_145 = arith.constant 3.200000e+01 : f32
    %353 = vector.broadcast %cst_145 : f32 to vector<8x1xf32>
    %354 = arith.divf %352, %353 : vector<8x1xf32>
    %355 = vector.broadcast %354 : vector<8x1xf32> to vector<8x32xf32>
    %356 = arith.subf %346, %355 : vector<8x32xf32>
    %357 = arith.mulf %356, %356 : vector<8x32xf32>
    %cst_146 = arith.constant dense<0.000000e+00> : vector<8xf32>
    %358 = vector.multi_reduction <add>, %357, %cst_146 [1] : vector<8x32xf32> to vector<8xf32>
    %359 = vector.shape_cast %358 : vector<8xf32> to vector<8x1xf32>
    %cst_147 = arith.constant 0.0322580636 : f32
    %360 = vector.broadcast %cst_147 : f32 to vector<8x1xf32>
    %361 = arith.mulf %359, %360 : vector<8x1xf32>
    %362 = math.sqrt %361 : vector<8x1xf32>
    %cst_148 = arith.constant 9.99999997E-7 : f32
    %363 = vector.broadcast %cst_148 : f32 to vector<8x1xf32>
    %364 = arith.addf %362, %363 : vector<8x1xf32>
    %365 = tpu.reciprocal %364 {approx = true} : vector<8x1xf32> -> vector<8x1xf32>
    %366 = vector.broadcast %354 : vector<8x1xf32> to vector<8x32xf32>
    %367 = arith.subf %346, %366 : vector<8x32xf32>
    %368 = vector.broadcast %348 : vector<1x32xf32> to vector<8x32xf32>
    %369 = arith.mulf %368, %367 : vector<8x32xf32>
    %370 = vector.broadcast %365 : vector<8x1xf32> to vector<8x32xf32>
    %371 = arith.mulf %369, %370 : vector<8x32xf32>
    %372 = vector.broadcast %350 : vector<1x32xf32> to vector<8x32xf32>
    %373 = arith.addf %371, %372 : vector<8x32xf32>
    %c1_149 = arith.constant 1 : index
    %c2_150 = arith.constant 2 : index
    %c0_151 = arith.constant 0 : index
    %c0_152 = arith.constant 0 : index
    %374 = vector.load %arg8[%c1_149, %c2_150, %c0_151, %c0_152] : memref<2x4x32x128xbf16, #tpu.memory_space<vmem>>, vector<1x1x32x64xbf16>
    %375 = vector.shape_cast %374 : vector<1x1x32x64xbf16> to vector<32x64xbf16>
    %c1_153 = arith.constant 1 : index
    %c6_154 = arith.constant 6 : index
    %c0_155 = arith.constant 0 : index
    %376 = vector.load %arg9[%c1_153, %c6_154, %c0_155] : memref<2x8x128xf32, #tpu.memory_space<vmem>>, vector<1x1x64xf32>
    %377 = vector.shape_cast %376 : vector<1x1x64xf32> to vector<1x64xf32>
    %c1_156 = arith.constant 1 : index
    %c3_157 = arith.constant 3 : index
    %c0_158 = arith.constant 0 : index
    %c0_159 = arith.constant 0 : index
    %378 = vector.load %arg8[%c1_156, %c3_157, %c0_158, %c0_159] : memref<2x4x32x128xbf16, #tpu.memory_space<vmem>>, vector<1x1x32x64xbf16>
    %379 = vector.shape_cast %378 : vector<1x1x32x64xbf16> to vector<32x64xbf16>
    %c1_160 = arith.constant 1 : index
    %c7_161 = arith.constant 7 : index
    %c0_162 = arith.constant 0 : index
    %380 = vector.load %arg9[%c1_160, %c7_161, %c0_162] : memref<2x8x128xf32, #tpu.memory_space<vmem>>, vector<1x1x32xf32>
    %381 = vector.shape_cast %380 : vector<1x1x32xf32> to vector<1x32xf32>
    %382 = arith.truncf %373 : vector<8x32xf32> to vector<8x32xbf16>
    %cst_163 = arith.constant dense<0.000000e+00> : vector<8x64xf32>
    %383 = tpu.matmul %382, %375, %cst_163 {dimension_numbers = #tpu.dot_dimension_numbers<[1], [0], [0], [1], [0, 0, 1, 1], [], []>} : vector<8x32xbf16>, vector<32x64xbf16>, vector<8x64xf32> -> vector<8x64xf32>
    %384 = vector.broadcast %377 : vector<1x64xf32> to vector<8x64xf32>
    %385 = arith.addf %383, %384 : vector<8x64xf32>
    %cst_164 = arith.constant 0.000000e+00 : f32
    %386 = vector.broadcast %cst_164 : f32 to vector<8x64xf32>
    %387 = arith.maximumf %385, %386 : vector<8x64xf32>
    %388 = arith.truncf %387 : vector<8x64xf32> to vector<8x64xbf16>
    %cst_165 = arith.constant dense<0.000000e+00> : vector<8x32xf32>
    %389 = tpu.matmul %388, %379, %cst_165 {dimension_numbers = #tpu.dot_dimension_numbers<[1], [1], [0], [0], [0, 0, 1, 0], [], []>} : vector<8x64xbf16>, vector<32x64xbf16>, vector<8x32xf32> -> vector<8x32xf32>
    %390 = arith.addf %346, %389 : vector<8x32xf32>
    %391 = vector.broadcast %381 : vector<1x32xf32> to vector<8x32xf32>
    %392 = arith.addf %390, %391 : vector<8x32xf32>
    %c0_166 = arith.constant 0 : index
    %c0_167 = arith.constant 0 : index
    %393 = vector.load %arg12[%c0_166, %c0_167] : memref<4x32xf32, #tpu.memory_space<vmem>>, vector<1x32xf32>
    %c1_168 = arith.constant 1 : index
    %c0_169 = arith.constant 0 : index
    %394 = vector.load %arg12[%c1_168, %c0_169] : memref<4x32xf32, #tpu.memory_space<vmem>>, vector<1x32xf32>
    %cst_170 = arith.constant dense<0.000000e+00> : vector<8xf32>
    %395 = vector.multi_reduction <add>, %392, %cst_170 [1] : vector<8x32xf32> to vector<8xf32>
    %396 = vector.shape_cast %395 : vector<8xf32> to vector<8x1xf32>
    %cst_171 = arith.constant 3.200000e+01 : f32
    %397 = vector.broadcast %cst_171 : f32 to vector<8x1xf32>
    %398 = arith.divf %396, %397 : vector<8x1xf32>
    %399 = vector.broadcast %398 : vector<8x1xf32> to vector<8x32xf32>
    %400 = arith.subf %392, %399 : vector<8x32xf32>
    %401 = arith.mulf %400, %400 : vector<8x32xf32>
    %cst_172 = arith.constant dense<0.000000e+00> : vector<8xf32>
    %402 = vector.multi_reduction <add>, %401, %cst_172 [1] : vector<8x32xf32> to vector<8xf32>
    %403 = vector.shape_cast %402 : vector<8xf32> to vector<8x1xf32>
    %cst_173 = arith.constant 0.0322580636 : f32
    %404 = vector.broadcast %cst_173 : f32 to vector<8x1xf32>
    %405 = arith.mulf %403, %404 : vector<8x1xf32>
    %406 = math.sqrt %405 : vector<8x1xf32>
    %cst_174 = arith.constant 9.99999997E-7 : f32
    %407 = vector.broadcast %cst_174 : f32 to vector<8x1xf32>
    %408 = arith.addf %406, %407 : vector<8x1xf32>
    %409 = tpu.reciprocal %408 {approx = true} : vector<8x1xf32> -> vector<8x1xf32>
    %410 = vector.broadcast %398 : vector<8x1xf32> to vector<8x32xf32>
    %411 = arith.subf %392, %410 : vector<8x32xf32>
    %412 = vector.broadcast %393 : vector<1x32xf32> to vector<8x32xf32>
    %413 = arith.mulf %412, %411 : vector<8x32xf32>
    %414 = vector.broadcast %409 : vector<8x1xf32> to vector<8x32xf32>
    %415 = arith.mulf %413, %414 : vector<8x32xf32>
    %416 = vector.broadcast %394 : vector<1x32xf32> to vector<8x32xf32>
    %417 = arith.addf %415, %416 : vector<8x32xf32>
    %418 = arith.truncf %417 : vector<8x32xf32> to vector<8x32xbf16>
    %c0_175 = arith.constant 0 : index
    %c0_176 = arith.constant 0 : index
    %c0_177 = arith.constant 0 : index
    %419 = vector.load %arg2[%c0_175, %c0_176, %c0_177] : memref<1x8x1xi32, #tpu.memory_space<vmem>>, vector<1x8x1xi32>
    %420 = vector.shape_cast %419 : vector<1x8x1xi32> to vector<8x1xi32>
    %c0_178 = arith.constant 0 : index
    %c0_179 = arith.constant 0 : index
    %421 = vector.load %arg6[%c0_178, %c0_179] : memref<16x32xf32, #tpu.memory_space<vmem>>, vector<16x32xf32>
    %c0_180 = arith.constant 0 : index
    %c0_181 = arith.constant 0 : index
    %422 = vector.load %arg7[%c0_180, %c0_181] : memref<64x32xf32, #tpu.memory_space<vmem>>, vector<8x32xf32>
    %423 = tpu.iota {dimensions = array<i32: 1>} : vector<8x16xi32>
    %424 = vector.broadcast %420 : vector<8x1xi32> to vector<8x16xi32>
    %425 = arith.cmpi eq, %424, %423 : vector<8x16xi32>
    %426 = arith.extui %425 : vector<8x16xi1> to vector<8x16xi32>
    %427 = arith.sitofp %426 : vector<8x16xi32> to vector<8x16xf32>
    %cst_182 = arith.constant dense<0.000000e+00> : vector<8x32xf32>
    %428 = tpu.matmul %427, %421, %cst_182 {dimension_numbers = #tpu.dot_dimension_numbers<[1], [0], [0], [1], [0, 0, 1, 1], [], []>} : vector<8x16xf32>, vector<16x32xf32>, vector<8x32xf32> -> vector<8x32xf32>
    %cst_183 = arith.constant 5.65685415 : f32
    %429 = vector.broadcast %cst_183 : f32 to vector<8x32xf32>
    %430 = arith.mulf %428, %429 : vector<8x32xf32>
    %431 = arith.addf %430, %422 : vector<8x32xf32>
    %c0_184 = arith.constant 0 : index
    %c0_185 = arith.constant 0 : index
    %c0_186 = arith.constant 0 : index
    %432 = vector.load %arg11[%c0_184, %c0_185, %c0_186] : memref<2x16x128xf32, #tpu.memory_space<vmem>>, vector<1x1x32xf32>
    %433 = vector.shape_cast %432 : vector<1x1x32xf32> to vector<1x32xf32>
    %c0_187 = arith.constant 0 : index
    %c1_188 = arith.constant 1 : index
    %c0_189 = arith.constant 0 : index
    %434 = vector.load %arg11[%c0_187, %c1_188, %c0_189] : memref<2x16x128xf32, #tpu.memory_space<vmem>>, vector<1x1x32xf32>
    %435 = vector.shape_cast %434 : vector<1x1x32xf32> to vector<1x32xf32>
    %cst_190 = arith.constant dense<0.000000e+00> : vector<8xf32>
    %436 = vector.multi_reduction <add>, %431, %cst_190 [1] : vector<8x32xf32> to vector<8xf32>
    %437 = vector.shape_cast %436 : vector<8xf32> to vector<8x1xf32>
    %cst_191 = arith.constant 3.200000e+01 : f32
    %438 = vector.broadcast %cst_191 : f32 to vector<8x1xf32>
    %439 = arith.divf %437, %438 : vector<8x1xf32>
    %440 = vector.broadcast %439 : vector<8x1xf32> to vector<8x32xf32>
    %441 = arith.subf %431, %440 : vector<8x32xf32>
    %442 = arith.mulf %441, %441 : vector<8x32xf32>
    %cst_192 = arith.constant dense<0.000000e+00> : vector<8xf32>
    %443 = vector.multi_reduction <add>, %442, %cst_192 [1] : vector<8x32xf32> to vector<8xf32>
    %444 = vector.shape_cast %443 : vector<8xf32> to vector<8x1xf32>
    %cst_193 = arith.constant 0.0322580636 : f32
    %445 = vector.broadcast %cst_193 : f32 to vector<8x1xf32>
    %446 = arith.mulf %444, %445 : vector<8x1xf32>
    %447 = math.sqrt %446 : vector<8x1xf32>
    %cst_194 = arith.constant 9.99999997E-7 : f32
    %448 = vector.broadcast %cst_194 : f32 to vector<8x1xf32>
    %449 = arith.addf %447, %448 : vector<8x1xf32>
    %450 = tpu.reciprocal %449 {approx = true} : vector<8x1xf32> -> vector<8x1xf32>
    %451 = vector.broadcast %439 : vector<8x1xf32> to vector<8x32xf32>
    %452 = arith.subf %431, %451 : vector<8x32xf32>
    %453 = vector.broadcast %433 : vector<1x32xf32> to vector<8x32xf32>
    %454 = arith.mulf %453, %452 : vector<8x32xf32>
    %455 = vector.broadcast %450 : vector<8x1xf32> to vector<8x32xf32>
    %456 = arith.mulf %454, %455 : vector<8x32xf32>
    %457 = vector.broadcast %435 : vector<1x32xf32> to vector<8x32xf32>
    %458 = arith.addf %456, %457 : vector<8x32xf32>
    %c0_195 = arith.constant 0 : index
    %c0_196 = arith.constant 0 : index
    %c0_197 = arith.constant 0 : index
    %c0_198 = arith.constant 0 : index
    %459 = vector.load %arg10[%c0_195, %c0_196, %c0_197, %c0_198] : memref<2x7x32x128xbf16, #tpu.memory_space<vmem>>, vector<1x1x32x96xbf16>
    %460 = vector.shape_cast %459 : vector<1x1x32x96xbf16> to vector<32x96xbf16>
    %c0_199 = arith.constant 0 : index
    %c2_200 = arith.constant 2 : index
    %c0_201 = arith.constant 0 : index
    %461 = vector.load %arg11[%c0_199, %c2_200, %c0_201] : memref<2x16x128xf32, #tpu.memory_space<vmem>>, vector<1x1x96xf32>
    %462 = vector.shape_cast %461 : vector<1x1x96xf32> to vector<1x96xf32>
    %c0_202 = arith.constant 0 : index
    %c1_203 = arith.constant 1 : index
    %c0_204 = arith.constant 0 : index
    %c0_205 = arith.constant 0 : index
    %463 = vector.load %arg10[%c0_202, %c1_203, %c0_204, %c0_205] : memref<2x7x32x128xbf16, #tpu.memory_space<vmem>>, vector<1x1x32x32xbf16>
    %464 = vector.shape_cast %463 : vector<1x1x32x32xbf16> to vector<32x32xbf16>
    %c0_206 = arith.constant 0 : index
    %c3_207 = arith.constant 3 : index
    %c0_208 = arith.constant 0 : index
    %465 = vector.load %arg11[%c0_206, %c3_207, %c0_208] : memref<2x16x128xf32, #tpu.memory_space<vmem>>, vector<1x1x32xf32>
    %466 = vector.shape_cast %465 : vector<1x1x32xf32> to vector<1x32xf32>
    %467 = arith.truncf %458 : vector<8x32xf32> to vector<8x32xbf16>
    %cst_209 = arith.constant dense<0.000000e+00> : vector<8x96xf32>
    %468 = tpu.matmul %467, %460, %cst_209 {dimension_numbers = #tpu.dot_dimension_numbers<[1], [0], [0], [1], [0, 0, 1, 1], [], []>} : vector<8x32xbf16>, vector<32x96xbf16>, vector<8x96xf32> -> vector<8x96xf32>
    %469 = vector.broadcast %462 : vector<1x96xf32> to vector<8x96xf32>
    %470 = arith.addf %468, %469 : vector<8x96xf32>
    %471 = arith.truncf %470 : vector<8x96xf32> to vector<8x96xbf16>
    %472 = vector.extract_strided_slice %471 {offsets = [0, 0], sizes = [8, 8], strides = [1, 1]} : vector<8x96xbf16> to vector<8x8xbf16>
    %473 = vector.extract_strided_slice %471 {offsets = [0, 32], sizes = [8, 8], strides = [1, 1]} : vector<8x96xbf16> to vector<8x8xbf16>
    %474 = vector.extract_strided_slice %471 {offsets = [0, 64], sizes = [8, 8], strides = [1, 1]} : vector<8x96xbf16> to vector<8x8xbf16>
    %cst_210 = arith.constant dense<0.000000e+00> : vector<8x8xf32>
    %475 = tpu.matmul %472, %473, %cst_210 {dimension_numbers = #tpu.dot_dimension_numbers<[1], [1], [0], [0], [0, 0, 1, 0], [], []>} : vector<8x8xbf16>, vector<8x8xbf16>, vector<8x8xf32> -> vector<8x8xf32>
    %cst_211 = arith.constant 0.353553385 : f32
    %476 = vector.broadcast %cst_211 : f32 to vector<8x8xf32>
    %477 = arith.mulf %475, %476 : vector<8x8xf32>
    %478 = arith.addf %477, %11 : vector<8x8xf32>
    %cst_212 = arith.constant dense<0xFF800000> : vector<8xf32>
    %479 = vector.multi_reduction <maximumf>, %478, %cst_212 [1] : vector<8x8xf32> to vector<8xf32>
    %480 = vector.shape_cast %479 : vector<8xf32> to vector<8x1xf32>
    %481 = vector.broadcast %480 : vector<8x1xf32> to vector<8x8xf32>
    %482 = arith.subf %478, %481 : vector<8x8xf32>
    %483 = math.exp %482 : vector<8x8xf32>
    %cst_213 = arith.constant dense<0.000000e+00> : vector<8xf32>
    %484 = vector.multi_reduction <add>, %483, %cst_213 [1] : vector<8x8xf32> to vector<8xf32>
    %485 = vector.shape_cast %484 : vector<8xf32> to vector<8x1xf32>
    %486 = tpu.reciprocal %485 {approx = true} : vector<8x1xf32> -> vector<8x1xf32>
    %487 = vector.broadcast %486 : vector<8x1xf32> to vector<8x8xf32>
    %488 = arith.mulf %483, %487 : vector<8x8xf32>
    %489 = vector.extract_strided_slice %464 {offsets = [0, 0], sizes = [8, 32], strides = [1, 1]} : vector<32x32xbf16> to vector<8x32xbf16>
    %cst_214 = arith.constant dense<0.000000e+00> : vector<8x32xf32>
    %490 = tpu.matmul %474, %489, %cst_214 {dimension_numbers = #tpu.dot_dimension_numbers<[1], [0], [0], [1], [0, 0, 1, 1], [], []>} : vector<8x8xbf16>, vector<8x32xbf16>, vector<8x32xf32> -> vector<8x32xf32>
    %491 = arith.truncf %488 : vector<8x8xf32> to vector<8x8xbf16>
    %492 = arith.truncf %490 : vector<8x32xf32> to vector<8x32xbf16>
    %cst_215 = arith.constant dense<0.000000e+00> : vector<8x32xf32>
    %493 = tpu.matmul %491, %492, %cst_215 {dimension_numbers = #tpu.dot_dimension_numbers<[1], [0], [0], [1], [0, 0, 1, 1], [], []>} : vector<8x8xbf16>, vector<8x32xbf16>, vector<8x32xf32> -> vector<8x32xf32>
    %494 = vector.extract_strided_slice %471 {offsets = [0, 8], sizes = [8, 8], strides = [1, 1]} : vector<8x96xbf16> to vector<8x8xbf16>
    %495 = vector.extract_strided_slice %471 {offsets = [0, 40], sizes = [8, 8], strides = [1, 1]} : vector<8x96xbf16> to vector<8x8xbf16>
    %496 = vector.extract_strided_slice %471 {offsets = [0, 72], sizes = [8, 8], strides = [1, 1]} : vector<8x96xbf16> to vector<8x8xbf16>
    %cst_216 = arith.constant dense<0.000000e+00> : vector<8x8xf32>
    %497 = tpu.matmul %494, %495, %cst_216 {dimension_numbers = #tpu.dot_dimension_numbers<[1], [1], [0], [0], [0, 0, 1, 0], [], []>} : vector<8x8xbf16>, vector<8x8xbf16>, vector<8x8xf32> -> vector<8x8xf32>
    %cst_217 = arith.constant 0.353553385 : f32
    %498 = vector.broadcast %cst_217 : f32 to vector<8x8xf32>
    %499 = arith.mulf %497, %498 : vector<8x8xf32>
    %500 = arith.addf %499, %11 : vector<8x8xf32>
    %cst_218 = arith.constant dense<0xFF800000> : vector<8xf32>
    %501 = vector.multi_reduction <maximumf>, %500, %cst_218 [1] : vector<8x8xf32> to vector<8xf32>
    %502 = vector.shape_cast %501 : vector<8xf32> to vector<8x1xf32>
    %503 = vector.broadcast %502 : vector<8x1xf32> to vector<8x8xf32>
    %504 = arith.subf %500, %503 : vector<8x8xf32>
    %505 = math.exp %504 : vector<8x8xf32>
    %cst_219 = arith.constant dense<0.000000e+00> : vector<8xf32>
    %506 = vector.multi_reduction <add>, %505, %cst_219 [1] : vector<8x8xf32> to vector<8xf32>
    %507 = vector.shape_cast %506 : vector<8xf32> to vector<8x1xf32>
    %508 = tpu.reciprocal %507 {approx = true} : vector<8x1xf32> -> vector<8x1xf32>
    %509 = vector.broadcast %508 : vector<8x1xf32> to vector<8x8xf32>
    %510 = arith.mulf %505, %509 : vector<8x8xf32>
    %511 = vector.extract_strided_slice %464 {offsets = [8, 0], sizes = [8, 32], strides = [1, 1]} : vector<32x32xbf16> to vector<8x32xbf16>
    %cst_220 = arith.constant dense<0.000000e+00> : vector<8x32xf32>
    %512 = tpu.matmul %496, %511, %cst_220 {dimension_numbers = #tpu.dot_dimension_numbers<[1], [0], [0], [1], [0, 0, 1, 1], [], []>} : vector<8x8xbf16>, vector<8x32xbf16>, vector<8x32xf32> -> vector<8x32xf32>
    %513 = arith.truncf %510 : vector<8x8xf32> to vector<8x8xbf16>
    %514 = arith.truncf %512 : vector<8x32xf32> to vector<8x32xbf16>
    %cst_221 = arith.constant dense<0.000000e+00> : vector<8x32xf32>
    %515 = tpu.matmul %513, %514, %cst_221 {dimension_numbers = #tpu.dot_dimension_numbers<[1], [0], [0], [1], [0, 0, 1, 1], [], []>} : vector<8x8xbf16>, vector<8x32xbf16>, vector<8x32xf32> -> vector<8x32xf32>
    %516 = arith.addf %493, %515 : vector<8x32xf32>
    %517 = vector.extract_strided_slice %471 {offsets = [0, 16], sizes = [8, 8], strides = [1, 1]} : vector<8x96xbf16> to vector<8x8xbf16>
    %518 = vector.extract_strided_slice %471 {offsets = [0, 48], sizes = [8, 8], strides = [1, 1]} : vector<8x96xbf16> to vector<8x8xbf16>
    %519 = vector.extract_strided_slice %471 {offsets = [0, 80], sizes = [8, 8], strides = [1, 1]} : vector<8x96xbf16> to vector<8x8xbf16>
    %cst_222 = arith.constant dense<0.000000e+00> : vector<8x8xf32>
    %520 = tpu.matmul %517, %518, %cst_222 {dimension_numbers = #tpu.dot_dimension_numbers<[1], [1], [0], [0], [0, 0, 1, 0], [], []>} : vector<8x8xbf16>, vector<8x8xbf16>, vector<8x8xf32> -> vector<8x8xf32>
    %cst_223 = arith.constant 0.353553385 : f32
    %521 = vector.broadcast %cst_223 : f32 to vector<8x8xf32>
    %522 = arith.mulf %520, %521 : vector<8x8xf32>
    %523 = arith.addf %522, %11 : vector<8x8xf32>
    %cst_224 = arith.constant dense<0xFF800000> : vector<8xf32>
    %524 = vector.multi_reduction <maximumf>, %523, %cst_224 [1] : vector<8x8xf32> to vector<8xf32>
    %525 = vector.shape_cast %524 : vector<8xf32> to vector<8x1xf32>
    %526 = vector.broadcast %525 : vector<8x1xf32> to vector<8x8xf32>
    %527 = arith.subf %523, %526 : vector<8x8xf32>
    %528 = math.exp %527 : vector<8x8xf32>
    %cst_225 = arith.constant dense<0.000000e+00> : vector<8xf32>
    %529 = vector.multi_reduction <add>, %528, %cst_225 [1] : vector<8x8xf32> to vector<8xf32>
    %530 = vector.shape_cast %529 : vector<8xf32> to vector<8x1xf32>
    %531 = tpu.reciprocal %530 {approx = true} : vector<8x1xf32> -> vector<8x1xf32>
    %532 = vector.broadcast %531 : vector<8x1xf32> to vector<8x8xf32>
    %533 = arith.mulf %528, %532 : vector<8x8xf32>
    %534 = vector.extract_strided_slice %464 {offsets = [16, 0], sizes = [8, 32], strides = [1, 1]} : vector<32x32xbf16> to vector<8x32xbf16>
    %cst_226 = arith.constant dense<0.000000e+00> : vector<8x32xf32>
    %535 = tpu.matmul %519, %534, %cst_226 {dimension_numbers = #tpu.dot_dimension_numbers<[1], [0], [0], [1], [0, 0, 1, 1], [], []>} : vector<8x8xbf16>, vector<8x32xbf16>, vector<8x32xf32> -> vector<8x32xf32>
    %536 = arith.truncf %533 : vector<8x8xf32> to vector<8x8xbf16>
    %537 = arith.truncf %535 : vector<8x32xf32> to vector<8x32xbf16>
    %cst_227 = arith.constant dense<0.000000e+00> : vector<8x32xf32>
    %538 = tpu.matmul %536, %537, %cst_227 {dimension_numbers = #tpu.dot_dimension_numbers<[1], [0], [0], [1], [0, 0, 1, 1], [], []>} : vector<8x8xbf16>, vector<8x32xbf16>, vector<8x32xf32> -> vector<8x32xf32>
    %539 = arith.addf %516, %538 : vector<8x32xf32>
    %540 = vector.extract_strided_slice %471 {offsets = [0, 24], sizes = [8, 8], strides = [1, 1]} : vector<8x96xbf16> to vector<8x8xbf16>
    %541 = vector.extract_strided_slice %471 {offsets = [0, 56], sizes = [8, 8], strides = [1, 1]} : vector<8x96xbf16> to vector<8x8xbf16>
    %542 = vector.extract_strided_slice %471 {offsets = [0, 88], sizes = [8, 8], strides = [1, 1]} : vector<8x96xbf16> to vector<8x8xbf16>
    %cst_228 = arith.constant dense<0.000000e+00> : vector<8x8xf32>
    %543 = tpu.matmul %540, %541, %cst_228 {dimension_numbers = #tpu.dot_dimension_numbers<[1], [1], [0], [0], [0, 0, 1, 0], [], []>} : vector<8x8xbf16>, vector<8x8xbf16>, vector<8x8xf32> -> vector<8x8xf32>
    %cst_229 = arith.constant 0.353553385 : f32
    %544 = vector.broadcast %cst_229 : f32 to vector<8x8xf32>
    %545 = arith.mulf %543, %544 : vector<8x8xf32>
    %546 = arith.addf %545, %11 : vector<8x8xf32>
    %cst_230 = arith.constant dense<0xFF800000> : vector<8xf32>
    %547 = vector.multi_reduction <maximumf>, %546, %cst_230 [1] : vector<8x8xf32> to vector<8xf32>
    %548 = vector.shape_cast %547 : vector<8xf32> to vector<8x1xf32>
    %549 = vector.broadcast %548 : vector<8x1xf32> to vector<8x8xf32>
    %550 = arith.subf %546, %549 : vector<8x8xf32>
    %551 = math.exp %550 : vector<8x8xf32>
    %cst_231 = arith.constant dense<0.000000e+00> : vector<8xf32>
    %552 = vector.multi_reduction <add>, %551, %cst_231 [1] : vector<8x8xf32> to vector<8xf32>
    %553 = vector.shape_cast %552 : vector<8xf32> to vector<8x1xf32>
    %554 = tpu.reciprocal %553 {approx = true} : vector<8x1xf32> -> vector<8x1xf32>
    %555 = vector.broadcast %554 : vector<8x1xf32> to vector<8x8xf32>
    %556 = arith.mulf %551, %555 : vector<8x8xf32>
    %557 = vector.extract_strided_slice %464 {offsets = [24, 0], sizes = [8, 32], strides = [1, 1]} : vector<32x32xbf16> to vector<8x32xbf16>
    %cst_232 = arith.constant dense<0.000000e+00> : vector<8x32xf32>
    %558 = tpu.matmul %542, %557, %cst_232 {dimension_numbers = #tpu.dot_dimension_numbers<[1], [0], [0], [1], [0, 0, 1, 1], [], []>} : vector<8x8xbf16>, vector<8x32xbf16>, vector<8x32xf32> -> vector<8x32xf32>
    %559 = arith.truncf %556 : vector<8x8xf32> to vector<8x8xbf16>
    %560 = arith.truncf %558 : vector<8x32xf32> to vector<8x32xbf16>
    %cst_233 = arith.constant dense<0.000000e+00> : vector<8x32xf32>
    %561 = tpu.matmul %559, %560, %cst_233 {dimension_numbers = #tpu.dot_dimension_numbers<[1], [0], [0], [1], [0, 0, 1, 1], [], []>} : vector<8x8xbf16>, vector<8x32xbf16>, vector<8x32xf32> -> vector<8x32xf32>
    %562 = arith.addf %539, %561 : vector<8x32xf32>
    %563 = arith.addf %431, %562 : vector<8x32xf32>
    %564 = vector.broadcast %466 : vector<1x32xf32> to vector<8x32xf32>
    %565 = arith.addf %563, %564 : vector<8x32xf32>
    %c0_234 = arith.constant 0 : index
    %c4_235 = arith.constant 4 : index
    %c0_236 = arith.constant 0 : index
    %566 = vector.load %arg11[%c0_234, %c4_235, %c0_236] : memref<2x16x128xf32, #tpu.memory_space<vmem>>, vector<1x1x32xf32>
    %567 = vector.shape_cast %566 : vector<1x1x32xf32> to vector<1x32xf32>
    %c0_237 = arith.constant 0 : index
    %c5_238 = arith.constant 5 : index
    %c0_239 = arith.constant 0 : index
    %568 = vector.load %arg11[%c0_237, %c5_238, %c0_239] : memref<2x16x128xf32, #tpu.memory_space<vmem>>, vector<1x1x32xf32>
    %569 = vector.shape_cast %568 : vector<1x1x32xf32> to vector<1x32xf32>
    %cst_240 = arith.constant dense<0.000000e+00> : vector<8xf32>
    %570 = vector.multi_reduction <add>, %565, %cst_240 [1] : vector<8x32xf32> to vector<8xf32>
    %571 = vector.shape_cast %570 : vector<8xf32> to vector<8x1xf32>
    %cst_241 = arith.constant 3.200000e+01 : f32
    %572 = vector.broadcast %cst_241 : f32 to vector<8x1xf32>
    %573 = arith.divf %571, %572 : vector<8x1xf32>
    %574 = vector.broadcast %573 : vector<8x1xf32> to vector<8x32xf32>
    %575 = arith.subf %565, %574 : vector<8x32xf32>
    %576 = arith.mulf %575, %575 : vector<8x32xf32>
    %cst_242 = arith.constant dense<0.000000e+00> : vector<8xf32>
    %577 = vector.multi_reduction <add>, %576, %cst_242 [1] : vector<8x32xf32> to vector<8xf32>
    %578 = vector.shape_cast %577 : vector<8xf32> to vector<8x1xf32>
    %cst_243 = arith.constant 0.0322580636 : f32
    %579 = vector.broadcast %cst_243 : f32 to vector<8x1xf32>
    %580 = arith.mulf %578, %579 : vector<8x1xf32>
    %581 = math.sqrt %580 : vector<8x1xf32>
    %cst_244 = arith.constant 9.99999997E-7 : f32
    %582 = vector.broadcast %cst_244 : f32 to vector<8x1xf32>
    %583 = arith.addf %581, %582 : vector<8x1xf32>
    %584 = tpu.reciprocal %583 {approx = true} : vector<8x1xf32> -> vector<8x1xf32>
    %585 = vector.broadcast %573 : vector<8x1xf32> to vector<8x32xf32>
    %586 = arith.subf %565, %585 : vector<8x32xf32>
    %587 = vector.broadcast %567 : vector<1x32xf32> to vector<8x32xf32>
    %588 = arith.mulf %587, %586 : vector<8x32xf32>
    %589 = vector.broadcast %584 : vector<8x1xf32> to vector<8x32xf32>
    %590 = arith.mulf %588, %589 : vector<8x32xf32>
    %591 = vector.broadcast %569 : vector<1x32xf32> to vector<8x32xf32>
    %592 = arith.addf %590, %591 : vector<8x32xf32>
    %c0_245 = arith.constant 0 : index
    %c2_246 = arith.constant 2 : index
    %c0_247 = arith.constant 0 : index
    %c0_248 = arith.constant 0 : index
    %593 = vector.load %arg10[%c0_245, %c2_246, %c0_247, %c0_248] : memref<2x7x32x128xbf16, #tpu.memory_space<vmem>>, vector<1x1x32x32xbf16>
    %594 = vector.shape_cast %593 : vector<1x1x32x32xbf16> to vector<32x32xbf16>
    %c0_249 = arith.constant 0 : index
    %c6_250 = arith.constant 6 : index
    %c0_251 = arith.constant 0 : index
    %595 = vector.load %arg11[%c0_249, %c6_250, %c0_251] : memref<2x16x128xf32, #tpu.memory_space<vmem>>, vector<1x1x32xf32>
    %596 = vector.shape_cast %595 : vector<1x1x32xf32> to vector<1x32xf32>
    %c0_252 = arith.constant 0 : index
    %c3_253 = arith.constant 3 : index
    %c0_254 = arith.constant 0 : index
    %c0_255 = arith.constant 0 : index
    %597 = vector.load %arg10[%c0_252, %c3_253, %c0_254, %c0_255] : memref<2x7x32x128xbf16, #tpu.memory_space<vmem>>, vector<1x1x32x64xbf16>
    %598 = vector.shape_cast %597 : vector<1x1x32x64xbf16> to vector<32x64xbf16>
    %c0_256 = arith.constant 0 : index
    %c7_257 = arith.constant 7 : index
    %c0_258 = arith.constant 0 : index
    %599 = vector.load %arg11[%c0_256, %c7_257, %c0_258] : memref<2x16x128xf32, #tpu.memory_space<vmem>>, vector<1x1x64xf32>
    %600 = vector.shape_cast %599 : vector<1x1x64xf32> to vector<1x64xf32>
    %c0_259 = arith.constant 0 : index
    %c4_260 = arith.constant 4 : index
    %c0_261 = arith.constant 0 : index
    %c0_262 = arith.constant 0 : index
    %601 = vector.load %arg10[%c0_259, %c4_260, %c0_261, %c0_262] : memref<2x7x32x128xbf16, #tpu.memory_space<vmem>>, vector<1x1x32x32xbf16>
    %602 = vector.shape_cast %601 : vector<1x1x32x32xbf16> to vector<32x32xbf16>
    %c0_263 = arith.constant 0 : index
    %c8 = arith.constant 8 : index
    %c0_264 = arith.constant 0 : index
    %603 = vector.load %arg11[%c0_263, %c8, %c0_264] : memref<2x16x128xf32, #tpu.memory_space<vmem>>, vector<1x1x32xf32>
    %604 = vector.shape_cast %603 : vector<1x1x32xf32> to vector<1x32xf32>
    %605 = arith.truncf %592 : vector<8x32xf32> to vector<8x32xbf16>
    %cst_265 = arith.constant dense<0.000000e+00> : vector<8x32xf32>
    %606 = tpu.matmul %605, %594, %cst_265 {dimension_numbers = #tpu.dot_dimension_numbers<[1], [0], [0], [1], [0, 0, 1, 1], [], []>} : vector<8x32xbf16>, vector<32x32xbf16>, vector<8x32xf32> -> vector<8x32xf32>
    %607 = vector.broadcast %596 : vector<1x32xf32> to vector<8x32xf32>
    %608 = arith.addf %606, %607 : vector<8x32xf32>
    %cst_266 = arith.constant dense<0.000000e+00> : vector<8x64xf32>
    %609 = tpu.matmul %418, %598, %cst_266 {dimension_numbers = #tpu.dot_dimension_numbers<[1], [0], [0], [1], [0, 0, 1, 1], [], []>} : vector<8x32xbf16>, vector<32x64xbf16>, vector<8x64xf32> -> vector<8x64xf32>
    %610 = vector.broadcast %600 : vector<1x64xf32> to vector<8x64xf32>
    %611 = arith.addf %609, %610 : vector<8x64xf32>
    %612 = arith.truncf %608 : vector<8x32xf32> to vector<8x32xbf16>
    %613 = arith.truncf %611 : vector<8x64xf32> to vector<8x64xbf16>
    %614 = vector.extract_strided_slice %612 {offsets = [0, 0], sizes = [8, 8], strides = [1, 1]} : vector<8x32xbf16> to vector<8x8xbf16>
    %615 = vector.extract_strided_slice %613 {offsets = [0, 0], sizes = [8, 8], strides = [1, 1]} : vector<8x64xbf16> to vector<8x8xbf16>
    %616 = vector.extract_strided_slice %613 {offsets = [0, 32], sizes = [8, 8], strides = [1, 1]} : vector<8x64xbf16> to vector<8x8xbf16>
    %cst_267 = arith.constant dense<0.000000e+00> : vector<8x8xf32>
    %617 = tpu.matmul %614, %615, %cst_267 {dimension_numbers = #tpu.dot_dimension_numbers<[1], [1], [0], [0], [0, 0, 1, 0], [], []>} : vector<8x8xbf16>, vector<8x8xbf16>, vector<8x8xf32> -> vector<8x8xf32>
    %cst_268 = arith.constant 0.353553385 : f32
    %618 = vector.broadcast %cst_268 : f32 to vector<8x8xf32>
    %619 = arith.mulf %617, %618 : vector<8x8xf32>
    %620 = vector.broadcast %5 : vector<1x8xf32> to vector<8x8xf32>
    %621 = arith.addf %619, %620 : vector<8x8xf32>
    %cst_269 = arith.constant dense<0xFF800000> : vector<8xf32>
    %622 = vector.multi_reduction <maximumf>, %621, %cst_269 [1] : vector<8x8xf32> to vector<8xf32>
    %623 = vector.shape_cast %622 : vector<8xf32> to vector<8x1xf32>
    %624 = vector.broadcast %623 : vector<8x1xf32> to vector<8x8xf32>
    %625 = arith.subf %621, %624 : vector<8x8xf32>
    %626 = math.exp %625 : vector<8x8xf32>
    %cst_270 = arith.constant dense<0.000000e+00> : vector<8xf32>
    %627 = vector.multi_reduction <add>, %626, %cst_270 [1] : vector<8x8xf32> to vector<8xf32>
    %628 = vector.shape_cast %627 : vector<8xf32> to vector<8x1xf32>
    %629 = tpu.reciprocal %628 {approx = true} : vector<8x1xf32> -> vector<8x1xf32>
    %630 = vector.broadcast %629 : vector<8x1xf32> to vector<8x8xf32>
    %631 = arith.mulf %626, %630 : vector<8x8xf32>
    %632 = vector.extract_strided_slice %602 {offsets = [0, 0], sizes = [8, 32], strides = [1, 1]} : vector<32x32xbf16> to vector<8x32xbf16>
    %cst_271 = arith.constant dense<0.000000e+00> : vector<8x32xf32>
    %633 = tpu.matmul %616, %632, %cst_271 {dimension_numbers = #tpu.dot_dimension_numbers<[1], [0], [0], [1], [0, 0, 1, 1], [], []>} : vector<8x8xbf16>, vector<8x32xbf16>, vector<8x32xf32> -> vector<8x32xf32>
    %634 = arith.truncf %631 : vector<8x8xf32> to vector<8x8xbf16>
    %635 = arith.truncf %633 : vector<8x32xf32> to vector<8x32xbf16>
    %cst_272 = arith.constant dense<0.000000e+00> : vector<8x32xf32>
    %636 = tpu.matmul %634, %635, %cst_272 {dimension_numbers = #tpu.dot_dimension_numbers<[1], [0], [0], [1], [0, 0, 1, 1], [], []>} : vector<8x8xbf16>, vector<8x32xbf16>, vector<8x32xf32> -> vector<8x32xf32>
    %637 = vector.extract_strided_slice %612 {offsets = [0, 8], sizes = [8, 8], strides = [1, 1]} : vector<8x32xbf16> to vector<8x8xbf16>
    %638 = vector.extract_strided_slice %613 {offsets = [0, 8], sizes = [8, 8], strides = [1, 1]} : vector<8x64xbf16> to vector<8x8xbf16>
    %639 = vector.extract_strided_slice %613 {offsets = [0, 40], sizes = [8, 8], strides = [1, 1]} : vector<8x64xbf16> to vector<8x8xbf16>
    %cst_273 = arith.constant dense<0.000000e+00> : vector<8x8xf32>
    %640 = tpu.matmul %637, %638, %cst_273 {dimension_numbers = #tpu.dot_dimension_numbers<[1], [1], [0], [0], [0, 0, 1, 0], [], []>} : vector<8x8xbf16>, vector<8x8xbf16>, vector<8x8xf32> -> vector<8x8xf32>
    %cst_274 = arith.constant 0.353553385 : f32
    %641 = vector.broadcast %cst_274 : f32 to vector<8x8xf32>
    %642 = arith.mulf %640, %641 : vector<8x8xf32>
    %643 = vector.broadcast %5 : vector<1x8xf32> to vector<8x8xf32>
    %644 = arith.addf %642, %643 : vector<8x8xf32>
    %cst_275 = arith.constant dense<0xFF800000> : vector<8xf32>
    %645 = vector.multi_reduction <maximumf>, %644, %cst_275 [1] : vector<8x8xf32> to vector<8xf32>
    %646 = vector.shape_cast %645 : vector<8xf32> to vector<8x1xf32>
    %647 = vector.broadcast %646 : vector<8x1xf32> to vector<8x8xf32>
    %648 = arith.subf %644, %647 : vector<8x8xf32>
    %649 = math.exp %648 : vector<8x8xf32>
    %cst_276 = arith.constant dense<0.000000e+00> : vector<8xf32>
    %650 = vector.multi_reduction <add>, %649, %cst_276 [1] : vector<8x8xf32> to vector<8xf32>
    %651 = vector.shape_cast %650 : vector<8xf32> to vector<8x1xf32>
    %652 = tpu.reciprocal %651 {approx = true} : vector<8x1xf32> -> vector<8x1xf32>
    %653 = vector.broadcast %652 : vector<8x1xf32> to vector<8x8xf32>
    %654 = arith.mulf %649, %653 : vector<8x8xf32>
    %655 = vector.extract_strided_slice %602 {offsets = [8, 0], sizes = [8, 32], strides = [1, 1]} : vector<32x32xbf16> to vector<8x32xbf16>
    %cst_277 = arith.constant dense<0.000000e+00> : vector<8x32xf32>
    %656 = tpu.matmul %639, %655, %cst_277 {dimension_numbers = #tpu.dot_dimension_numbers<[1], [0], [0], [1], [0, 0, 1, 1], [], []>} : vector<8x8xbf16>, vector<8x32xbf16>, vector<8x32xf32> -> vector<8x32xf32>
    %657 = arith.truncf %654 : vector<8x8xf32> to vector<8x8xbf16>
    %658 = arith.truncf %656 : vector<8x32xf32> to vector<8x32xbf16>
    %cst_278 = arith.constant dense<0.000000e+00> : vector<8x32xf32>
    %659 = tpu.matmul %657, %658, %cst_278 {dimension_numbers = #tpu.dot_dimension_numbers<[1], [0], [0], [1], [0, 0, 1, 1], [], []>} : vector<8x8xbf16>, vector<8x32xbf16>, vector<8x32xf32> -> vector<8x32xf32>
    %660 = arith.addf %636, %659 : vector<8x32xf32>
    %661 = vector.extract_strided_slice %612 {offsets = [0, 16], sizes = [8, 8], strides = [1, 1]} : vector<8x32xbf16> to vector<8x8xbf16>
    %662 = vector.extract_strided_slice %613 {offsets = [0, 16], sizes = [8, 8], strides = [1, 1]} : vector<8x64xbf16> to vector<8x8xbf16>
    %663 = vector.extract_strided_slice %613 {offsets = [0, 48], sizes = [8, 8], strides = [1, 1]} : vector<8x64xbf16> to vector<8x8xbf16>
    %cst_279 = arith.constant dense<0.000000e+00> : vector<8x8xf32>
    %664 = tpu.matmul %661, %662, %cst_279 {dimension_numbers = #tpu.dot_dimension_numbers<[1], [1], [0], [0], [0, 0, 1, 0], [], []>} : vector<8x8xbf16>, vector<8x8xbf16>, vector<8x8xf32> -> vector<8x8xf32>
    %cst_280 = arith.constant 0.353553385 : f32
    %665 = vector.broadcast %cst_280 : f32 to vector<8x8xf32>
    %666 = arith.mulf %664, %665 : vector<8x8xf32>
    %667 = vector.broadcast %5 : vector<1x8xf32> to vector<8x8xf32>
    %668 = arith.addf %666, %667 : vector<8x8xf32>
    %cst_281 = arith.constant dense<0xFF800000> : vector<8xf32>
    %669 = vector.multi_reduction <maximumf>, %668, %cst_281 [1] : vector<8x8xf32> to vector<8xf32>
    %670 = vector.shape_cast %669 : vector<8xf32> to vector<8x1xf32>
    %671 = vector.broadcast %670 : vector<8x1xf32> to vector<8x8xf32>
    %672 = arith.subf %668, %671 : vector<8x8xf32>
    %673 = math.exp %672 : vector<8x8xf32>
    %cst_282 = arith.constant dense<0.000000e+00> : vector<8xf32>
    %674 = vector.multi_reduction <add>, %673, %cst_282 [1] : vector<8x8xf32> to vector<8xf32>
    %675 = vector.shape_cast %674 : vector<8xf32> to vector<8x1xf32>
    %676 = tpu.reciprocal %675 {approx = true} : vector<8x1xf32> -> vector<8x1xf32>
    %677 = vector.broadcast %676 : vector<8x1xf32> to vector<8x8xf32>
    %678 = arith.mulf %673, %677 : vector<8x8xf32>
    %679 = vector.extract_strided_slice %602 {offsets = [16, 0], sizes = [8, 32], strides = [1, 1]} : vector<32x32xbf16> to vector<8x32xbf16>
    %cst_283 = arith.constant dense<0.000000e+00> : vector<8x32xf32>
    %680 = tpu.matmul %663, %679, %cst_283 {dimension_numbers = #tpu.dot_dimension_numbers<[1], [0], [0], [1], [0, 0, 1, 1], [], []>} : vector<8x8xbf16>, vector<8x32xbf16>, vector<8x32xf32> -> vector<8x32xf32>
    %681 = arith.truncf %678 : vector<8x8xf32> to vector<8x8xbf16>
    %682 = arith.truncf %680 : vector<8x32xf32> to vector<8x32xbf16>
    %cst_284 = arith.constant dense<0.000000e+00> : vector<8x32xf32>
    %683 = tpu.matmul %681, %682, %cst_284 {dimension_numbers = #tpu.dot_dimension_numbers<[1], [0], [0], [1], [0, 0, 1, 1], [], []>} : vector<8x8xbf16>, vector<8x32xbf16>, vector<8x32xf32> -> vector<8x32xf32>
    %684 = arith.addf %660, %683 : vector<8x32xf32>
    %685 = vector.extract_strided_slice %612 {offsets = [0, 24], sizes = [8, 8], strides = [1, 1]} : vector<8x32xbf16> to vector<8x8xbf16>
    %686 = vector.extract_strided_slice %613 {offsets = [0, 24], sizes = [8, 8], strides = [1, 1]} : vector<8x64xbf16> to vector<8x8xbf16>
    %687 = vector.extract_strided_slice %613 {offsets = [0, 56], sizes = [8, 8], strides = [1, 1]} : vector<8x64xbf16> to vector<8x8xbf16>
    %cst_285 = arith.constant dense<0.000000e+00> : vector<8x8xf32>
    %688 = tpu.matmul %685, %686, %cst_285 {dimension_numbers = #tpu.dot_dimension_numbers<[1], [1], [0], [0], [0, 0, 1, 0], [], []>} : vector<8x8xbf16>, vector<8x8xbf16>, vector<8x8xf32> -> vector<8x8xf32>
    %cst_286 = arith.constant 0.353553385 : f32
    %689 = vector.broadcast %cst_286 : f32 to vector<8x8xf32>
    %690 = arith.mulf %688, %689 : vector<8x8xf32>
    %691 = vector.broadcast %5 : vector<1x8xf32> to vector<8x8xf32>
    %692 = arith.addf %690, %691 : vector<8x8xf32>
    %cst_287 = arith.constant dense<0xFF800000> : vector<8xf32>
    %693 = vector.multi_reduction <maximumf>, %692, %cst_287 [1] : vector<8x8xf32> to vector<8xf32>
    %694 = vector.shape_cast %693 : vector<8xf32> to vector<8x1xf32>
    %695 = vector.broadcast %694 : vector<8x1xf32> to vector<8x8xf32>
    %696 = arith.subf %692, %695 : vector<8x8xf32>
    %697 = math.exp %696 : vector<8x8xf32>
    %cst_288 = arith.constant dense<0.000000e+00> : vector<8xf32>
    %698 = vector.multi_reduction <add>, %697, %cst_288 [1] : vector<8x8xf32> to vector<8xf32>
    %699 = vector.shape_cast %698 : vector<8xf32> to vector<8x1xf32>
    %700 = tpu.reciprocal %699 {approx = true} : vector<8x1xf32> -> vector<8x1xf32>
    %701 = vector.broadcast %700 : vector<8x1xf32> to vector<8x8xf32>
    %702 = arith.mulf %697, %701 : vector<8x8xf32>
    %703 = vector.extract_strided_slice %602 {offsets = [24, 0], sizes = [8, 32], strides = [1, 1]} : vector<32x32xbf16> to vector<8x32xbf16>
    %cst_289 = arith.constant dense<0.000000e+00> : vector<8x32xf32>
    %704 = tpu.matmul %687, %703, %cst_289 {dimension_numbers = #tpu.dot_dimension_numbers<[1], [0], [0], [1], [0, 0, 1, 1], [], []>} : vector<8x8xbf16>, vector<8x32xbf16>, vector<8x32xf32> -> vector<8x32xf32>
    %705 = arith.truncf %702 : vector<8x8xf32> to vector<8x8xbf16>
    %706 = arith.truncf %704 : vector<8x32xf32> to vector<8x32xbf16>
    %cst_290 = arith.constant dense<0.000000e+00> : vector<8x32xf32>
    %707 = tpu.matmul %705, %706, %cst_290 {dimension_numbers = #tpu.dot_dimension_numbers<[1], [0], [0], [1], [0, 0, 1, 1], [], []>} : vector<8x8xbf16>, vector<8x32xbf16>, vector<8x32xf32> -> vector<8x32xf32>
    %708 = arith.addf %684, %707 : vector<8x32xf32>
    %709 = arith.addf %565, %708 : vector<8x32xf32>
    %710 = vector.broadcast %604 : vector<1x32xf32> to vector<8x32xf32>
    %711 = arith.addf %709, %710 : vector<8x32xf32>
    %c0_291 = arith.constant 0 : index
    %c9 = arith.constant 9 : index
    %c0_292 = arith.constant 0 : index
    %712 = vector.load %arg11[%c0_291, %c9, %c0_292] : memref<2x16x128xf32, #tpu.memory_space<vmem>>, vector<1x1x32xf32>
    %713 = vector.shape_cast %712 : vector<1x1x32xf32> to vector<1x32xf32>
    %c0_293 = arith.constant 0 : index
    %c10 = arith.constant 10 : index
    %c0_294 = arith.constant 0 : index
    %714 = vector.load %arg11[%c0_293, %c10, %c0_294] : memref<2x16x128xf32, #tpu.memory_space<vmem>>, vector<1x1x32xf32>
    %715 = vector.shape_cast %714 : vector<1x1x32xf32> to vector<1x32xf32>
    %cst_295 = arith.constant dense<0.000000e+00> : vector<8xf32>
    %716 = vector.multi_reduction <add>, %711, %cst_295 [1] : vector<8x32xf32> to vector<8xf32>
    %717 = vector.shape_cast %716 : vector<8xf32> to vector<8x1xf32>
    %cst_296 = arith.constant 3.200000e+01 : f32
    %718 = vector.broadcast %cst_296 : f32 to vector<8x1xf32>
    %719 = arith.divf %717, %718 : vector<8x1xf32>
    %720 = vector.broadcast %719 : vector<8x1xf32> to vector<8x32xf32>
    %721 = arith.subf %711, %720 : vector<8x32xf32>
    %722 = arith.mulf %721, %721 : vector<8x32xf32>
    %cst_297 = arith.constant dense<0.000000e+00> : vector<8xf32>
    %723 = vector.multi_reduction <add>, %722, %cst_297 [1] : vector<8x32xf32> to vector<8xf32>
    %724 = vector.shape_cast %723 : vector<8xf32> to vector<8x1xf32>
    %cst_298 = arith.constant 0.0322580636 : f32
    %725 = vector.broadcast %cst_298 : f32 to vector<8x1xf32>
    %726 = arith.mulf %724, %725 : vector<8x1xf32>
    %727 = math.sqrt %726 : vector<8x1xf32>
    %cst_299 = arith.constant 9.99999997E-7 : f32
    %728 = vector.broadcast %cst_299 : f32 to vector<8x1xf32>
    %729 = arith.addf %727, %728 : vector<8x1xf32>
    %730 = tpu.reciprocal %729 {approx = true} : vector<8x1xf32> -> vector<8x1xf32>
    %731 = vector.broadcast %719 : vector<8x1xf32> to vector<8x32xf32>
    %732 = arith.subf %711, %731 : vector<8x32xf32>
    %733 = vector.broadcast %713 : vector<1x32xf32> to vector<8x32xf32>
    %734 = arith.mulf %733, %732 : vector<8x32xf32>
    %735 = vector.broadcast %730 : vector<8x1xf32> to vector<8x32xf32>
    %736 = arith.mulf %734, %735 : vector<8x32xf32>
    %737 = vector.broadcast %715 : vector<1x32xf32> to vector<8x32xf32>
    %738 = arith.addf %736, %737 : vector<8x32xf32>
    %c0_300 = arith.constant 0 : index
    %c5_301 = arith.constant 5 : index
    %c0_302 = arith.constant 0 : index
    %c0_303 = arith.constant 0 : index
    %739 = vector.load %arg10[%c0_300, %c5_301, %c0_302, %c0_303] : memref<2x7x32x128xbf16, #tpu.memory_space<vmem>>, vector<1x1x32x64xbf16>
    %740 = vector.shape_cast %739 : vector<1x1x32x64xbf16> to vector<32x64xbf16>
    %c0_304 = arith.constant 0 : index
    %c11 = arith.constant 11 : index
    %c0_305 = arith.constant 0 : index
    %741 = vector.load %arg11[%c0_304, %c11, %c0_305] : memref<2x16x128xf32, #tpu.memory_space<vmem>>, vector<1x1x64xf32>
    %742 = vector.shape_cast %741 : vector<1x1x64xf32> to vector<1x64xf32>
    %c0_306 = arith.constant 0 : index
    %c6_307 = arith.constant 6 : index
    %c0_308 = arith.constant 0 : index
    %c0_309 = arith.constant 0 : index
    %743 = vector.load %arg10[%c0_306, %c6_307, %c0_308, %c0_309] : memref<2x7x32x128xbf16, #tpu.memory_space<vmem>>, vector<1x1x32x64xbf16>
    %744 = vector.shape_cast %743 : vector<1x1x32x64xbf16> to vector<32x64xbf16>
    %c0_310 = arith.constant 0 : index
    %c12 = arith.constant 12 : index
    %c0_311 = arith.constant 0 : index
    %745 = vector.load %arg11[%c0_310, %c12, %c0_311] : memref<2x16x128xf32, #tpu.memory_space<vmem>>, vector<1x1x32xf32>
    %746 = vector.shape_cast %745 : vector<1x1x32xf32> to vector<1x32xf32>
    %747 = arith.truncf %738 : vector<8x32xf32> to vector<8x32xbf16>
    %cst_312 = arith.constant dense<0.000000e+00> : vector<8x64xf32>
    %748 = tpu.matmul %747, %740, %cst_312 {dimension_numbers = #tpu.dot_dimension_numbers<[1], [0], [0], [1], [0, 0, 1, 1], [], []>} : vector<8x32xbf16>, vector<32x64xbf16>, vector<8x64xf32> -> vector<8x64xf32>
    %749 = vector.broadcast %742 : vector<1x64xf32> to vector<8x64xf32>
    %750 = arith.addf %748, %749 : vector<8x64xf32>
    %cst_313 = arith.constant 0.000000e+00 : f32
    %751 = vector.broadcast %cst_313 : f32 to vector<8x64xf32>
    %752 = arith.maximumf %750, %751 : vector<8x64xf32>
    %753 = arith.truncf %752 : vector<8x64xf32> to vector<8x64xbf16>
    %cst_314 = arith.constant dense<0.000000e+00> : vector<8x32xf32>
    %754 = tpu.matmul %753, %744, %cst_314 {dimension_numbers = #tpu.dot_dimension_numbers<[1], [1], [0], [0], [0, 0, 1, 0], [], []>} : vector<8x64xbf16>, vector<32x64xbf16>, vector<8x32xf32> -> vector<8x32xf32>
    %755 = arith.addf %711, %754 : vector<8x32xf32>
    %756 = vector.broadcast %746 : vector<1x32xf32> to vector<8x32xf32>
    %757 = arith.addf %755, %756 : vector<8x32xf32>
    %c1_315 = arith.constant 1 : index
    %c0_316 = arith.constant 0 : index
    %c0_317 = arith.constant 0 : index
    %758 = vector.load %arg11[%c1_315, %c0_316, %c0_317] : memref<2x16x128xf32, #tpu.memory_space<vmem>>, vector<1x1x32xf32>
    %759 = vector.shape_cast %758 : vector<1x1x32xf32> to vector<1x32xf32>
    %c1_318 = arith.constant 1 : index
    %c1_319 = arith.constant 1 : index
    %c0_320 = arith.constant 0 : index
    %760 = vector.load %arg11[%c1_318, %c1_319, %c0_320] : memref<2x16x128xf32, #tpu.memory_space<vmem>>, vector<1x1x32xf32>
    %761 = vector.shape_cast %760 : vector<1x1x32xf32> to vector<1x32xf32>
    %cst_321 = arith.constant dense<0.000000e+00> : vector<8xf32>
    %762 = vector.multi_reduction <add>, %757, %cst_321 [1] : vector<8x32xf32> to vector<8xf32>
    %763 = vector.shape_cast %762 : vector<8xf32> to vector<8x1xf32>
    %cst_322 = arith.constant 3.200000e+01 : f32
    %764 = vector.broadcast %cst_322 : f32 to vector<8x1xf32>
    %765 = arith.divf %763, %764 : vector<8x1xf32>
    %766 = vector.broadcast %765 : vector<8x1xf32> to vector<8x32xf32>
    %767 = arith.subf %757, %766 : vector<8x32xf32>
    %768 = arith.mulf %767, %767 : vector<8x32xf32>
    %cst_323 = arith.constant dense<0.000000e+00> : vector<8xf32>
    %769 = vector.multi_reduction <add>, %768, %cst_323 [1] : vector<8x32xf32> to vector<8xf32>
    %770 = vector.shape_cast %769 : vector<8xf32> to vector<8x1xf32>
    %cst_324 = arith.constant 0.0322580636 : f32
    %771 = vector.broadcast %cst_324 : f32 to vector<8x1xf32>
    %772 = arith.mulf %770, %771 : vector<8x1xf32>
    %773 = math.sqrt %772 : vector<8x1xf32>
    %cst_325 = arith.constant 9.99999997E-7 : f32
    %774 = vector.broadcast %cst_325 : f32 to vector<8x1xf32>
    %775 = arith.addf %773, %774 : vector<8x1xf32>
    %776 = tpu.reciprocal %775 {approx = true} : vector<8x1xf32> -> vector<8x1xf32>
    %777 = vector.broadcast %765 : vector<8x1xf32> to vector<8x32xf32>
    %778 = arith.subf %757, %777 : vector<8x32xf32>
    %779 = vector.broadcast %759 : vector<1x32xf32> to vector<8x32xf32>
    %780 = arith.mulf %779, %778 : vector<8x32xf32>
    %781 = vector.broadcast %776 : vector<8x1xf32> to vector<8x32xf32>
    %782 = arith.mulf %780, %781 : vector<8x32xf32>
    %783 = vector.broadcast %761 : vector<1x32xf32> to vector<8x32xf32>
    %784 = arith.addf %782, %783 : vector<8x32xf32>
    %c1_326 = arith.constant 1 : index
    %c0_327 = arith.constant 0 : index
    %c0_328 = arith.constant 0 : index
    %c0_329 = arith.constant 0 : index
    %785 = vector.load %arg10[%c1_326, %c0_327, %c0_328, %c0_329] : memref<2x7x32x128xbf16, #tpu.memory_space<vmem>>, vector<1x1x32x96xbf16>
    %786 = vector.shape_cast %785 : vector<1x1x32x96xbf16> to vector<32x96xbf16>
    %c1_330 = arith.constant 1 : index
    %c2_331 = arith.constant 2 : index
    %c0_332 = arith.constant 0 : index
    %787 = vector.load %arg11[%c1_330, %c2_331, %c0_332] : memref<2x16x128xf32, #tpu.memory_space<vmem>>, vector<1x1x96xf32>
    %788 = vector.shape_cast %787 : vector<1x1x96xf32> to vector<1x96xf32>
    %c1_333 = arith.constant 1 : index
    %c1_334 = arith.constant 1 : index
    %c0_335 = arith.constant 0 : index
    %c0_336 = arith.constant 0 : index
    %789 = vector.load %arg10[%c1_333, %c1_334, %c0_335, %c0_336] : memref<2x7x32x128xbf16, #tpu.memory_space<vmem>>, vector<1x1x32x32xbf16>
    %790 = vector.shape_cast %789 : vector<1x1x32x32xbf16> to vector<32x32xbf16>
    %c1_337 = arith.constant 1 : index
    %c3_338 = arith.constant 3 : index
    %c0_339 = arith.constant 0 : index
    %791 = vector.load %arg11[%c1_337, %c3_338, %c0_339] : memref<2x16x128xf32, #tpu.memory_space<vmem>>, vector<1x1x32xf32>
    %792 = vector.shape_cast %791 : vector<1x1x32xf32> to vector<1x32xf32>
    %793 = arith.truncf %784 : vector<8x32xf32> to vector<8x32xbf16>
    %cst_340 = arith.constant dense<0.000000e+00> : vector<8x96xf32>
    %794 = tpu.matmul %793, %786, %cst_340 {dimension_numbers = #tpu.dot_dimension_numbers<[1], [0], [0], [1], [0, 0, 1, 1], [], []>} : vector<8x32xbf16>, vector<32x96xbf16>, vector<8x96xf32> -> vector<8x96xf32>
    %795 = vector.broadcast %788 : vector<1x96xf32> to vector<8x96xf32>
    %796 = arith.addf %794, %795 : vector<8x96xf32>
    %797 = arith.truncf %796 : vector<8x96xf32> to vector<8x96xbf16>
    %798 = vector.extract_strided_slice %797 {offsets = [0, 0], sizes = [8, 8], strides = [1, 1]} : vector<8x96xbf16> to vector<8x8xbf16>
    %799 = vector.extract_strided_slice %797 {offsets = [0, 32], sizes = [8, 8], strides = [1, 1]} : vector<8x96xbf16> to vector<8x8xbf16>
    %800 = vector.extract_strided_slice %797 {offsets = [0, 64], sizes = [8, 8], strides = [1, 1]} : vector<8x96xbf16> to vector<8x8xbf16>
    %cst_341 = arith.constant dense<0.000000e+00> : vector<8x8xf32>
    %801 = tpu.matmul %798, %799, %cst_341 {dimension_numbers = #tpu.dot_dimension_numbers<[1], [1], [0], [0], [0, 0, 1, 0], [], []>} : vector<8x8xbf16>, vector<8x8xbf16>, vector<8x8xf32> -> vector<8x8xf32>
    %cst_342 = arith.constant 0.353553385 : f32
    %802 = vector.broadcast %cst_342 : f32 to vector<8x8xf32>
    %803 = arith.mulf %801, %802 : vector<8x8xf32>
    %804 = arith.addf %803, %11 : vector<8x8xf32>
    %cst_343 = arith.constant dense<0xFF800000> : vector<8xf32>
    %805 = vector.multi_reduction <maximumf>, %804, %cst_343 [1] : vector<8x8xf32> to vector<8xf32>
    %806 = vector.shape_cast %805 : vector<8xf32> to vector<8x1xf32>
    %807 = vector.broadcast %806 : vector<8x1xf32> to vector<8x8xf32>
    %808 = arith.subf %804, %807 : vector<8x8xf32>
    %809 = math.exp %808 : vector<8x8xf32>
    %cst_344 = arith.constant dense<0.000000e+00> : vector<8xf32>
    %810 = vector.multi_reduction <add>, %809, %cst_344 [1] : vector<8x8xf32> to vector<8xf32>
    %811 = vector.shape_cast %810 : vector<8xf32> to vector<8x1xf32>
    %812 = tpu.reciprocal %811 {approx = true} : vector<8x1xf32> -> vector<8x1xf32>
    %813 = vector.broadcast %812 : vector<8x1xf32> to vector<8x8xf32>
    %814 = arith.mulf %809, %813 : vector<8x8xf32>
    %815 = vector.extract_strided_slice %790 {offsets = [0, 0], sizes = [8, 32], strides = [1, 1]} : vector<32x32xbf16> to vector<8x32xbf16>
    %cst_345 = arith.constant dense<0.000000e+00> : vector<8x32xf32>
    %816 = tpu.matmul %800, %815, %cst_345 {dimension_numbers = #tpu.dot_dimension_numbers<[1], [0], [0], [1], [0, 0, 1, 1], [], []>} : vector<8x8xbf16>, vector<8x32xbf16>, vector<8x32xf32> -> vector<8x32xf32>
    %817 = arith.truncf %814 : vector<8x8xf32> to vector<8x8xbf16>
    %818 = arith.truncf %816 : vector<8x32xf32> to vector<8x32xbf16>
    %cst_346 = arith.constant dense<0.000000e+00> : vector<8x32xf32>
    %819 = tpu.matmul %817, %818, %cst_346 {dimension_numbers = #tpu.dot_dimension_numbers<[1], [0], [0], [1], [0, 0, 1, 1], [], []>} : vector<8x8xbf16>, vector<8x32xbf16>, vector<8x32xf32> -> vector<8x32xf32>
    %820 = vector.extract_strided_slice %797 {offsets = [0, 8], sizes = [8, 8], strides = [1, 1]} : vector<8x96xbf16> to vector<8x8xbf16>
    %821 = vector.extract_strided_slice %797 {offsets = [0, 40], sizes = [8, 8], strides = [1, 1]} : vector<8x96xbf16> to vector<8x8xbf16>
    %822 = vector.extract_strided_slice %797 {offsets = [0, 72], sizes = [8, 8], strides = [1, 1]} : vector<8x96xbf16> to vector<8x8xbf16>
    %cst_347 = arith.constant dense<0.000000e+00> : vector<8x8xf32>
    %823 = tpu.matmul %820, %821, %cst_347 {dimension_numbers = #tpu.dot_dimension_numbers<[1], [1], [0], [0], [0, 0, 1, 0], [], []>} : vector<8x8xbf16>, vector<8x8xbf16>, vector<8x8xf32> -> vector<8x8xf32>
    %cst_348 = arith.constant 0.353553385 : f32
    %824 = vector.broadcast %cst_348 : f32 to vector<8x8xf32>
    %825 = arith.mulf %823, %824 : vector<8x8xf32>
    %826 = arith.addf %825, %11 : vector<8x8xf32>
    %cst_349 = arith.constant dense<0xFF800000> : vector<8xf32>
    %827 = vector.multi_reduction <maximumf>, %826, %cst_349 [1] : vector<8x8xf32> to vector<8xf32>
    %828 = vector.shape_cast %827 : vector<8xf32> to vector<8x1xf32>
    %829 = vector.broadcast %828 : vector<8x1xf32> to vector<8x8xf32>
    %830 = arith.subf %826, %829 : vector<8x8xf32>
    %831 = math.exp %830 : vector<8x8xf32>
    %cst_350 = arith.constant dense<0.000000e+00> : vector<8xf32>
    %832 = vector.multi_reduction <add>, %831, %cst_350 [1] : vector<8x8xf32> to vector<8xf32>
    %833 = vector.shape_cast %832 : vector<8xf32> to vector<8x1xf32>
    %834 = tpu.reciprocal %833 {approx = true} : vector<8x1xf32> -> vector<8x1xf32>
    %835 = vector.broadcast %834 : vector<8x1xf32> to vector<8x8xf32>
    %836 = arith.mulf %831, %835 : vector<8x8xf32>
    %837 = vector.extract_strided_slice %790 {offsets = [8, 0], sizes = [8, 32], strides = [1, 1]} : vector<32x32xbf16> to vector<8x32xbf16>
    %cst_351 = arith.constant dense<0.000000e+00> : vector<8x32xf32>
    %838 = tpu.matmul %822, %837, %cst_351 {dimension_numbers = #tpu.dot_dimension_numbers<[1], [0], [0], [1], [0, 0, 1, 1], [], []>} : vector<8x8xbf16>, vector<8x32xbf16>, vector<8x32xf32> -> vector<8x32xf32>
    %839 = arith.truncf %836 : vector<8x8xf32> to vector<8x8xbf16>
    %840 = arith.truncf %838 : vector<8x32xf32> to vector<8x32xbf16>
    %cst_352 = arith.constant dense<0.000000e+00> : vector<8x32xf32>
    %841 = tpu.matmul %839, %840, %cst_352 {dimension_numbers = #tpu.dot_dimension_numbers<[1], [0], [0], [1], [0, 0, 1, 1], [], []>} : vector<8x8xbf16>, vector<8x32xbf16>, vector<8x32xf32> -> vector<8x32xf32>
    %842 = arith.addf %819, %841 : vector<8x32xf32>
    %843 = vector.extract_strided_slice %797 {offsets = [0, 16], sizes = [8, 8], strides = [1, 1]} : vector<8x96xbf16> to vector<8x8xbf16>
    %844 = vector.extract_strided_slice %797 {offsets = [0, 48], sizes = [8, 8], strides = [1, 1]} : vector<8x96xbf16> to vector<8x8xbf16>
    %845 = vector.extract_strided_slice %797 {offsets = [0, 80], sizes = [8, 8], strides = [1, 1]} : vector<8x96xbf16> to vector<8x8xbf16>
    %cst_353 = arith.constant dense<0.000000e+00> : vector<8x8xf32>
    %846 = tpu.matmul %843, %844, %cst_353 {dimension_numbers = #tpu.dot_dimension_numbers<[1], [1], [0], [0], [0, 0, 1, 0], [], []>} : vector<8x8xbf16>, vector<8x8xbf16>, vector<8x8xf32> -> vector<8x8xf32>
    %cst_354 = arith.constant 0.353553385 : f32
    %847 = vector.broadcast %cst_354 : f32 to vector<8x8xf32>
    %848 = arith.mulf %846, %847 : vector<8x8xf32>
    %849 = arith.addf %848, %11 : vector<8x8xf32>
    %cst_355 = arith.constant dense<0xFF800000> : vector<8xf32>
    %850 = vector.multi_reduction <maximumf>, %849, %cst_355 [1] : vector<8x8xf32> to vector<8xf32>
    %851 = vector.shape_cast %850 : vector<8xf32> to vector<8x1xf32>
    %852 = vector.broadcast %851 : vector<8x1xf32> to vector<8x8xf32>
    %853 = arith.subf %849, %852 : vector<8x8xf32>
    %854 = math.exp %853 : vector<8x8xf32>
    %cst_356 = arith.constant dense<0.000000e+00> : vector<8xf32>
    %855 = vector.multi_reduction <add>, %854, %cst_356 [1] : vector<8x8xf32> to vector<8xf32>
    %856 = vector.shape_cast %855 : vector<8xf32> to vector<8x1xf32>
    %857 = tpu.reciprocal %856 {approx = true} : vector<8x1xf32> -> vector<8x1xf32>
    %858 = vector.broadcast %857 : vector<8x1xf32> to vector<8x8xf32>
    %859 = arith.mulf %854, %858 : vector<8x8xf32>
    %860 = vector.extract_strided_slice %790 {offsets = [16, 0], sizes = [8, 32], strides = [1, 1]} : vector<32x32xbf16> to vector<8x32xbf16>
    %cst_357 = arith.constant dense<0.000000e+00> : vector<8x32xf32>
    %861 = tpu.matmul %845, %860, %cst_357 {dimension_numbers = #tpu.dot_dimension_numbers<[1], [0], [0], [1], [0, 0, 1, 1], [], []>} : vector<8x8xbf16>, vector<8x32xbf16>, vector<8x32xf32> -> vector<8x32xf32>
    %862 = arith.truncf %859 : vector<8x8xf32> to vector<8x8xbf16>
    %863 = arith.truncf %861 : vector<8x32xf32> to vector<8x32xbf16>
    %cst_358 = arith.constant dense<0.000000e+00> : vector<8x32xf32>
    %864 = tpu.matmul %862, %863, %cst_358 {dimension_numbers = #tpu.dot_dimension_numbers<[1], [0], [0], [1], [0, 0, 1, 1], [], []>} : vector<8x8xbf16>, vector<8x32xbf16>, vector<8x32xf32> -> vector<8x32xf32>
    %865 = arith.addf %842, %864 : vector<8x32xf32>
    %866 = vector.extract_strided_slice %797 {offsets = [0, 24], sizes = [8, 8], strides = [1, 1]} : vector<8x96xbf16> to vector<8x8xbf16>
    %867 = vector.extract_strided_slice %797 {offsets = [0, 56], sizes = [8, 8], strides = [1, 1]} : vector<8x96xbf16> to vector<8x8xbf16>
    %868 = vector.extract_strided_slice %797 {offsets = [0, 88], sizes = [8, 8], strides = [1, 1]} : vector<8x96xbf16> to vector<8x8xbf16>
    %cst_359 = arith.constant dense<0.000000e+00> : vector<8x8xf32>
    %869 = tpu.matmul %866, %867, %cst_359 {dimension_numbers = #tpu.dot_dimension_numbers<[1], [1], [0], [0], [0, 0, 1, 0], [], []>} : vector<8x8xbf16>, vector<8x8xbf16>, vector<8x8xf32> -> vector<8x8xf32>
    %cst_360 = arith.constant 0.353553385 : f32
    %870 = vector.broadcast %cst_360 : f32 to vector<8x8xf32>
    %871 = arith.mulf %869, %870 : vector<8x8xf32>
    %872 = arith.addf %871, %11 : vector<8x8xf32>
    %cst_361 = arith.constant dense<0xFF800000> : vector<8xf32>
    %873 = vector.multi_reduction <maximumf>, %872, %cst_361 [1] : vector<8x8xf32> to vector<8xf32>
    %874 = vector.shape_cast %873 : vector<8xf32> to vector<8x1xf32>
    %875 = vector.broadcast %874 : vector<8x1xf32> to vector<8x8xf32>
    %876 = arith.subf %872, %875 : vector<8x8xf32>
    %877 = math.exp %876 : vector<8x8xf32>
    %cst_362 = arith.constant dense<0.000000e+00> : vector<8xf32>
    %878 = vector.multi_reduction <add>, %877, %cst_362 [1] : vector<8x8xf32> to vector<8xf32>
    %879 = vector.shape_cast %878 : vector<8xf32> to vector<8x1xf32>
    %880 = tpu.reciprocal %879 {approx = true} : vector<8x1xf32> -> vector<8x1xf32>
    %881 = vector.broadcast %880 : vector<8x1xf32> to vector<8x8xf32>
    %882 = arith.mulf %877, %881 : vector<8x8xf32>
    %883 = vector.extract_strided_slice %790 {offsets = [24, 0], sizes = [8, 32], strides = [1, 1]} : vector<32x32xbf16> to vector<8x32xbf16>
    %cst_363 = arith.constant dense<0.000000e+00> : vector<8x32xf32>
    %884 = tpu.matmul %868, %883, %cst_363 {dimension_numbers = #tpu.dot_dimension_numbers<[1], [0], [0], [1], [0, 0, 1, 1], [], []>} : vector<8x8xbf16>, vector<8x32xbf16>, vector<8x32xf32> -> vector<8x32xf32>
    %885 = arith.truncf %882 : vector<8x8xf32> to vector<8x8xbf16>
    %886 = arith.truncf %884 : vector<8x32xf32> to vector<8x32xbf16>
    %cst_364 = arith.constant dense<0.000000e+00> : vector<8x32xf32>
    %887 = tpu.matmul %885, %886, %cst_364 {dimension_numbers = #tpu.dot_dimension_numbers<[1], [0], [0], [1], [0, 0, 1, 1], [], []>} : vector<8x8xbf16>, vector<8x32xbf16>, vector<8x32xf32> -> vector<8x32xf32>
    %888 = arith.addf %865, %887 : vector<8x32xf32>
    %889 = arith.addf %757, %888 : vector<8x32xf32>
    %890 = vector.broadcast %792 : vector<1x32xf32> to vector<8x32xf32>
    %891 = arith.addf %889, %890 : vector<8x32xf32>
    %c1_365 = arith.constant 1 : index
    %c4_366 = arith.constant 4 : index
    %c0_367 = arith.constant 0 : index
    %892 = vector.load %arg11[%c1_365, %c4_366, %c0_367] : memref<2x16x128xf32, #tpu.memory_space<vmem>>, vector<1x1x32xf32>
    %893 = vector.shape_cast %892 : vector<1x1x32xf32> to vector<1x32xf32>
    %c1_368 = arith.constant 1 : index
    %c5_369 = arith.constant 5 : index
    %c0_370 = arith.constant 0 : index
    %894 = vector.load %arg11[%c1_368, %c5_369, %c0_370] : memref<2x16x128xf32, #tpu.memory_space<vmem>>, vector<1x1x32xf32>
    %895 = vector.shape_cast %894 : vector<1x1x32xf32> to vector<1x32xf32>
    %cst_371 = arith.constant dense<0.000000e+00> : vector<8xf32>
    %896 = vector.multi_reduction <add>, %891, %cst_371 [1] : vector<8x32xf32> to vector<8xf32>
    %897 = vector.shape_cast %896 : vector<8xf32> to vector<8x1xf32>
    %cst_372 = arith.constant 3.200000e+01 : f32
    %898 = vector.broadcast %cst_372 : f32 to vector<8x1xf32>
    %899 = arith.divf %897, %898 : vector<8x1xf32>
    %900 = vector.broadcast %899 : vector<8x1xf32> to vector<8x32xf32>
    %901 = arith.subf %891, %900 : vector<8x32xf32>
    %902 = arith.mulf %901, %901 : vector<8x32xf32>
    %cst_373 = arith.constant dense<0.000000e+00> : vector<8xf32>
    %903 = vector.multi_reduction <add>, %902, %cst_373 [1] : vector<8x32xf32> to vector<8xf32>
    %904 = vector.shape_cast %903 : vector<8xf32> to vector<8x1xf32>
    %cst_374 = arith.constant 0.0322580636 : f32
    %905 = vector.broadcast %cst_374 : f32 to vector<8x1xf32>
    %906 = arith.mulf %904, %905 : vector<8x1xf32>
    %907 = math.sqrt %906 : vector<8x1xf32>
    %cst_375 = arith.constant 9.99999997E-7 : f32
    %908 = vector.broadcast %cst_375 : f32 to vector<8x1xf32>
    %909 = arith.addf %907, %908 : vector<8x1xf32>
    %910 = tpu.reciprocal %909 {approx = true} : vector<8x1xf32> -> vector<8x1xf32>
    %911 = vector.broadcast %899 : vector<8x1xf32> to vector<8x32xf32>
    %912 = arith.subf %891, %911 : vector<8x32xf32>
    %913 = vector.broadcast %893 : vector<1x32xf32> to vector<8x32xf32>
    %914 = arith.mulf %913, %912 : vector<8x32xf32>
    %915 = vector.broadcast %910 : vector<8x1xf32> to vector<8x32xf32>
    %916 = arith.mulf %914, %915 : vector<8x32xf32>
    %917 = vector.broadcast %895 : vector<1x32xf32> to vector<8x32xf32>
    %918 = arith.addf %916, %917 : vector<8x32xf32>
    %c1_376 = arith.constant 1 : index
    %c2_377 = arith.constant 2 : index
    %c0_378 = arith.constant 0 : index
    %c0_379 = arith.constant 0 : index
    %919 = vector.load %arg10[%c1_376, %c2_377, %c0_378, %c0_379] : memref<2x7x32x128xbf16, #tpu.memory_space<vmem>>, vector<1x1x32x32xbf16>
    %920 = vector.shape_cast %919 : vector<1x1x32x32xbf16> to vector<32x32xbf16>
    %c1_380 = arith.constant 1 : index
    %c6_381 = arith.constant 6 : index
    %c0_382 = arith.constant 0 : index
    %921 = vector.load %arg11[%c1_380, %c6_381, %c0_382] : memref<2x16x128xf32, #tpu.memory_space<vmem>>, vector<1x1x32xf32>
    %922 = vector.shape_cast %921 : vector<1x1x32xf32> to vector<1x32xf32>
    %c1_383 = arith.constant 1 : index
    %c3_384 = arith.constant 3 : index
    %c0_385 = arith.constant 0 : index
    %c0_386 = arith.constant 0 : index
    %923 = vector.load %arg10[%c1_383, %c3_384, %c0_385, %c0_386] : memref<2x7x32x128xbf16, #tpu.memory_space<vmem>>, vector<1x1x32x64xbf16>
    %924 = vector.shape_cast %923 : vector<1x1x32x64xbf16> to vector<32x64xbf16>
    %c1_387 = arith.constant 1 : index
    %c7_388 = arith.constant 7 : index
    %c0_389 = arith.constant 0 : index
    %925 = vector.load %arg11[%c1_387, %c7_388, %c0_389] : memref<2x16x128xf32, #tpu.memory_space<vmem>>, vector<1x1x64xf32>
    %926 = vector.shape_cast %925 : vector<1x1x64xf32> to vector<1x64xf32>
    %c1_390 = arith.constant 1 : index
    %c4_391 = arith.constant 4 : index
    %c0_392 = arith.constant 0 : index
    %c0_393 = arith.constant 0 : index
    %927 = vector.load %arg10[%c1_390, %c4_391, %c0_392, %c0_393] : memref<2x7x32x128xbf16, #tpu.memory_space<vmem>>, vector<1x1x32x32xbf16>
    %928 = vector.shape_cast %927 : vector<1x1x32x32xbf16> to vector<32x32xbf16>
    %c1_394 = arith.constant 1 : index
    %c8_395 = arith.constant 8 : index
    %c0_396 = arith.constant 0 : index
    %929 = vector.load %arg11[%c1_394, %c8_395, %c0_396] : memref<2x16x128xf32, #tpu.memory_space<vmem>>, vector<1x1x32xf32>
    %930 = vector.shape_cast %929 : vector<1x1x32xf32> to vector<1x32xf32>
    %931 = arith.truncf %918 : vector<8x32xf32> to vector<8x32xbf16>
    %cst_397 = arith.constant dense<0.000000e+00> : vector<8x32xf32>
    %932 = tpu.matmul %931, %920, %cst_397 {dimension_numbers = #tpu.dot_dimension_numbers<[1], [0], [0], [1], [0, 0, 1, 1], [], []>} : vector<8x32xbf16>, vector<32x32xbf16>, vector<8x32xf32> -> vector<8x32xf32>
    %933 = vector.broadcast %922 : vector<1x32xf32> to vector<8x32xf32>
    %934 = arith.addf %932, %933 : vector<8x32xf32>
    %cst_398 = arith.constant dense<0.000000e+00> : vector<8x64xf32>
    %935 = tpu.matmul %418, %924, %cst_398 {dimension_numbers = #tpu.dot_dimension_numbers<[1], [0], [0], [1], [0, 0, 1, 1], [], []>} : vector<8x32xbf16>, vector<32x64xbf16>, vector<8x64xf32> -> vector<8x64xf32>
    %936 = vector.broadcast %926 : vector<1x64xf32> to vector<8x64xf32>
    %937 = arith.addf %935, %936 : vector<8x64xf32>
    %938 = arith.truncf %934 : vector<8x32xf32> to vector<8x32xbf16>
    %939 = arith.truncf %937 : vector<8x64xf32> to vector<8x64xbf16>
    %940 = vector.extract_strided_slice %938 {offsets = [0, 0], sizes = [8, 8], strides = [1, 1]} : vector<8x32xbf16> to vector<8x8xbf16>
    %941 = vector.extract_strided_slice %939 {offsets = [0, 0], sizes = [8, 8], strides = [1, 1]} : vector<8x64xbf16> to vector<8x8xbf16>
    %942 = vector.extract_strided_slice %939 {offsets = [0, 32], sizes = [8, 8], strides = [1, 1]} : vector<8x64xbf16> to vector<8x8xbf16>
    %cst_399 = arith.constant dense<0.000000e+00> : vector<8x8xf32>
    %943 = tpu.matmul %940, %941, %cst_399 {dimension_numbers = #tpu.dot_dimension_numbers<[1], [1], [0], [0], [0, 0, 1, 0], [], []>} : vector<8x8xbf16>, vector<8x8xbf16>, vector<8x8xf32> -> vector<8x8xf32>
    %cst_400 = arith.constant 0.353553385 : f32
    %944 = vector.broadcast %cst_400 : f32 to vector<8x8xf32>
    %945 = arith.mulf %943, %944 : vector<8x8xf32>
    %946 = vector.broadcast %5 : vector<1x8xf32> to vector<8x8xf32>
    %947 = arith.addf %945, %946 : vector<8x8xf32>
    %cst_401 = arith.constant dense<0xFF800000> : vector<8xf32>
    %948 = vector.multi_reduction <maximumf>, %947, %cst_401 [1] : vector<8x8xf32> to vector<8xf32>
    %949 = vector.shape_cast %948 : vector<8xf32> to vector<8x1xf32>
    %950 = vector.broadcast %949 : vector<8x1xf32> to vector<8x8xf32>
    %951 = arith.subf %947, %950 : vector<8x8xf32>
    %952 = math.exp %951 : vector<8x8xf32>
    %cst_402 = arith.constant dense<0.000000e+00> : vector<8xf32>
    %953 = vector.multi_reduction <add>, %952, %cst_402 [1] : vector<8x8xf32> to vector<8xf32>
    %954 = vector.shape_cast %953 : vector<8xf32> to vector<8x1xf32>
    %955 = tpu.reciprocal %954 {approx = true} : vector<8x1xf32> -> vector<8x1xf32>
    %956 = vector.broadcast %955 : vector<8x1xf32> to vector<8x8xf32>
    %957 = arith.mulf %952, %956 : vector<8x8xf32>
    %958 = vector.extract_strided_slice %928 {offsets = [0, 0], sizes = [8, 32], strides = [1, 1]} : vector<32x32xbf16> to vector<8x32xbf16>
    %cst_403 = arith.constant dense<0.000000e+00> : vector<8x32xf32>
    %959 = tpu.matmul %942, %958, %cst_403 {dimension_numbers = #tpu.dot_dimension_numbers<[1], [0], [0], [1], [0, 0, 1, 1], [], []>} : vector<8x8xbf16>, vector<8x32xbf16>, vector<8x32xf32> -> vector<8x32xf32>
    %960 = arith.truncf %957 : vector<8x8xf32> to vector<8x8xbf16>
    %961 = arith.truncf %959 : vector<8x32xf32> to vector<8x32xbf16>
    %cst_404 = arith.constant dense<0.000000e+00> : vector<8x32xf32>
    %962 = tpu.matmul %960, %961, %cst_404 {dimension_numbers = #tpu.dot_dimension_numbers<[1], [0], [0], [1], [0, 0, 1, 1], [], []>} : vector<8x8xbf16>, vector<8x32xbf16>, vector<8x32xf32> -> vector<8x32xf32>
    %963 = vector.extract_strided_slice %938 {offsets = [0, 8], sizes = [8, 8], strides = [1, 1]} : vector<8x32xbf16> to vector<8x8xbf16>
    %964 = vector.extract_strided_slice %939 {offsets = [0, 8], sizes = [8, 8], strides = [1, 1]} : vector<8x64xbf16> to vector<8x8xbf16>
    %965 = vector.extract_strided_slice %939 {offsets = [0, 40], sizes = [8, 8], strides = [1, 1]} : vector<8x64xbf16> to vector<8x8xbf16>
    %cst_405 = arith.constant dense<0.000000e+00> : vector<8x8xf32>
    %966 = tpu.matmul %963, %964, %cst_405 {dimension_numbers = #tpu.dot_dimension_numbers<[1], [1], [0], [0], [0, 0, 1, 0], [], []>} : vector<8x8xbf16>, vector<8x8xbf16>, vector<8x8xf32> -> vector<8x8xf32>
    %cst_406 = arith.constant 0.353553385 : f32
    %967 = vector.broadcast %cst_406 : f32 to vector<8x8xf32>
    %968 = arith.mulf %966, %967 : vector<8x8xf32>
    %969 = vector.broadcast %5 : vector<1x8xf32> to vector<8x8xf32>
    %970 = arith.addf %968, %969 : vector<8x8xf32>
    %cst_407 = arith.constant dense<0xFF800000> : vector<8xf32>
    %971 = vector.multi_reduction <maximumf>, %970, %cst_407 [1] : vector<8x8xf32> to vector<8xf32>
    %972 = vector.shape_cast %971 : vector<8xf32> to vector<8x1xf32>
    %973 = vector.broadcast %972 : vector<8x1xf32> to vector<8x8xf32>
    %974 = arith.subf %970, %973 : vector<8x8xf32>
    %975 = math.exp %974 : vector<8x8xf32>
    %cst_408 = arith.constant dense<0.000000e+00> : vector<8xf32>
    %976 = vector.multi_reduction <add>, %975, %cst_408 [1] : vector<8x8xf32> to vector<8xf32>
    %977 = vector.shape_cast %976 : vector<8xf32> to vector<8x1xf32>
    %978 = tpu.reciprocal %977 {approx = true} : vector<8x1xf32> -> vector<8x1xf32>
    %979 = vector.broadcast %978 : vector<8x1xf32> to vector<8x8xf32>
    %980 = arith.mulf %975, %979 : vector<8x8xf32>
    %981 = vector.extract_strided_slice %928 {offsets = [8, 0], sizes = [8, 32], strides = [1, 1]} : vector<32x32xbf16> to vector<8x32xbf16>
    %cst_409 = arith.constant dense<0.000000e+00> : vector<8x32xf32>
    %982 = tpu.matmul %965, %981, %cst_409 {dimension_numbers = #tpu.dot_dimension_numbers<[1], [0], [0], [1], [0, 0, 1, 1], [], []>} : vector<8x8xbf16>, vector<8x32xbf16>, vector<8x32xf32> -> vector<8x32xf32>
    %983 = arith.truncf %980 : vector<8x8xf32> to vector<8x8xbf16>
    %984 = arith.truncf %982 : vector<8x32xf32> to vector<8x32xbf16>
    %cst_410 = arith.constant dense<0.000000e+00> : vector<8x32xf32>
    %985 = tpu.matmul %983, %984, %cst_410 {dimension_numbers = #tpu.dot_dimension_numbers<[1], [0], [0], [1], [0, 0, 1, 1], [], []>} : vector<8x8xbf16>, vector<8x32xbf16>, vector<8x32xf32> -> vector<8x32xf32>
    %986 = arith.addf %962, %985 : vector<8x32xf32>
    %987 = vector.extract_strided_slice %938 {offsets = [0, 16], sizes = [8, 8], strides = [1, 1]} : vector<8x32xbf16> to vector<8x8xbf16>
    %988 = vector.extract_strided_slice %939 {offsets = [0, 16], sizes = [8, 8], strides = [1, 1]} : vector<8x64xbf16> to vector<8x8xbf16>
    %989 = vector.extract_strided_slice %939 {offsets = [0, 48], sizes = [8, 8], strides = [1, 1]} : vector<8x64xbf16> to vector<8x8xbf16>
    %cst_411 = arith.constant dense<0.000000e+00> : vector<8x8xf32>
    %990 = tpu.matmul %987, %988, %cst_411 {dimension_numbers = #tpu.dot_dimension_numbers<[1], [1], [0], [0], [0, 0, 1, 0], [], []>} : vector<8x8xbf16>, vector<8x8xbf16>, vector<8x8xf32> -> vector<8x8xf32>
    %cst_412 = arith.constant 0.353553385 : f32
    %991 = vector.broadcast %cst_412 : f32 to vector<8x8xf32>
    %992 = arith.mulf %990, %991 : vector<8x8xf32>
    %993 = vector.broadcast %5 : vector<1x8xf32> to vector<8x8xf32>
    %994 = arith.addf %992, %993 : vector<8x8xf32>
    %cst_413 = arith.constant dense<0xFF800000> : vector<8xf32>
    %995 = vector.multi_reduction <maximumf>, %994, %cst_413 [1] : vector<8x8xf32> to vector<8xf32>
    %996 = vector.shape_cast %995 : vector<8xf32> to vector<8x1xf32>
    %997 = vector.broadcast %996 : vector<8x1xf32> to vector<8x8xf32>
    %998 = arith.subf %994, %997 : vector<8x8xf32>
    %999 = math.exp %998 : vector<8x8xf32>
    %cst_414 = arith.constant dense<0.000000e+00> : vector<8xf32>
    %1000 = vector.multi_reduction <add>, %999, %cst_414 [1] : vector<8x8xf32> to vector<8xf32>
    %1001 = vector.shape_cast %1000 : vector<8xf32> to vector<8x1xf32>
    %1002 = tpu.reciprocal %1001 {approx = true} : vector<8x1xf32> -> vector<8x1xf32>
    %1003 = vector.broadcast %1002 : vector<8x1xf32> to vector<8x8xf32>
    %1004 = arith.mulf %999, %1003 : vector<8x8xf32>
    %1005 = vector.extract_strided_slice %928 {offsets = [16, 0], sizes = [8, 32], strides = [1, 1]} : vector<32x32xbf16> to vector<8x32xbf16>
    %cst_415 = arith.constant dense<0.000000e+00> : vector<8x32xf32>
    %1006 = tpu.matmul %989, %1005, %cst_415 {dimension_numbers = #tpu.dot_dimension_numbers<[1], [0], [0], [1], [0, 0, 1, 1], [], []>} : vector<8x8xbf16>, vector<8x32xbf16>, vector<8x32xf32> -> vector<8x32xf32>
    %1007 = arith.truncf %1004 : vector<8x8xf32> to vector<8x8xbf16>
    %1008 = arith.truncf %1006 : vector<8x32xf32> to vector<8x32xbf16>
    %cst_416 = arith.constant dense<0.000000e+00> : vector<8x32xf32>
    %1009 = tpu.matmul %1007, %1008, %cst_416 {dimension_numbers = #tpu.dot_dimension_numbers<[1], [0], [0], [1], [0, 0, 1, 1], [], []>} : vector<8x8xbf16>, vector<8x32xbf16>, vector<8x32xf32> -> vector<8x32xf32>
    %1010 = arith.addf %986, %1009 : vector<8x32xf32>
    %1011 = vector.extract_strided_slice %938 {offsets = [0, 24], sizes = [8, 8], strides = [1, 1]} : vector<8x32xbf16> to vector<8x8xbf16>
    %1012 = vector.extract_strided_slice %939 {offsets = [0, 24], sizes = [8, 8], strides = [1, 1]} : vector<8x64xbf16> to vector<8x8xbf16>
    %1013 = vector.extract_strided_slice %939 {offsets = [0, 56], sizes = [8, 8], strides = [1, 1]} : vector<8x64xbf16> to vector<8x8xbf16>
    %cst_417 = arith.constant dense<0.000000e+00> : vector<8x8xf32>
    %1014 = tpu.matmul %1011, %1012, %cst_417 {dimension_numbers = #tpu.dot_dimension_numbers<[1], [1], [0], [0], [0, 0, 1, 0], [], []>} : vector<8x8xbf16>, vector<8x8xbf16>, vector<8x8xf32> -> vector<8x8xf32>
    %cst_418 = arith.constant 0.353553385 : f32
    %1015 = vector.broadcast %cst_418 : f32 to vector<8x8xf32>
    %1016 = arith.mulf %1014, %1015 : vector<8x8xf32>
    %1017 = vector.broadcast %5 : vector<1x8xf32> to vector<8x8xf32>
    %1018 = arith.addf %1016, %1017 : vector<8x8xf32>
    %cst_419 = arith.constant dense<0xFF800000> : vector<8xf32>
    %1019 = vector.multi_reduction <maximumf>, %1018, %cst_419 [1] : vector<8x8xf32> to vector<8xf32>
    %1020 = vector.shape_cast %1019 : vector<8xf32> to vector<8x1xf32>
    %1021 = vector.broadcast %1020 : vector<8x1xf32> to vector<8x8xf32>
    %1022 = arith.subf %1018, %1021 : vector<8x8xf32>
    %1023 = math.exp %1022 : vector<8x8xf32>
    %cst_420 = arith.constant dense<0.000000e+00> : vector<8xf32>
    %1024 = vector.multi_reduction <add>, %1023, %cst_420 [1] : vector<8x8xf32> to vector<8xf32>
    %1025 = vector.shape_cast %1024 : vector<8xf32> to vector<8x1xf32>
    %1026 = tpu.reciprocal %1025 {approx = true} : vector<8x1xf32> -> vector<8x1xf32>
    %1027 = vector.broadcast %1026 : vector<8x1xf32> to vector<8x8xf32>
    %1028 = arith.mulf %1023, %1027 : vector<8x8xf32>
    %1029 = vector.extract_strided_slice %928 {offsets = [24, 0], sizes = [8, 32], strides = [1, 1]} : vector<32x32xbf16> to vector<8x32xbf16>
    %cst_421 = arith.constant dense<0.000000e+00> : vector<8x32xf32>
    %1030 = tpu.matmul %1013, %1029, %cst_421 {dimension_numbers = #tpu.dot_dimension_numbers<[1], [0], [0], [1], [0, 0, 1, 1], [], []>} : vector<8x8xbf16>, vector<8x32xbf16>, vector<8x32xf32> -> vector<8x32xf32>
    %1031 = arith.truncf %1028 : vector<8x8xf32> to vector<8x8xbf16>
    %1032 = arith.truncf %1030 : vector<8x32xf32> to vector<8x32xbf16>
    %cst_422 = arith.constant dense<0.000000e+00> : vector<8x32xf32>
    %1033 = tpu.matmul %1031, %1032, %cst_422 {dimension_numbers = #tpu.dot_dimension_numbers<[1], [0], [0], [1], [0, 0, 1, 1], [], []>} : vector<8x8xbf16>, vector<8x32xbf16>, vector<8x32xf32> -> vector<8x32xf32>
    %1034 = arith.addf %1010, %1033 : vector<8x32xf32>
    %1035 = arith.addf %891, %1034 : vector<8x32xf32>
    %1036 = vector.broadcast %930 : vector<1x32xf32> to vector<8x32xf32>
    %1037 = arith.addf %1035, %1036 : vector<8x32xf32>
    %c1_423 = arith.constant 1 : index
    %c9_424 = arith.constant 9 : index
    %c0_425 = arith.constant 0 : index
    %1038 = vector.load %arg11[%c1_423, %c9_424, %c0_425] : memref<2x16x128xf32, #tpu.memory_space<vmem>>, vector<1x1x32xf32>
    %1039 = vector.shape_cast %1038 : vector<1x1x32xf32> to vector<1x32xf32>
    %c1_426 = arith.constant 1 : index
    %c10_427 = arith.constant 10 : index
    %c0_428 = arith.constant 0 : index
    %1040 = vector.load %arg11[%c1_426, %c10_427, %c0_428] : memref<2x16x128xf32, #tpu.memory_space<vmem>>, vector<1x1x32xf32>
    %1041 = vector.shape_cast %1040 : vector<1x1x32xf32> to vector<1x32xf32>
    %cst_429 = arith.constant dense<0.000000e+00> : vector<8xf32>
    %1042 = vector.multi_reduction <add>, %1037, %cst_429 [1] : vector<8x32xf32> to vector<8xf32>
    %1043 = vector.shape_cast %1042 : vector<8xf32> to vector<8x1xf32>
    %cst_430 = arith.constant 3.200000e+01 : f32
    %1044 = vector.broadcast %cst_430 : f32 to vector<8x1xf32>
    %1045 = arith.divf %1043, %1044 : vector<8x1xf32>
    %1046 = vector.broadcast %1045 : vector<8x1xf32> to vector<8x32xf32>
    %1047 = arith.subf %1037, %1046 : vector<8x32xf32>
    %1048 = arith.mulf %1047, %1047 : vector<8x32xf32>
    %cst_431 = arith.constant dense<0.000000e+00> : vector<8xf32>
    %1049 = vector.multi_reduction <add>, %1048, %cst_431 [1] : vector<8x32xf32> to vector<8xf32>
    %1050 = vector.shape_cast %1049 : vector<8xf32> to vector<8x1xf32>
    %cst_432 = arith.constant 0.0322580636 : f32
    %1051 = vector.broadcast %cst_432 : f32 to vector<8x1xf32>
    %1052 = arith.mulf %1050, %1051 : vector<8x1xf32>
    %1053 = math.sqrt %1052 : vector<8x1xf32>
    %cst_433 = arith.constant 9.99999997E-7 : f32
    %1054 = vector.broadcast %cst_433 : f32 to vector<8x1xf32>
    %1055 = arith.addf %1053, %1054 : vector<8x1xf32>
    %1056 = tpu.reciprocal %1055 {approx = true} : vector<8x1xf32> -> vector<8x1xf32>
    %1057 = vector.broadcast %1045 : vector<8x1xf32> to vector<8x32xf32>
    %1058 = arith.subf %1037, %1057 : vector<8x32xf32>
    %1059 = vector.broadcast %1039 : vector<1x32xf32> to vector<8x32xf32>
    %1060 = arith.mulf %1059, %1058 : vector<8x32xf32>
    %1061 = vector.broadcast %1056 : vector<8x1xf32> to vector<8x32xf32>
    %1062 = arith.mulf %1060, %1061 : vector<8x32xf32>
    %1063 = vector.broadcast %1041 : vector<1x32xf32> to vector<8x32xf32>
    %1064 = arith.addf %1062, %1063 : vector<8x32xf32>
    %c1_434 = arith.constant 1 : index
    %c5_435 = arith.constant 5 : index
    %c0_436 = arith.constant 0 : index
    %c0_437 = arith.constant 0 : index
    %1065 = vector.load %arg10[%c1_434, %c5_435, %c0_436, %c0_437] : memref<2x7x32x128xbf16, #tpu.memory_space<vmem>>, vector<1x1x32x64xbf16>
    %1066 = vector.shape_cast %1065 : vector<1x1x32x64xbf16> to vector<32x64xbf16>
    %c1_438 = arith.constant 1 : index
    %c11_439 = arith.constant 11 : index
    %c0_440 = arith.constant 0 : index
    %1067 = vector.load %arg11[%c1_438, %c11_439, %c0_440] : memref<2x16x128xf32, #tpu.memory_space<vmem>>, vector<1x1x64xf32>
    %1068 = vector.shape_cast %1067 : vector<1x1x64xf32> to vector<1x64xf32>
    %c1_441 = arith.constant 1 : index
    %c6_442 = arith.constant 6 : index
    %c0_443 = arith.constant 0 : index
    %c0_444 = arith.constant 0 : index
    %1069 = vector.load %arg10[%c1_441, %c6_442, %c0_443, %c0_444] : memref<2x7x32x128xbf16, #tpu.memory_space<vmem>>, vector<1x1x32x64xbf16>
    %1070 = vector.shape_cast %1069 : vector<1x1x32x64xbf16> to vector<32x64xbf16>
    %c1_445 = arith.constant 1 : index
    %c12_446 = arith.constant 12 : index
    %c0_447 = arith.constant 0 : index
    %1071 = vector.load %arg11[%c1_445, %c12_446, %c0_447] : memref<2x16x128xf32, #tpu.memory_space<vmem>>, vector<1x1x32xf32>
    %1072 = vector.shape_cast %1071 : vector<1x1x32xf32> to vector<1x32xf32>
    %1073 = arith.truncf %1064 : vector<8x32xf32> to vector<8x32xbf16>
    %cst_448 = arith.constant dense<0.000000e+00> : vector<8x64xf32>
    %1074 = tpu.matmul %1073, %1066, %cst_448 {dimension_numbers = #tpu.dot_dimension_numbers<[1], [0], [0], [1], [0, 0, 1, 1], [], []>} : vector<8x32xbf16>, vector<32x64xbf16>, vector<8x64xf32> -> vector<8x64xf32>
    %1075 = vector.broadcast %1068 : vector<1x64xf32> to vector<8x64xf32>
    %1076 = arith.addf %1074, %1075 : vector<8x64xf32>
    %cst_449 = arith.constant 0.000000e+00 : f32
    %1077 = vector.broadcast %cst_449 : f32 to vector<8x64xf32>
    %1078 = arith.maximumf %1076, %1077 : vector<8x64xf32>
    %1079 = arith.truncf %1078 : vector<8x64xf32> to vector<8x64xbf16>
    %cst_450 = arith.constant dense<0.000000e+00> : vector<8x32xf32>
    %1080 = tpu.matmul %1079, %1070, %cst_450 {dimension_numbers = #tpu.dot_dimension_numbers<[1], [1], [0], [0], [0, 0, 1, 0], [], []>} : vector<8x64xbf16>, vector<32x64xbf16>, vector<8x32xf32> -> vector<8x32xf32>
    %1081 = arith.addf %1037, %1080 : vector<8x32xf32>
    %1082 = vector.broadcast %1072 : vector<1x32xf32> to vector<8x32xf32>
    %1083 = arith.addf %1081, %1082 : vector<8x32xf32>
    %c2_451 = arith.constant 2 : index
    %c0_452 = arith.constant 0 : index
    %1084 = vector.load %arg12[%c2_451, %c0_452] : memref<4x32xf32, #tpu.memory_space<vmem>>, vector<1x32xf32>
    %c3_453 = arith.constant 3 : index
    %c0_454 = arith.constant 0 : index
    %1085 = vector.load %arg12[%c3_453, %c0_454] : memref<4x32xf32, #tpu.memory_space<vmem>>, vector<1x32xf32>
    %cst_455 = arith.constant dense<0.000000e+00> : vector<8xf32>
    %1086 = vector.multi_reduction <add>, %1083, %cst_455 [1] : vector<8x32xf32> to vector<8xf32>
    %1087 = vector.shape_cast %1086 : vector<8xf32> to vector<8x1xf32>
    %cst_456 = arith.constant 3.200000e+01 : f32
    %1088 = vector.broadcast %cst_456 : f32 to vector<8x1xf32>
    %1089 = arith.divf %1087, %1088 : vector<8x1xf32>
    %1090 = vector.broadcast %1089 : vector<8x1xf32> to vector<8x32xf32>
    %1091 = arith.subf %1083, %1090 : vector<8x32xf32>
    %1092 = arith.mulf %1091, %1091 : vector<8x32xf32>
    %cst_457 = arith.constant dense<0.000000e+00> : vector<8xf32>
    %1093 = vector.multi_reduction <add>, %1092, %cst_457 [1] : vector<8x32xf32> to vector<8xf32>
    %1094 = vector.shape_cast %1093 : vector<8xf32> to vector<8x1xf32>
    %cst_458 = arith.constant 0.0322580636 : f32
    %1095 = vector.broadcast %cst_458 : f32 to vector<8x1xf32>
    %1096 = arith.mulf %1094, %1095 : vector<8x1xf32>
    %1097 = math.sqrt %1096 : vector<8x1xf32>
    %cst_459 = arith.constant 9.99999997E-7 : f32
    %1098 = vector.broadcast %cst_459 : f32 to vector<8x1xf32>
    %1099 = arith.addf %1097, %1098 : vector<8x1xf32>
    %1100 = tpu.reciprocal %1099 {approx = true} : vector<8x1xf32> -> vector<8x1xf32>
    %1101 = vector.broadcast %1089 : vector<8x1xf32> to vector<8x32xf32>
    %1102 = arith.subf %1083, %1101 : vector<8x32xf32>
    %1103 = vector.broadcast %1084 : vector<1x32xf32> to vector<8x32xf32>
    %1104 = arith.mulf %1103, %1102 : vector<8x32xf32>
    %1105 = vector.broadcast %1100 : vector<8x1xf32> to vector<8x32xf32>
    %1106 = arith.mulf %1104, %1105 : vector<8x32xf32>
    %1107 = vector.broadcast %1085 : vector<1x32xf32> to vector<8x32xf32>
    %1108 = arith.addf %1106, %1107 : vector<8x32xf32>
    %c0_460 = arith.constant 0 : index
    %c0_461 = arith.constant 0 : index
    %c0_462 = arith.constant 0 : index
    %1109 = vector.load %arg13[%c0_460, %c0_461, %c0_462] : memref<1x8x32xf32, #tpu.memory_space<vmem>>, vector<1x8x32xf32>
    %1110 = vector.shape_cast %1109 : vector<1x8x32xf32> to vector<8x32xf32>
    %1111 = vector.shape_cast %1108 : vector<8x32xf32> to vector<1x8x32xf32>
    tpu.vector_store %arg13[%c0_460, %c0_461, %c0_462], %1111 {strides = array<i32>} : memref<1x8x32xf32, #tpu.memory_space<vmem>>, vector<1x8x32xf32>,
    return
  }
  func.func @transform_0(%arg0: i32) -> (i32, i32, i32) {
    %c0_i32 = arith.constant 0 : i32
    %c0_i32_0 = arith.constant 0 : i32
    %c0_i32_1 = arith.constant 0 : i32
    return %arg0, %c0_i32, %c0_i32_0 : i32, i32, i32
  }
  func.func @transform_1(%arg0: i32) -> (i32, i32, i32) {
    %c0_i32 = arith.constant 0 : i32
    %c0_i32_0 = arith.constant 0 : i32
    %c0_i32_1 = arith.constant 0 : i32
    return %arg0, %c0_i32, %c0_i32_0 : i32, i32, i32
  }
  func.func @transform_2(%arg0: i32) -> (i32, i32, i32) {
    %c0_i32 = arith.constant 0 : i32
    %c0_i32_0 = arith.constant 0 : i32
    %c0_i32_1 = arith.constant 0 : i32
    return %arg0, %c0_i32, %c0_i32_0 : i32, i32, i32
  }
  func.func @transform_3(%arg0: i32) -> (i32, i32, i32) {
    %c0_i32 = arith.constant 0 : i32
    %c0_i32_0 = arith.constant 0 : i32
    %c0_i32_1 = arith.constant 0 : i32
    return %arg0, %c0_i32, %c0_i32_0 : i32, i32, i32
  }
  func.func @transform_4(%arg0: i32) -> (i32, i32) {
    %c0_i32 = arith.constant 0 : i32
    %c0_i32_0 = arith.constant 0 : i32
    %c0_i32_1 = arith.constant 0 : i32
    return %c0_i32, %c0_i32_0 : i32, i32
  }
  func.func @transform_5(%arg0: i32) -> (i32, i32) {
    %c0_i32 = arith.constant 0 : i32
    %c0_i32_0 = arith.constant 0 : i32
    %c0_i32_1 = arith.constant 0 : i32
    return %c0_i32, %c0_i32_0 : i32, i32
  }
  func.func @transform_6(%arg0: i32) -> (i32, i32) {
    %c0_i32 = arith.constant 0 : i32
    %c0_i32_0 = arith.constant 0 : i32
    %c0_i32_1 = arith.constant 0 : i32
    return %c0_i32, %c0_i32_0 : i32, i32
  }
  func.func @transform_7(%arg0: i32) -> (i32, i32, i32, i32) {
    %c0_i32 = arith.constant 0 : i32
    %c0_i32_0 = arith.constant 0 : i32
    %c0_i32_1 = arith.constant 0 : i32
    %c0_i32_2 = arith.constant 0 : i32
    %c0_i32_3 = arith.constant 0 : i32
    return %c0_i32, %c0_i32_0, %c0_i32_1, %c0_i32_2 : i32, i32, i32, i32
  }
  func.func @transform_8(%arg0: i32) -> (i32, i32, i32) {
    %c0_i32 = arith.constant 0 : i32
    %c0_i32_0 = arith.constant 0 : i32
    %c0_i32_1 = arith.constant 0 : i32
    %c0_i32_2 = arith.constant 0 : i32
    return %c0_i32, %c0_i32_0, %c0_i32_1 : i32, i32, i32
  }
  func.func @transform_9(%arg0: i32) -> (i32, i32, i32, i32) {
    %c0_i32 = arith.constant 0 : i32
    %c0_i32_0 = arith.constant 0 : i32
    %c0_i32_1 = arith.constant 0 : i32
    %c0_i32_2 = arith.constant 0 : i32
    %c0_i32_3 = arith.constant 0 : i32
    return %c0_i32, %c0_i32_0, %c0_i32_1, %c0_i32_2 : i32, i32, i32, i32
  }
  func.func @transform_10(%arg0: i32) -> (i32, i32, i32) {
    %c0_i32 = arith.constant 0 : i32
    %c0_i32_0 = arith.constant 0 : i32
    %c0_i32_1 = arith.constant 0 : i32
    %c0_i32_2 = arith.constant 0 : i32
    return %c0_i32, %c0_i32_0, %c0_i32_1 : i32, i32, i32
  }
  func.func @transform_11(%arg0: i32) -> (i32, i32) {
    %c0_i32 = arith.constant 0 : i32
    %c0_i32_0 = arith.constant 0 : i32
    %c0_i32_1 = arith.constant 0 : i32
    return %c0_i32, %c0_i32_0 : i32, i32
  }
  func.func @transform_12(%arg0: i32) -> (i32, i32, i32) {
    %c0_i32 = arith.constant 0 : i32
    %c0_i32_0 = arith.constant 0 : i32
    %c0_i32_1 = arith.constant 0 : i32
    return %arg0, %c0_i32, %c0_i32_0 : i32, i32, i32
  }
}

</mosaic_0001>

<bundles_post_ra>
// kernel: encoder_decoder_forward.1
= control target key start
LH: loop header
LB: loop body
LE: loop exit
PB: predicated region body
PF: predicated region fallthrough
CT: control target
= control target key end

     0   :  { %17 = vsyncpa [#allocation3], 0  ;;  %s8901_s0 = inlined_call_operand.vmem [shape: s32[2,8,1], index: 0, kind: input, shape index: {}]   ;;  %s8902_s1 = inlined_call_operand.vmem [shape: s32[2,8,1], index: 1, kind: input, shape index: {}]   ;;  %s8903_s2 = inlined_call_operand.vmem [shape: f32[2,1,8], index: 2, kind: input, shape index: {}]   ;;  %s8904_s3 = inlined_call_operand.vmem [shape: f32[2,8,8], index: 3, kind: input, shape index: {}]   ;;  %s8905_s4 = inlined_call_operand.hbm [shape: f32[16,32], index: 4, kind: input, shape index: {}]   ;;  %s8906_s5 = inlined_call_operand.hbm [shape: f32[16,32], index: 5, kind: input, shape index: {}]   ;;  %s8907_s6 = inlined_call_operand.vmem [shape: f32[64,32], index: 6, kind: input, shape index: {}]   ;;  %s8908_s7 = inlined_call_operand.vmem [shape: bf16[2,4,32,128], index: 7, kind: input, shape index: {}]   ;;  %s8909_s8 = inlined_call_operand.hbm [shape: f32[2,8,128], index: 8, kind: input, shape index: {}]   ;;  %s8910_s9 = inlined_call_operand.hbm [shape: bf16[2,7,32,128], index: 9, kind: input, shape index: {}]   ;;  %s8911_s10 = inlined_call_operand.hbm [shape: f32[2,16,128], index: 10, kind: input, shape index: {}]   ;;  %s8912_s11 = inlined_call_operand.hbm [shape: f32[4,32], index: 11, kind: input, shape index: {}]   ;;  %s8913_s12 = inlined_call_operand.hbm [shape: f32[2,8,32], index: 12, kind: output, shape index: {}]  }
   0x1   :  { %18 = vsyncpa [#allocation6], 0 }
   0x2   :  { %19 = vsyncpa [#allocation9], 0 }
   0x3   :  { %20 = vsyncpa [#allocation12], 0 }
   0x4   :  { %21 = vsyncpa [#allocation4], 0 }
   0x5   :  { %23 = vsyncpa [#allocation4 + $0x1], 0  ;;  %s7881_s21 = smov 0   ;;  %s7883_s22 = smov 0  }
   0x6   :  { %s7885_s23 = smov 0   ;;  %s7887_s24 = smov 0  }
   0x7 LB: > { %8946 = sst [smem:[#allocation19_spill]] %s7777_s21  ;;  %s7902_s25 = sadd.s32 4294967295, %s7789_s24   ;;  %s7789_s24 = sphi %s7887_s24, %s8980_s24   ;;  %s7785_s23 = sphi %s7885_s23, %s8982_s23   ;;  %s7781_s22 = sphi %s7883_s22, %s8984_s22   ;;  %s7777_s21 = sphi %s7881_s21, %s8983_s21  }
   0x8   : > { %8947 = sst [smem:[#allocation20_spill]] %s7785_s23  ;;  %s6264_s26 = sadd.s32 4294967294, %s7789_s24  }
   0x9   : > { %s7906_s27 = sadd.s32 1, %s7789_s24   ;;  %s308_s28 = sadd.s32 1, %s7785_s23 }
   0xa   : > { %8948 = sst [smem:[#allocation21_spill]] %s7906_s27  ;;  %s305_s29 = ssub.s32 %s7789_s24, %s7906_s27 }
   0xb   : > { %p318_p0 = scmp.ne.s32.totalorder %s7785_s23, %s7781_s22  ;;  %p306_p1 = scmp.eq.s32.totalorder %s305_s29, 0 }
   0xc   : > { %p319_p2 = scmp.eq.s32.totalorder %s7902_s25, 1  ;;  %p324_p3 = scmp.ne.s32.totalorder %s7781_s22, %s7777_s21 }
   0xd   : > { %p325_p4 = scmp.eq.s32.totalorder %s6264_s26, 1  ;;  %p6265_p7 = scmp.ge.s32.totalorder %s7789_s24, 1 }
   0xe   : > { %s7917_s30 = scalar_select %p306_p1, %s7785_s23, %s308_s28  }
   0xf   : > { %p7919_p5 = por %p319_p2, %p318_p0  ;;  %p7923_p6 = por %p325_p4, %p324_p3 }
  0x10   : > { %8949 = sst [smem:[#allocation22_spill]] %s7917_s30  ;;  %p332_p8 = scmp.lt.s32.totalorder %s7789_s24, 3 }
  0x11   : > { %s8951_s14 = scalar_select %p7923_p6, 1, 0 }
  0x12   : > { %p8923_p9 = scmp.eq.s32.totalorder %s7902_s25, 0  ;;  %p7930_p10 = pnand %p6265_p7, %p332_p8 }
  0x13   : > { %8952 = sst [smem:[#allocation23_spill]] %s8951_s14  ;;  %s7791_s16 = smov [#allocation5]  }
  0x14   : > { %p7286_p11 = pneg %p7930_p10  ;;  %s357_s17 = sshll.u32 %s7791_s16, 4  ;;  %s358_s17 = int_to_ptr.vmem [resolvable:$true] %s357_s17 }
  0x15   : > { %s7792_s19 = smov [#allocation8]   ;;  %s7568_s28 = scalar_lea.vmem %s358_s17, 256 }
  0x16   : > { %p7938_p12 = pnand %p8923_p9, %p7286_p11  ;;  %s389_s20 = sshll.u32 %s7792_s19, 4  ;;  %s390_s20 = int_to_ptr.vmem [resolvable:$true] %s389_s20 }
  0x17   : > { %p7569_p0 = scmp.ne.s32.totalorder %s358_s17, %s7568_s28  ;;  %p7576_p3 = scmp.lt.s32.totalorder %s358_s17, %s358_s17 }
  0x18   : > { %p7944_p13 = pneg %p7938_p12  ;;  %p7577_p4 = scmp.lt.s32.totalorder %s7568_s28, %s7568_s28 }
  0x1a   : > { %p7571_p1 = pnand %p7569_p0, %p7944_p13  ;;  %p7578_p7 = por %p7577_p4, %p7576_p3 }
  0x1c   : > { %p7572_p2 = pneg %p7571_p1 }
  0x1e   : > { %p7579_p8 = pnand %p7578_p7, %p7572_p2 }
  0x20   : > { %7582 = shalt.err (!%p7579_p8)
}
  0x21   : > { %s8919_s29 = smov 128   ;;  %s8921_s16 = smov 8  }
  0x22   : > { %7292 = dma.hbm_to_vmem [thread:$0]  (!%p7938_p12), %s8906_s5, 256, %s358_s17, [#allocation6], %s8919_s29, %s8919_s29, %s8921_s16  }
  0x23   : > { %s7594_s23 = scalar_lea.vmem %s390_s20, 3584  ;;  %p7602_p3 = scmp.lt.s32.totalorder %s390_s20, %s390_s20 }
  0x24   : > { %p7595_p11 = scmp.ne.s32.totalorder %s390_s20, %s7594_s23  ;;  %p7603_p2 = scmp.lt.s32.totalorder %s7594_s23, %s7594_s23 }
  0x26   : > { %p7597_p0 = pnand %p7595_p11, %p7944_p13  ;;  %p7604_p4 = por %p7603_p2, %p7602_p3 }
  0x28   : > { %p7598_p1 = pneg %p7597_p0 }
  0x2a   : > { %p7605_p7 = pnand %p7604_p4, %p7598_p1 }
  0x2c   : > { %7608 = shalt.err (!%p7605_p7)
}
  0x2d   : > { %s7795_s28 = smov 64   ;;  %s7796_s27 = smov 4  }
  0x2e   : > { %7298 = dma.hbm_to_vmem [thread:$0]  (!%p7938_p12), %s8910_s9, 3584, %s390_s20, [#allocation9], %s7795_s28, %s7795_s28, %s7796_s27  }
  0x2f   : > { %s7797_s30 = smov [#allocation2]   ;;  %s7798_s19 = smov [#allocation7]  }
  0x30   : > { %s344_s17 = sshll.u32 %s7797_s30, 4  ;;  %s376_s29 = sshll.u32 %s7798_s19, 4  ;;  %s345_s17 = int_to_ptr.vmem [resolvable:$true] %s344_s17  ;;  %s377_s29 = int_to_ptr.vmem [resolvable:$true] %s376_s29 }
  0x31   : > { %s7620_s16 = scalar_lea.vmem %s345_s17, 256  ;;  %p7628_p1 = scmp.lt.s32.totalorder %s345_s17, %s345_s17 }
  0x32   : > { %p7621_p8 = scmp.ne.s32.totalorder %s345_s17, %s7620_s16  ;;  %p7629_p3 = scmp.lt.s32.totalorder %s7620_s16, %s7620_s16 }
  0x34   : > { %p7623_p11 = pnand %p7621_p8, %p7944_p13  ;;  %p7630_p2 = por %p7629_p3, %p7628_p1 }
  0x36   : > { %p7624_p0 = pneg %p7623_p11 }
  0x38   : > { %p7631_p4 = pnand %p7630_p2, %p7624_p0 }
  0x3a   : > { %7634 = shalt.err (!%p7631_p4)
}
  0x3b   : > { %s8956_s21 = smov 8   ;;  %s8957_s23 = smov 128  }
  0x3c   : > { %7289 = dma.hbm_to_vmem [thread:$0]  (!%p7938_p12), %s8905_s4, 256, %s345_s17, [#allocation3], %s8957_s23, %s8957_s23, %s8956_s21  }
  0x3d   : > { %s7646_s20 = scalar_lea.vmem %s377_s29, 256  ;;  %p7654_p9 = scmp.lt.s32.totalorder %s377_s29, %s377_s29 }
  0x3e   : > { %p7647_p7 = scmp.ne.s32.totalorder %s377_s29, %s7646_s20  ;;  %p7655_p6 = scmp.lt.s32.totalorder %s7646_s20, %s7646_s20 }
  0x40   : > { %p7649_p8 = pnand %p7647_p7, %p7944_p13  ;;  %p7656_p1 = por %p7655_p6, %p7654_p9 }
  0x42   : > { %p7650_p11 = pneg %p7649_p8 }
  0x44   : > { %p7657_p0 = pnand %p7656_p1, %p7650_p11 }
  0x46   : > { %7660 = shalt.err (!%p7657_p0)
}
  0x47   : > { %7295 = dma.hbm_to_vmem [thread:$0]  (!%p7938_p12), %s8909_s8, 256, %s377_s29, [#allocation6], %s8957_s23, %s8957_s23, %s8956_s21  }
  0x48   : > { %s7799_s30 = smov [#allocation10]   ;;  %s7800_s19 = smov [#allocation11]  }
  0x49   : > { %s402_s17 = sshll.u32 %s7799_s30, 4  ;;  %s416_s27 = sshll.u32 %s7800_s19, 4  ;;  %s403_s17 = int_to_ptr.vmem [resolvable:$true] %s402_s17  ;;  %s417_s27 = int_to_ptr.vmem [resolvable:$true] %s416_s27 }
  0x4a   : > { %s7672_s14 = scalar_lea.vmem %s403_s17, 512  ;;  %p7680_p2 = scmp.lt.s32.totalorder %s403_s17, %s403_s17 }
  0x4b   : > { %p7673_p6 = scmp.ne.s32.totalorder %s403_s17, %s7672_s14  ;;  %p7681_p4 = scmp.lt.s32.totalorder %s7672_s14, %s7672_s14 }
  0x4d   : > { %p7675_p9 = pnand %p7673_p6, %p7944_p13  ;;  %p7682_p7 = por %p7681_p4, %p7680_p2 }
  0x4f   : > { %p7676_p3 = pneg %p7675_p9 }
  0x51   : > { %p7683_p8 = pnand %p7682_p7, %p7676_p3 }
  0x53   : > { %7686 = shalt.err (!%p7683_p8)
}
  0x54   : > { %7301 = dma.hbm_to_vmem [thread:$0]  (!%p7938_p12), %s8911_s10, 512, %s403_s17, [#allocation9], %s8957_s23, %s8957_s23, %s8956_s21  }
  0x55   : > { %s7698_s16 = scalar_lea.vmem %s417_s27, 64  ;;  %p7706_p6 = scmp.lt.s32.totalorder %s417_s27, %s417_s27 }
  0x56   : > { %p7699_p11 = scmp.ne.s32.totalorder %s417_s27, %s7698_s16  ;;  %p7707_p9 = scmp.lt.s32.totalorder %s7698_s16, %s7698_s16 }
  0x58   : > { %p7701_p1 = pnand %p7699_p11, %p7944_p13  ;;  %p7708_p2 = por %p7707_p9, %p7706_p6 }
  0x5a   : > { %p7702_p0 = pneg %p7701_p1 }
  0x5c   : > { %p7709_p3 = pnand %p7708_p2, %p7702_p0 }
  0x5e   : > { %7712 = shalt.err (!%p7709_p3)
}
  0x5f   : > { %7304 = dma.hbm_to_vmem [thread:$0]  (!%p7938_p12), %s8912_s11, 64, %s417_s27, [#allocation12]  }
  0x60   : > { %456 = sbr.rel (%p7930_p10) target bundleno = 15998 (0x3e7e), region = 68  ;;  %p8958_p4 = scmp.eq.s32.totalorder (!%p7930_p10), %s7902_s25, 0 }
  0x65   : > { %7756 = dma.done.wait (%p8958_p4), [#allocation3], 256   ;;  %p8959_p13 = pmov %p8958_p4 }
  0x66   : > { %p8960_p7 = pmov %p8958_p4 }
  0x67   : > { %7758 = vsyncadd (%p8959_p13), [#allocation3], 4294967040 }
  0x68   : > { %7760 = dma.done.wait (%p8960_p7), [#allocation6], 512   ;;  %p8961_p8 = pmov %p8958_p4 }
  0x69   : > { %p8962_p11 = pmov %p8958_p4 }
  0x6a   : > { %7762 = vsyncadd (%p8961_p8), [#allocation6], 4294966784 }
  0x6b   : > { %7764 = dma.done.wait (%p8962_p11), [#allocation9], 4096   ;;  %p8963_p12 = pmov %p8958_p4 }
  0x6c   : > { %p8964_p10 = pmov %p8958_p4 }
  0x6d   : > { %7766 = vsyncadd (%p8963_p12), [#allocation9], 4294963200 }
  0x6e   : > { %7768 = dma.done.wait (%p8964_p10), [#allocation12], 64   ;;  %p8965_p1 = pmov %p8958_p4 }
  0x6f   : > { %p528_p0 = scmp.lt.s32.totalorder %s7902_s25, 1  ;;  %v7801_v0 = vmov 0   ;;  %v7802_v1 = vmov 0.0   ;;  %v554_v2 = vlaneseq  ;;  %vm7803_vm0 = vmmov 0   ;;  %v552_v7 = vld [vmem:[#allocation2 + $0x8] sm:$0xff]  ;;  %v551_v9 = vld [vmem:[#allocation2] sm:$0xff] }
  0x70   : > { %7770 = vsyncadd (%p8965_p1), [#allocation12], 4294967232  ;;  %7378 = vset.pattern.permute.xlu0 %v7801_v0  ;;  %6686 = vmatprep.subr.mxu1 %v7802_v1  ;;  %vm562_vm1 = vcmask 130048   ;;  %v553_v15 = vld [vmem:[%s8907_s6] sm:$0xff]  ;;  %vm640_vm3 = vcmask 261120   ;;  %v7380_v26 = vld [vmem:[%s8908_s7 + $0x8] sm:$0xff]  }
  0x71   : > { %s529_s15 = scalar_select %p528_p0, %s7902_s25, 1  ;;  %6701 = vmatprep.subr.bf16.mxu0 %v7802_v1  ;;  %7379 = vset.pattern.permute.xlu1 %v7801_v0  ;;  %v797_v3 = vshrl.u32 %v554_v2, 7  ;;  %v8041_v12 = vand.u32 127, %v554_v2  ;;  %v7381_v27 = vld [vmem:[%s8908_s7] sm:$0xff]   ;;  %v6290_v44 = vld [vmem:[%s8908_s7 + $0x10] sm:$0xf] }
  0x72   : > { %6690 = vmatprep.mubr.msk.f32.mxu1 %vm7803_vm0, %v7802_v1  ;;  %6703 = vmatprep.mubr.msk.bf16.mxu0 %vm7803_vm0, %v7802_v1  ;;  %v6288_v36 = vld [vmem:[#allocation7] ss:$0 sm:$0xff]  ;;  %v6289_v39 = vld [vmem:[#allocation7 + $0x1] ss:$0 sm:$0xff]  ;;  %v6294_v43 = vld [vmem:[#allocation7 + $0x2] ss:$0 sm:$0xff] }
  0x73   : > { %s8024_s18 = sshll.u32 %s529_s15, 3  ;;  %s538_s23 = scalar_lea.vmem %s8903_s2, %s529_s15  ;;  %v798_v8 = vsub.s32 0, %v797_v3  ;;  %6687 = vmatpush3.msra.mxu1 %v552_v7  ;;  %vm818_vm6 = vcmask 1043456   ;;  %vm747_vm7 = vcmask 64512   ;;  %v6291_v56 = vld [vmem:[%s8908_s7 + $0x14] sm:$0xf] }
  0x74   : > { %s531_s27 = scalar_lea.vmem %s8901_s0, %s8024_s18  ;;  %v544_v5 = vld [vmem:[%s538_s23] sm:$0x1]  ;;  %6688 = vmatprep.subr.mxu1 %v7802_v1  ;;  %v820_v46 = vsel %vm818_vm6, %v6290_v44, 0  ;;  %s8942_s21 = smov 96   ;;  %v933_v58 = vsel %vm818_vm6, %v6291_v56, 0  ;;  %vm1511_vm8 = vcmask 523264  }
  0x75   : > { %v550_v4 = vld [vmem:[%s531_s27] sm:$0xff]  ;;  %v6284_v6 = vadd.f32 -1.0, %v544_v5  ;;  %6689 = vmatpush3.msra.mxu1 %v551_v9  ;;  %s8944_s23 = smov 88   ;;  %s8940_s17 = smov 120  }
  0x76   : > { %557 = vperm.xlu0 %7378, %v550_v4   ;;  %6693 = vmatprep.subr.bf16.mxu1 %v7802_v1  ;;  %s8938_s19 = smov 64   ;;  %s8936_s27 = smov 56  }
  0x77   : > { %v546_v10 = vmul.f32 1e+09, %v6284_v6  ;;  %s8934_s20 = smov 80   ;;  %s8928_s16 = smov 112  }
  0x78   : > { %s8930_s28 = smov 104   ;;  %s8932_s30 = smov 48  }
  0x79   : > { %v8038_v11 = vrot.slane %v546_v10, %v798_v8  ;;  %s8926_s15 = smov 72   ;;  %s8924_s29 = smov 40  }
  0x7a   : > { %s8966_s26 = smov 104   ;;  %s8967_s14 = smov 112  }
  0xf1   : > { %v558_v13 = vpop.permute.xlu0 %557 }
  0xf2   : > { %vm559_vm2 = vcmp.eq.s32.totalorder %v558_v13, %v8041_v12 }
  0xf3   : > { %v6286_v14 = vsel %vm559_vm2, 1.0, %v7802_v1 }
  0xf4   : > { %6691 = vmatmul.mubr.msk.f32.vlgmr.msra.gmra.mxu1 %vm562_vm1, %v6286_v14 }
  0xf5   : > { %6697 = vmatprep.mubr.msk.bf16.mxu1 %vm7803_vm0, %v7802_v1  ;;  %6694 = vmatpush3.bf16.msra.mxu1 %v7380_v26 }
  0xf6   : > { %6695 = vmatprep.subr.bf16.mxu1 %v7802_v1 }
  0xf9   : > { %6696 = vmatpush3.bf16.msra.mxu1 %v7381_v27 }
  0xfa   : > { %6707 = vmatprep.subr.bf16.mxu1 %v7802_v1 }
 0x1b4   : > { %v632_v16 = vpop.f32.mrf.mxu1 }
 0x1b5   : > { %v636_v17 = vmul.f32 5.656854, %v632_v16 }
 0x1b6   : > { %v6692_v18 = vpop.f32.mrf.mxu1 }
 0x1b7   : > { %v8051_v19 = vadd.f32 %v636_v17, %v553_v15 }
 0x1b9   : > { %v641_v20 = vsel %vm640_vm3, %v8051_v19, 0.0 }
 0x1ba   : > { %642 = vadd.xlane.f32.xlu0 %v641_v20 }
 0x243   : > { %v643_v21 = vpop.xlane.xlu0 %642 }
 0x244   : > { %v645_v22 = vmul.f32 0.03125, %v643_v21 }
 0x246   : > { %v646_v23 = vsub.f32 %v8051_v19, %v645_v22 }
 0x248   : > { %v647_v24 = vmul.f32 %v646_v23, %v646_v23  ;;  %v665_v37 = vmul.f32 %v6288_v36, %v646_v23 }
 0x24a   : > { %v648_v25 = vsel %vm640_vm3, %v647_v24, 0.0 }
 0x24b   : > { %649 = vadd.xlane.f32.xlu1 %v648_v25 }
 0x2d4   : > { %v650_v28 = vpop.xlane.xlu1 %649 }
 0x2d5   : > { %v651_v29 = vmul.f32 0.032258064, %v650_v28 }
 0x2d7   : > { %7412 = vrsqrt.f32 %v651_v29  ;;  %vm654_vm4 = vcmp.eq.f32.partialorder %v651_v29, inf  ;;  %v657_v32 = vand.u32 2147483648, %v651_v29  ;;  %vm656_vm5 = vcmp.eq.f32.partialorder %v651_v29, 0.0 }
 0x2e4   : > { %v7413_v30 = vpop.eup %7412 }
 0x2e5   : > { %v653_v31 = vmul.f32 %v7413_v30, %v651_v29 }
 0x2e7   : > { %v655_v33 = vsel %vm654_vm4, %v651_v29, %v653_v31 }
 0x2e8   : > { %v658_v34 = vsel %vm656_vm5, %v657_v32, %v655_v33 }
 0x2e9   : > { %v659_v35 = vadd.f32 1e-06, %v658_v34 }
 0x2eb   : > { %7414 = vrcp.f32 %v659_v35 }
 0x2f8   : > { %v7415_v38 = vpop.eup %7414 }
 0x2f9   : > { %v666_v40 = vmul.f32 %v7415_v38, %v665_v37 }
 0x2fb   : > { %v671_v41 = vadd.f32 %v6289_v39, %v666_v40 }
 0x2fd   : > { %v683_v42 = vpack.c.bf16 %v671_v41, %v671_v41 }
 0x2ff   : > { %6698 = vmatmul.mubr.msk.bf16.vlgmr.msra.gmra.mxu1 %vm640_vm3, %v683_v42 }
 0x300   : > { %6709 = vmatprep.mubr.msk.bf16.mxu1 %vm7803_vm0, %v7802_v1  ;;  %6708 = vmatpush3.bf16.msra.mxu1 %v820_v46  ;;  %v6292_v46 = vld [vmem:[%s8908_s7 + $0x18] sm:$0xf] }
 0x301   : > { %6719 = vmatprep.subr.bf16.mxu1 %v7802_v1 }
 0x3bf   : > { %v737_v45 = vpop.f32.mrf.mxu1 }
 0x3c0   : > { %v738_v47 = vadd.f32 %v6294_v43, %v737_v45 }
 0x3c1   : > { %v6699_v48 = vpop.f32.mrf.mxu1 }
 0x3c2   : > { %v8073_v49 = vpack.c.bf16 %v738_v47, %v738_v47 }
 0x3c3   : > { %v740_v50 = vpop.f32.mrf.mxu1 }
 0x3c4   : > { %745 = vrot.lane.b32.xlu1 %v8073_v49, %s8942_s21  ;;  %v1138_v50 = vsel %vm818_vm6, %v6292_v46, 0 }
 0x3c5   : > { %v6700_v51 = vpop.f32.mrf.mxu1 }
 0x3c8   : > { %866 = vrot.lane.b32.xlu1 %v8073_v49, %s8944_s23 }
 0x3cc   : > { %864 = vrot.lane.b32.xlu1 %v8073_v49, %s8940_s17 }
 0x3d0   : > { %813 = vrot.lane.b32.xlu1 %v8073_v49, %s8938_s19 }
 0x3d4   : > { %927 = vrot.lane.b32.xlu1 %v8073_v49, %s8936_s27 }
 0x436   : > { %v746_v52 = vpop.permute.xlu1 %745 }
 0x437   : > { %v752_v53 = vsel %vm747_vm7, %v746_v52, 0 }
 0x438   : > { %6702 = vmatpush3.bf16.xpose.msra.mxu0 %v752_v53 }
 0x439   : > { %6713 = vmatprep.subr.bf16.mxu0 %v7802_v1 }
 0x43a   : > { %v867_v54 = vpop.permute.xlu1 %866 }
 0x43b   : > { %v872_v57 = vsel %vm747_vm7, %v867_v54, 0 }
 0x43e   : > { %v865_v55 = vpop.permute.xlu1 %864 }
 0x43f   : > { %6704 = vmatmul.mubr.msk.bf16.vlgmr.msra.gmra.mxu0 %vm747_vm7, %v8073_v49 }
 0x440   : > { %6714 = vmatpush3.bf16.xpose.msra.mxu0 %v872_v57  ;;  %6715 = vmatprep.mubr.msk.bf16.mxu0 %vm7803_vm0, %v7802_v1 }
 0x441   : > { %6725 = vmatprep.subr.bf16.mxu0 %v7802_v1 }
 0x442   : > { %v814_v59 = vpop.permute.xlu1 %813 }
 0x443   : > { %6710 = vmatmul.mubr.msk.bf16.vlgmr.msra.gmra.mxu1 %vm747_vm7, %v814_v59 }
 0x444   : > { %6720 = vmatpush3.bf16.msra.mxu1 %v933_v58  ;;  %6721 = vmatprep.mubr.msk.bf16.mxu1 %vm7803_vm0, %v7802_v1 }
 0x445   : > { %6731 = vmatprep.subr.bf16.mxu1 %v7802_v1 }
 0x446   : > { %v928_v60 = vpop.permute.xlu1 %927 }
 0x447   : > { %6716 = vmatmul.mubr.msk.bf16.vlgmr.msra.gmra.mxu0 %vm747_vm7, %v865_v55 }
 0x448   : > { %6727 = vmatprep.mubr.msk.bf16.mxu0 %vm7803_vm0, %v7802_v1 }
 0x44b   : > { %6722 = vmatmul.mubr.msk.bf16.vlgmr.msra.gmra.mxu1 %vm747_vm7, %v928_v60 }
 0x44c   : > { %6733 = vmatprep.mubr.msk.bf16.mxu1 %vm7803_vm0, %v7802_v1 }
 0x4ff   : > { %v788_v61 = vpop.f32.mrf.mxu0 }
 0x500   : > { %v794_v24 = vmul.f32 0.35355338, %v788_v61 }
 0x501   : > { %v6705_v62 = vpop.f32.mrf.mxu0 }
 0x502   : > { %v801_v25 = vadd.f32 %v8038_v11, %v794_v24 }
 0x503   : > { %v791_v63 = vpop.f32.mrf.mxu0  ;;  %v856_v0 = vpop.f32.mrf.mxu1 }
 0x504   : > { %v863_v2 = vpack.c.bf16 %v856_v0, %v856_v0  ;;  %v802_v26 = vsel %vm747_vm7, %v801_v25, -inf }
 0x505   : > { %v6706_v3 = vpop.f32.mrf.mxu0  ;;  %v6711_v4 = vpop.f32.mrf.mxu1 }
 0x506   : > { %v1027_v5 = vsel %vm818_vm6, %v863_v2, 0 }
 0x507   : > { %v859_v6 = vpop.f32.mrf.mxu1  ;;  %v908_v7 = vpop.f32.mrf.mxu0  ;;  %6732 = vmatpush3.bf16.msra.mxu1 %v1027_v5 }
 0x508   : > { %v914_v8 = vmul.f32 0.35355338, %v908_v7  ;;  %6743 = vmatprep.subr.bf16.mxu1 %v7802_v1 }
 0x509   : > { %v6712_v9 = vpop.f32.mrf.mxu1  ;;  %v6717_v10 = vpop.f32.mrf.mxu0 }
 0x50a   : > { %v915_v13 = vadd.f32 %v914_v8, %v8038_v11 }
 0x50b   : > { %v911_v14 = vpop.f32.mrf.mxu0  ;;  %v969_v15 = vpop.f32.mrf.mxu1 }
 0x50c   : > { %v976_v16 = vpack.c.bf16 %v969_v15, %v969_v15  ;;  %v916_v17 = vsel %vm747_vm7, %v915_v13, -inf }
 0x50d   : > { %v6718_v18 = vpop.f32.mrf.mxu0  ;;  %v6723_v20 = vpop.f32.mrf.mxu1  ;;  %917 = vmax.xlane.f32.xlu0 %v916_v17 }
 0x50e   : > { %v981_v21 = vsel %vm818_vm6, %v976_v16, 0 }
 0x50f   : > { %v972_v22 = vpop.f32.mrf.mxu1  ;;  %6726 = vmatpush3.bf16.msra.mxu0 %v981_v21 }
 0x510   : > { %6737 = vmatprep.subr.bf16.mxu0 %v7802_v1 }
 0x511   : > { %v6724_v23 = vpop.f32.mrf.mxu1 }
 0x523   : > { %1071 = vrot.lane.b32.xlu0 %v8073_v49, %s8934_s20 }
 0x527   : > { %1069 = vrot.lane.b32.xlu0 %v8073_v49, %s8928_s16  ;;  %s8968_s16 = smov 72  }
 0x546   : > { %803 = vmax.xlane.f32.xlu0 %v802_v26 }
 0x55c   : > { %1229 = vrot.lane.b32.xlu0 %v8073_v49, %s8930_s28  ;;  %s8973_s28 = smov 64  }
 0x596   : > { %v918_v27 = vpop.xlane.xlu0 %917 }
 0x597   : > { %v919_v28 = vsub.f32 %v915_v13, %v918_v27 }
 0x599   : > { %v920_v29 = vmul.f32 1.442695, %v919_v28 }
 0x59a   : > { %v1072_v32 = vpop.permute.xlu0 %1071 }
 0x59b   : > { %7416 = vpow2.f32 %v920_v29  ;;  %v1077_v43 = vsel %vm747_vm7, %v1072_v32, 0 }
 0x59e   : > { %v1070_v33 = vpop.permute.xlu0 %1069 }
 0x5a8   : > { %v7417_v30 = vpop.eup %7416 }
 0x5a9   : > { %v922_v31 = vsel %vm747_vm7, %v7417_v30, 0.0 }
 0x5aa   : > { %923 = vadd.xlane.f32.xlu1 %v922_v31 }
 0x5cf   : > { %v804_v34 = vpop.xlane.xlu0 %803 }
 0x5d0   : > { %v805_v35 = vsub.f32 %v801_v25, %v804_v34 }
 0x5d2   : > { %v806_v36 = vmul.f32 1.442695, %v805_v35 }
 0x5d3   : > { %v1230_v54 = vpop.permute.xlu0 %1229 }
 0x5d4   : > { %7418 = vpow2.f32 %v806_v36 }
 0x5e1   : > { %v7419_v37 = vpop.eup %7418 }
 0x5e2   : > { %v808_v38 = vsel %vm747_vm7, %v7419_v37, 0.0 }
 0x5e3   : > { %809 = vadd.xlane.f32.xlu1 %v808_v38 }
 0x5f4   : > { %1132 = vrot.lane.b32.xlu1 %v8073_v49, %s8932_s30 }
 0x5f8   : > { %1231 = vrot.lane.b32.xlu1 %v8073_v49, %s8926_s15  ;;  %s8974_s15 = smov 56  }
 0x633   : > { %v924_v39 = vpop.xlane.xlu1 %923 }
 0x634   : > { %7420 = vrcp.f32 %v924_v39 }
 0x641   : > { %v7421_v40 = vpop.eup %7420 }
 0x642   : > { %v926_v41 = vmul.f32 %v7421_v40, %v7417_v30 }
 0x644   : > { %v975_v42 = vpack.c.bf16 %v926_v41, %v926_v41 }
 0x646   : > { %6728 = vmatmul.mubr.msk.bf16.vlgmr.msra.gmra.mxu0 %vm747_vm7, %v975_v42 }
 0x647   : > { %6738 = vmatpush3.bf16.xpose.msra.mxu0 %v1077_v43  ;;  %6739 = vmatprep.mubr.msk.bf16.mxu0 %vm7803_vm0, %v7802_v1 }
 0x648   : > { %6749 = vmatprep.subr.bf16.mxu0 %v7802_v1 }
 0x64e   : > { %6740 = vmatmul.mubr.msk.bf16.vlgmr.msra.gmra.mxu0 %vm747_vm7, %v1070_v33  ;;  %v6293_v33 = vld [vmem:[%s8908_s7 + $0x1c] sm:$0xf] }
 0x64f   : > { %6751 = vmatprep.mubr.msk.bf16.mxu0 %vm7803_vm0, %v7802_v1  ;;  %v1298_v36 = vsel %vm818_vm6, %v6293_v33, 0 }
 0x66c   : > { %v810_v44 = vpop.xlane.xlu1 %809 }
 0x66d   : > { %7422 = vrcp.f32 %v810_v44 }
 0x670   : > { %v1133_v51 = vpop.permute.xlu1 %1132 }
 0x674   : > { %v1232_v52 = vpop.permute.xlu1 %1231 }
 0x675   : > { %v1237_v53 = vsel %vm747_vm7, %v1232_v52, 0 }
 0x67a   : > { %v7423_v45 = vpop.eup %7422 }
 0x67b   : > { %v812_v47 = vmul.f32 %v7423_v45, %v7419_v37 }
 0x67d   : > { %v862_v48 = vpack.c.bf16 %v812_v47, %v812_v47 }
 0x67f   : > { %6734 = vmatmul.mubr.msk.bf16.vlgmr.msra.gmra.mxu1 %vm747_vm7, %v862_v48 }
 0x680   : > { %6744 = vmatpush3.bf16.msra.mxu1 %v1138_v50  ;;  %6745 = vmatprep.mubr.msk.bf16.mxu1 %vm7803_vm0, %v7802_v1 }
 0x681   : > { %6755 = vmatprep.subr.bf16.mxu1 %v7802_v1 }
 0x687   : > { %6746 = vmatmul.mubr.msk.bf16.vlgmr.msra.gmra.mxu1 %vm747_vm7, %v1133_v51 }
 0x688   : > { %6756 = vmatpush3.bf16.xpose.msra.mxu1 %v1237_v53  ;;  %6757 = vmatprep.mubr.msk.bf16.mxu1 %vm7803_vm0, %v7802_v1 }
 0x689   : > { %6767 = vmatprep.subr.bf16.mxu1 %v7802_v1 }
 0x68f   : > { %6758 = vmatmul.mubr.msk.bf16.vlgmr.msra.gmra.mxu1 %vm747_vm7, %v1230_v54 }
 0x690   : > { %6769 = vmatprep.mubr.msk.bf16.mxu1 %vm7803_vm0, %v7802_v1 }
 0x706   : > { %v1017_v55 = vpop.f32.mrf.mxu0 }
 0x708   : > { %v6729_v56 = vpop.f32.mrf.mxu0 }
 0x70a   : > { %v1020_v57 = vpop.f32.mrf.mxu0 }
 0x70c   : > { %v6730_v58 = vpop.f32.mrf.mxu0 }
 0x70d   : > { %v6310_v58 = vld [vmem:[#allocation7 + $0x3] ss:$0 sm:$0xff] }
 0x70e   : > { %v1113_v59 = vpop.f32.mrf.mxu0 }
 0x70f   : > { %v1119_v60 = vmul.f32 0.35355338, %v1113_v59 }
 0x710   : > { %v6741_v61 = vpop.f32.mrf.mxu0 }
 0x711   : > { %v1120_v62 = vadd.f32 %v1119_v60, %v8038_v11 }
 0x712   : > { %v1116_v63 = vpop.f32.mrf.mxu0 }
 0x713   : > { %v1121_v0 = vsel %vm747_vm7, %v1120_v62, -inf }
 0x714   : > { %v6742_v2 = vpop.f32.mrf.mxu0  ;;  %1122 = vmax.xlane.f32.xlu1 %v1121_v0 }
 0x725   : > { %1292 = vrot.lane.b32.xlu1 %v8073_v49, %s8924_s29  ;;  %s8969_s29 = smov 40  }
 0x73f   : > { %v1063_v3 = vpop.f32.mrf.mxu1 }
 0x740   : > { %v1064_v4 = vadd.f32 %v1063_v3, %v1017_v55 }
 0x741   : > { %v6735_v5 = vpop.f32.mrf.mxu1 }
 0x743   : > { %v1066_v6 = vpop.f32.mrf.mxu1 }
 0x745   : > { %v6736_v7 = vpop.f32.mrf.mxu1 }
 0x746   : > { %v7382_v7 = vld [vmem:[%s8908_s7 + $0x28] sm:$0xff]  }
 0x747   : > { %v1174_v8 = vpop.f32.mrf.mxu1 }
 0x748   : > { %v1181_v9 = vpack.c.bf16 %v1174_v8, %v1174_v8  ;;  %v7384_v8 = vld [vmem:[%s8908_s7 + $0x38] sm:$0xff]  }
 0x749   : > { %v6747_v10 = vpop.f32.mrf.mxu1 }
 0x74a   : > { %v1186_v13 = vsel %vm818_vm6, %v1181_v9, 0  ;;  %v1519_v9 = vsel %vm1511_vm8, %v7384_v8, 0 }
 0x74b   : > { %v1177_v14 = vpop.f32.mrf.mxu1  ;;  %6750 = vmatpush3.bf16.msra.mxu0 %v1186_v13 }
 0x74c   : > { %6761 = vmatprep.subr.bf16.mxu0 %v7802_v1 }
 0x74d   : > { %v6748_v15 = vpop.f32.mrf.mxu1 }
 0x74f   : > { %v1273_v16 = vpop.f32.mrf.mxu1 }
 0x750   : > { %v1279_v23 = vmul.f32 0.35355338, %v1273_v16 }
 0x751   : > { %v6759_v17 = vpop.f32.mrf.mxu1 }
 0x752   : > { %v1280_v26 = vadd.f32 %v1279_v23, %v8038_v11  ;;  %v6312_v23 = vld [vmem:[#allocation7 + $0x5] ss:$0 sm:$0xff] }
 0x753   : > { %v1276_v18 = vpop.f32.mrf.mxu1 }
 0x754   : > { %v1281_v27 = vsel %vm747_vm7, %v1280_v26, -inf }
 0x755   : > { %v6760_v20 = vpop.f32.mrf.mxu1 }
 0x79d   : > { %v1123_v49 = vpop.xlane.xlu1 %1122 }
 0x79e   : > { %v1124_v21 = vsub.f32 %v1120_v62, %v1123_v49  ;;  %v6311_v49 = vld [vmem:[#allocation7 + $0x4] ss:$0 sm:$0xff] }
 0x7a0   : > { %v1125_v22 = vmul.f32 1.442695, %v1124_v21 }
 0x7a1   : > { %v1293_v39 = vpop.permute.xlu1 %1292 }
 0x7a2   : > { %7424 = vpow2.f32 %v1125_v22 }
 0x7af   : > { %v7425_v24 = vpop.eup %7424 }
 0x7b0   : > { %v1127_v25 = vsel %vm747_vm7, %v7425_v24, 0.0 }
 0x7b1   : > { %1128 = vadd.xlane.f32.xlu0 %v1127_v25 }
 0x7b5   : > { %1282 = vmax.xlane.f32.xlu0 %v1281_v27  ;;  %v7385_v27 = vld [vmem:[%s8908_s7 + $0x30] sm:$0xff]  }
 0x83a   : > { %v1129_v28 = vpop.xlane.xlu0 %1128 }
 0x83b   : > { %7426 = vrcp.f32 %v1129_v28  ;;  %v1516_v28 = vsel %vm1511_vm8, %v7385_v27, 0 }
 0x83e   : > { %v1283_v29 = vpop.xlane.xlu0 %1282 }
 0x83f   : > { %v1284_v30 = vsub.f32 %v1280_v26, %v1283_v29  ;;  %v6321_v29 = vld [vmem:[#allocation7 + $0x6] ss:$0 sm:$0xff] }
 0x841   : > { %v1285_v31 = vmul.f32 1.442695, %v1284_v30 }
 0x843   : > { %7428 = vpow2.f32 %v1285_v31 }
 0x848   : > { %v7427_v32 = vpop.eup %7426 }
 0x849   : > { %v1131_v34 = vmul.f32 %v7427_v32, %v7425_v24 }
 0x84b   : > { %v1180_v35 = vpack.c.bf16 %v1131_v34, %v1131_v34 }
 0x84d   : > { %6752 = vmatmul.mubr.msk.bf16.vlgmr.msra.gmra.mxu0 %vm747_vm7, %v1180_v35 }
 0x84e   : > { %6762 = vmatpush3.bf16.msra.mxu0 %v1298_v36  ;;  %6763 = vmatprep.mubr.msk.bf16.mxu0 %vm7803_vm0, %v7802_v1 }
 0x84f   : > { %6773 = vmatprep.subr.bf16.mxu0 %v7802_v1 }
 0x850   : > { %v7429_v37 = vpop.eup %7428 }
 0x851   : > { %v1287_v38 = vsel %vm747_vm7, %v7429_v37, 0.0 }
 0x852   : > { %1288 = vadd.xlane.f32.xlu1 %v1287_v38 }
 0x855   : > { %6764 = vmatmul.mubr.msk.bf16.vlgmr.msra.gmra.mxu0 %vm747_vm7, %v1293_v39 }
 0x856   : > { %6777 = vmatprep.mubr.msk.bf16.mxu0 %vm7803_vm0, %v7802_v1  ;;  %6774 = vmatpush3.bf16.msra.mxu0 %v7382_v7  ;;  %v6339_v7 = vld [vmem:[#allocation7 + $0xa] ss:$0 sm:$0xff] }
 0x857   : > { %6775 = vmatprep.subr.bf16.mxu0 %v7802_v1 }
 0x8db   : > { %v1289_v40 = vpop.xlane.xlu1 %1288 }
 0x8dc   : > { %7430 = vrcp.f32 %v1289_v40 }
 0x8e9   : > { %v7431_v45 = vpop.eup %7430 }
 0x8ea   : > { %v1291_v50 = vmul.f32 %v7431_v45, %v7429_v37  ;;  %v6328_v37 = vld [vmem:[#allocation7 + $0x7] ss:$0 sm:$0xff] }
 0x8ec   : > { %v1340_v54 = vpack.c.bf16 %v1291_v50, %v1291_v50 }
 0x90d   : > { %v1222_v41 = vpop.f32.mrf.mxu0 }
 0x90e   : > { %v1228_v42 = vadd.f32 %v1222_v41, %v1064_v4 }
 0x90f   : > { %v6753_v43 = vpop.f32.mrf.mxu0 }
 0x911   : > { %v1225_v44 = vpop.f32.mrf.mxu0 }
 0x913   : > { %v6754_v46 = vpop.f32.mrf.mxu0 }
 0x915   : > { %v1334_v47 = vpop.f32.mrf.mxu0 }
 0x916   : > { %v1341_v48 = vpack.c.bf16 %v1334_v47, %v1334_v47 }
 0x917   : > { %v6765_v51 = vpop.f32.mrf.mxu0 }
 0x918   : > { %v1346_v52 = vsel %vm818_vm6, %v1341_v48, 0  ;;  %v7386_v51 = vld [vmem:[%s8908_s7 + $0x48] sm:$0xff]  }
 0x919   : > { %v1337_v53 = vpop.f32.mrf.mxu0  ;;  %6768 = vmatpush3.bf16.msra.mxu1 %v1346_v52  ;;  %v7387_v52 = vld [vmem:[%s8908_s7 + $0x40] sm:$0xff]  }
 0x91a   : > { %6781 = vmatprep.subr.bf16.mxu1 %v7802_v1 }
 0x91b   : > { %v6766_v55 = vpop.f32.mrf.mxu0 }
 0x91c   : > { %6770 = vmatmul.mubr.msk.bf16.vlgmr.msra.gmra.mxu1 %vm747_vm7, %v1340_v54 }
 0x91d   : > { %6785 = vmatprep.mubr.msk.bf16.mxu1 %vm7803_vm0, %v7802_v1  ;;  %6782 = vmatpush3.bf16.xpose.msra.mxu1 %v1519_v9 }
 0x91e   : > { %6783 = vmatprep.subr.bf16.mxu1 %v7802_v1 }
 0x925   : > { %6784 = vmatpush3.bf16.xpose.msra.mxu1 %v1516_v28 }
 0x926   : > { %6803 = vmatprep.subr.bf16.mxu1 %v7802_v1 }
 0x9dc   : > { %v1382_v56 = vpop.f32.mrf.mxu1 }
 0x9dd   : > { %v1388_v57 = vadd.f32 %v1382_v56, %v1228_v42 }
 0x9de   : > { %v6771_v59 = vpop.f32.mrf.mxu1 }
 0x9df   : > { %v1389_v60 = vadd.f32 %v1388_v57, %v8051_v19  ;;  %v7383_v19 = vld [vmem:[%s8908_s7 + $0x20] sm:$0xff]  }
 0x9e0   : > { %v1385_v61 = vpop.f32.mrf.mxu1  ;;  %6776 = vmatpush3.bf16.msra.mxu0 %v7383_v19 }
 0x9e1   : > { %v1394_v62 = vadd.f32 %v6310_v58, %v1389_v60  ;;  %6789 = vmatprep.subr.bf16.mxu0 %v7802_v1  ;;  %v6329_v61 = vld [vmem:[#allocation7 + $0x8] ss:$0 sm:$0xff] }
 0x9e2   : > { %v6772_v63 = vpop.f32.mrf.mxu1 }
 0x9e3   : > { %v1397_v0 = vsel %vm640_vm3, %v1394_v62, 0.0 }
 0x9e4   : > { %1398 = vadd.xlane.f32.xlu0 %v1397_v0  ;;  %v6330_v0 = vld [vmem:[#allocation7 + $0x9] ss:$0 sm:$0xff] }
 0xa6d   : > { %v1399_v2 = vpop.xlane.xlu0 %1398 }
 0xa6e   : > { %v1400_v3 = vmul.f32 0.03125, %v1399_v2 }
 0xa70   : > { %v1401_v4 = vsub.f32 %v1394_v62, %v1400_v3 }
 0xa72   : > { %v1402_v5 = vmul.f32 %v1401_v4, %v1401_v4  ;;  %v1420_v21 = vmul.f32 %v6311_v49, %v1401_v4 }
 0xa74   : > { %v1403_v6 = vsel %vm640_vm3, %v1402_v5, 0.0  ;;  %v6335_v5 = vld [vmem:[%s8908_s7 + $0x50] sm:$0xf] }
 0xa75   : > { %1404 = vadd.xlane.f32.xlu0 %v1403_v6  ;;  %v1741_v6 = vsel %vm818_vm6, %v6335_v5, 0 }
 0xafe   : > { %v1405_v10 = vpop.xlane.xlu0 %1404 }
 0xaff   : > { %v1406_v13 = vmul.f32 0.032258064, %v1405_v10 }
 0xb01   : > { %7432 = vrsqrt.f32 %v1406_v13  ;;  %vm1409_vm9 = vcmp.eq.f32.partialorder %v1406_v13, inf  ;;  %v1412_v16 = vand.u32 2147483648, %v1406_v13  ;;  %vm1411_vm10 = vcmp.eq.f32.partialorder %v1406_v13, 0.0 }
 0xb0e   : > { %v7433_v14 = vpop.eup %7432 }
 0xb0f   : > { %v1408_v15 = vmul.f32 %v7433_v14, %v1406_v13 }
 0xb11   : > { %v1410_v17 = vsel %vm1409_vm9, %v1406_v13, %v1408_v15 }
 0xb12   : > { %v1413_v18 = vsel %vm1411_vm10, %v1412_v16, %v1410_v17 }
 0xb13   : > { %v1414_v20 = vadd.f32 1e-06, %v1413_v18  ;;  %v6336_v18 = vld [vmem:[%s8908_s7 + $0x54] sm:$0xf] }
 0xb14   : > { %v1854_v49 = vsel %vm818_vm6, %v6336_v18, 0 }
 0xb15   : > { %7434 = vrcp.f32 %v1414_v20 }
 0xb22   : > { %v7435_v22 = vpop.eup %7434 }
 0xb23   : > { %v1421_v24 = vmul.f32 %v7435_v22, %v1420_v21 }
 0xb25   : > { %v1426_v25 = vadd.f32 %v6312_v23, %v1421_v24 }
 0xb27   : > { %v1439_v26 = vpack.c.bf16 %v1426_v25, %v1426_v25 }
 0xb29   : > { %6778 = vmatmul.mubr.msk.bf16.vlgmr.msra.gmra.mxu0 %vm640_vm3, %v1439_v26 }
 0xb2a   : > { %6793 = vmatprep.mubr.msk.bf16.mxu0 %vm7803_vm0, %v7802_v1  ;;  %6790 = vmatpush3.bf16.msra.mxu0 %v7386_v51 }
 0xb2b   : > { %6791 = vmatprep.subr.bf16.mxu0 %v7802_v1 }
 0xb2e   : > { %6792 = vmatpush3.bf16.msra.mxu0 %v7387_v52 }
 0xb2f   : > { %6797 = vmatprep.subr.bf16.mxu0 %v7802_v1 }
 0xbe9   : > { %v1493_v30 = vpop.f32.mrf.mxu0 }
 0xbea   : > { %v1494_v31 = vadd.f32 %v6321_v29, %v1493_v30 }
 0xbeb   : > { %v6779_v32 = vpop.f32.mrf.mxu0 }
 0xbec   : > { %v1499_v33 = vmax.f32 %v1494_v31, 0.0 }
 0xbed   : > { %v1496_v34 = vpop.f32.mrf.mxu0 }
 0xbee   : > { %v1500_v35 = vpack.c.bf16 %v1499_v33, %v1499_v33 }
 0xbef   : > { %v6780_v36 = vpop.f32.mrf.mxu0 }
 0xbf0   : > { %6786 = vmatmul.mubr.msk.bf16.vlgmr.msra.gmra.mxu1 %vm1511_vm8, %v1500_v35 }
 0xbf1   : > { %6805 = vmatprep.mubr.msk.bf16.mxu1 %vm7803_vm0, %v7802_v1  ;;  %6804 = vmatpush3.bf16.msra.mxu1 %v1741_v6 }
 0xbf2   : > { %6815 = vmatprep.subr.bf16.mxu1 %v7802_v1 }
 0xcb0   : > { %v1555_v38 = vpop.f32.mrf.mxu1 }
 0xcb1   : > { %v1561_v39 = vadd.f32 %v1555_v38, %v1394_v62 }
 0xcb2   : > { %v6787_v40 = vpop.f32.mrf.mxu1 }
 0xcb3   : > { %v8204_v41 = vadd.f32 %v6328_v37, %v1561_v39 }
 0xcb4   : > { %v1558_v42 = vpop.f32.mrf.mxu1 }
 0xcb5   : > { %v1570_v43 = vsel %vm640_vm3, %v8204_v41, 0.0 }
 0xcb6   : > { %1571 = vadd.xlane.f32.xlu0 %v1570_v43  ;;  %v6788_v44 = vpop.f32.mrf.mxu1 }
 0xd3f   : > { %v1572_v45 = vpop.xlane.xlu0 %1571 }
 0xd40   : > { %v1573_v46 = vmul.f32 0.03125, %v1572_v45 }
 0xd42   : > { %v1574_v47 = vsub.f32 %v8204_v41, %v1573_v46 }
 0xd44   : > { %v1575_v48 = vmul.f32 %v1574_v47, %v1574_v47  ;;  %v1593_v62 = vmul.f32 %v6329_v61, %v1574_v47 }
 0xd46   : > { %v1576_v50 = vsel %vm640_vm3, %v1575_v48, 0.0 }
 0xd47   : > { %1577 = vadd.xlane.f32.xlu0 %v1576_v50 }
 0xdd0   : > { %v1578_v53 = vpop.xlane.xlu0 %1577 }
 0xdd1   : > { %v1579_v54 = vmul.f32 0.032258064, %v1578_v53 }
 0xdd3   : > { %7436 = vrsqrt.f32 %v1579_v54  ;;  %vm1582_vm11 = vcmp.eq.f32.partialorder %v1579_v54, inf  ;;  %v1585_v57 = vand.u32 2147483648, %v1579_v54  ;;  %vm1584_vm12 = vcmp.eq.f32.partialorder %v1579_v54, 0.0 }
 0xde0   : > { %v7437_v55 = vpop.eup %7436 }
 0xde1   : > { %v1581_v56 = vmul.f32 %v7437_v55, %v1579_v54 }
 0xde3   : > { %v1583_v58 = vsel %vm1582_vm11, %v1579_v54, %v1581_v56 }
 0xde4   : > { %v1586_v59 = vsel %vm1584_vm12, %v1585_v57, %v1583_v58 }
 0xde5   : > { %v1587_v60 = vadd.f32 1e-06, %v1586_v59 }
 0xde7   : > { %7438 = vrcp.f32 %v1587_v60 }
 0xdf4   : > { %v7439_v63 = vpop.eup %7438 }
 0xdf5   : > { %v1594_v2 = vmul.f32 %v7439_v63, %v1593_v62 }
 0xdf7   : > { %v1599_v3 = vadd.f32 %v6330_v0, %v1594_v2 }
 0xdf9   : > { %v1612_v4 = vpack.c.bf16 %v1599_v3, %v1599_v3 }
 0xdfb   : > { %6794 = vmatmul.mubr.msk.bf16.vlgmr.msra.gmra.mxu0 %vm640_vm3, %v1612_v4 }
 0xdfc   : > { %6799 = vmatprep.mubr.msk.bf16.mxu0 %vm7803_vm0, %v7802_v1 }
 0xebb   : > { %v1666_v19 = vpop.f32.mrf.mxu0 }
 0xebc   : > { %v1667_v8 = vadd.f32 %v6339_v7, %v1666_v19  ;;  %v6337_v19 = vld [vmem:[%s8908_s7 + $0x58] sm:$0xf] }
 0xebd   : > { %v6795_v9 = vpop.f32.mrf.mxu0 }
 0xebe   : > { %v8226_v10 = vpack.c.bf16 %v1667_v8, %v1667_v8 }
 0xebf   : > { %v1669_v13 = vpop.f32.mrf.mxu0 }
 0xec0   : > { %1787 = vrot.lane.b32.xlu1 %v8226_v10, %s8944_s23  ;;  %1674 = vrot.lane.b32.xlu0 %v8226_v10, %s8942_s21  ;;  %v2059_v13 = vsel %vm818_vm6, %v6337_v19, 0  ;;  %s7815_s23 = smov [#allocation13]  }
 0xec1   : > { %v6796_v14 = vpop.f32.mrf.mxu0 }
 0xec4   : > { %1785 = vrot.lane.b32.xlu0 %v8226_v10, %s8940_s17  ;;  %s542_s17 = scalar_lea.vmem %s8904_s3, %s8024_s18 }
 0xec8   : > { %1735 = vrot.lane.b32.xlu0 %v8226_v10, %s8938_s19  ;;  %s8976_s19 = smov 48  }
 0xecc   : > { %1848 = vrot.lane.b32.xlu0 %v8226_v10, %s8936_s27  ;;  %s8970_s27 = smov 88  }
 0xf32   : > { %v1675_v15 = vpop.permute.xlu0 %1674  ;;  %v1788_v20 = vpop.permute.xlu1 %1787 }
 0xf33   : > { %v1680_v16 = vsel %vm747_vm7, %v1675_v15, 0  ;;  %v1793_v22 = vsel %vm747_vm7, %v1788_v20, 0 }
 0xf34   : > { %6798 = vmatpush3.bf16.xpose.msra.mxu0 %v1680_v16 }
 0xf35   : > { %6809 = vmatprep.subr.bf16.mxu0 %v7802_v1 }
 0xf36   : > { %v1786_v17 = vpop.permute.xlu0 %1785 }
 0xf3a   : > { %v1736_v21 = vpop.permute.xlu0 %1735 }
 0xf3b   : > { %6800 = vmatmul.mubr.msk.bf16.vlgmr.msra.gmra.mxu0 %vm747_vm7, %v8226_v10  ;;  %6806 = vmatmul.mubr.msk.bf16.vlgmr.msra.gmra.mxu1 %vm747_vm7, %v1736_v21 }
 0xf3c   : > { %6810 = vmatpush3.bf16.xpose.msra.mxu0 %v1793_v22  ;;  %6816 = vmatpush3.bf16.msra.mxu1 %v1854_v49 }
 0xf3d   : > { %6811 = vmatprep.mubr.msk.bf16.mxu0 %vm7803_vm0, %v7802_v1  ;;  %6817 = vmatprep.mubr.msk.bf16.mxu1 %vm7803_vm0, %v7802_v1 }
 0xf3e   : > { %6827 = vmatprep.subr.bf16.mxu1 %v7802_v1  ;;  %6821 = vmatprep.subr.bf16.mxu0 %v7802_v1  ;;  %v1849_v23 = vpop.permute.xlu0 %1848 }
 0xf43   : > { %6812 = vmatmul.mubr.msk.bf16.vlgmr.msra.gmra.mxu0 %vm747_vm7, %v1786_v17  ;;  %6818 = vmatmul.mubr.msk.bf16.vlgmr.msra.gmra.mxu1 %vm747_vm7, %v1849_v23 }
 0xf44   : > { %6823 = vmatprep.mubr.msk.bf16.mxu0 %vm7803_vm0, %v7802_v1  ;;  %6829 = vmatprep.mubr.msk.bf16.mxu1 %vm7803_vm0, %v7802_v1 }
 0xffb   : > { %v1716_v24 = vpop.f32.mrf.mxu0  ;;  %v1777_v25 = vpop.f32.mrf.mxu1 }
 0xffc   : > { %v1784_v26 = vpack.c.bf16 %v1777_v25, %v1777_v25  ;;  %v1722_v48 = vmul.f32 0.35355338, %v1716_v24 }
 0xffd   : > { %v6801_v27 = vpop.f32.mrf.mxu0  ;;  %v6807_v28 = vpop.f32.mrf.mxu1 }
 0xffe   : > { %v1948_v29 = vsel %vm818_vm6, %v1784_v26, 0  ;;  %v1723_v50 = vadd.f32 %v1722_v48, %v8038_v11 }
 0xfff   : > { %v1719_v30 = vpop.f32.mrf.mxu0  ;;  %v1780_v31 = vpop.f32.mrf.mxu1  ;;  %6828 = vmatpush3.bf16.msra.mxu1 %v1948_v29 }
0x1000   : > { %6839 = vmatprep.subr.bf16.mxu1 %v7802_v1  ;;  %v1724_v51 = vsel %vm747_vm7, %v1723_v50, -inf }
0x1001   : > { %v6802_v32 = vpop.f32.mrf.mxu0  ;;  %v6808_v33 = vpop.f32.mrf.mxu1 }
0x1003   : > { %v1829_v34 = vpop.f32.mrf.mxu0  ;;  %v1890_v35 = vpop.f32.mrf.mxu1 }
0x1004   : > { %v1835_v36 = vmul.f32 0.35355338, %v1829_v34  ;;  %v1897_v37 = vpack.c.bf16 %v1890_v35, %v1890_v35 }
0x1005   : > { %v6813_v38 = vpop.f32.mrf.mxu0  ;;  %v6819_v39 = vpop.f32.mrf.mxu1 }
0x1006   : > { %v1902_v40 = vsel %vm818_vm6, %v1897_v37, 0  ;;  %v1836_v42 = vadd.f32 %v1835_v36, %v8038_v11 }
0x1007   : > { %v1832_v43 = vpop.f32.mrf.mxu0  ;;  %v1893_v44 = vpop.f32.mrf.mxu1  ;;  %6822 = vmatpush3.bf16.msra.mxu0 %v1902_v40 }
0x1008   : > { %v1837_v45 = vsel %vm747_vm7, %v1836_v42, -inf  ;;  %6833 = vmatprep.subr.bf16.mxu0 %v7802_v1 }
0x1009   : > { %1838 = vmax.xlane.f32.xlu0 %v1837_v45  ;;  %v6814_v46 = vpop.f32.mrf.mxu0  ;;  %v6820_v47 = vpop.f32.mrf.mxu1 }
0x101f   : > { %1992 = vrot.lane.b32.xlu0 %v8226_v10, %s8934_s20  ;;  %s8971_s20 = smov 96  }
0x103e   : > { %1725 = vmax.xlane.f32.xlu0 %v1724_v51 }
0x1054   : > { %2053 = vrot.lane.b32.xlu0 %v8226_v10, %s8932_s30  ;;  %s535_s30 = scalar_lea.vmem %s8902_s1, %s8024_s18  ;;  %s8975_s18 = smov 80  }
0x1058   : > { %2150 = vrot.lane.b32.xlu0 %v8226_v10, %s8966_s26 }
0x1092   : > { %v1839_v52 = vpop.xlane.xlu0 %1838 }
0x1093   : > { %v1840_v53 = vsub.f32 %v1836_v42, %v1839_v52 }
0x1095   : > { %v1841_v54 = vmul.f32 1.442695, %v1840_v53 }
0x1096   : > { %v1993_v57 = vpop.permute.xlu0 %1992 }
0x1097   : > { %7440 = vpow2.f32 %v1841_v54  ;;  %v1998_v4 = vsel %vm747_vm7, %v1993_v57, 0 }
0x10a4   : > { %v7441_v55 = vpop.eup %7440 }
0x10a5   : > { %v1843_v56 = vsel %vm747_vm7, %v7441_v55, 0.0 }
0x10a6   : > { %1844 = vadd.xlane.f32.xlu1 %v1843_v56 }
0x10b7   : > { %1990 = vrot.lane.b32.xlu1 %v8226_v10, %s8967_s14 }
0x10c7   : > { %v1726_v58 = vpop.xlane.xlu0 %1725 }
0x10c8   : > { %v1727_v59 = vsub.f32 %v1723_v50, %v1726_v58 }
0x10ca   : > { %v1728_v60 = vmul.f32 1.442695, %v1727_v59 }
0x10cb   : > { %v2054_v15 = vpop.permute.xlu0 %2053 }
0x10cc   : > { %7442 = vpow2.f32 %v1728_v60 }
0x10cf   : > { %v2151_v17 = vpop.permute.xlu0 %2150 }
0x10d9   : > { %v7443_v61 = vpop.eup %7442 }
0x10da   : > { %v1730_v62 = vsel %vm747_vm7, %v7443_v61, 0.0 }
0x10db   : > { %1731 = vadd.xlane.f32.xlu1 %v1730_v62 }
0x10ec   : > { %2152 = vrot.lane.b32.xlu1 %v8226_v10, %s8968_s16 }
0x112f   : > { %v1845_v63 = vpop.xlane.xlu1 %1844 }
0x1130   : > { %7444 = vrcp.f32 %v1845_v63 }
0x1133   : > { %v1991_v5 = vpop.permute.xlu1 %1990 }
0x113d   : > { %v7445_v0 = vpop.eup %7444 }
0x113e   : > { %v1847_v2 = vmul.f32 %v7445_v0, %v7441_v55 }
0x1140   : > { %v1896_v3 = vpack.c.bf16 %v1847_v2, %v1847_v2 }
0x1142   : > { %6824 = vmatmul.mubr.msk.bf16.vlgmr.msra.gmra.mxu0 %vm747_vm7, %v1896_v3 }
0x1143   : > { %6834 = vmatpush3.bf16.xpose.msra.mxu0 %v1998_v4  ;;  %6835 = vmatprep.mubr.msk.bf16.mxu0 %vm7803_vm0, %v7802_v1 }
0x1144   : > { %6845 = vmatprep.subr.bf16.mxu0 %v7802_v1 }
0x114a   : > { %6836 = vmatmul.mubr.msk.bf16.vlgmr.msra.gmra.mxu0 %vm747_vm7, %v1991_v5 }
0x114b   : > { %6847 = vmatprep.mubr.msk.bf16.mxu0 %vm7803_vm0, %v7802_v1 }
0x1164   : > { %v1732_v6 = vpop.xlane.xlu1 %1731 }
0x1165   : > { %7446 = vrcp.f32 %v1732_v6 }
0x1168   : > { %v2153_v14 = vpop.permute.xlu1 %2152 }
0x1169   : > { %v2158_v16 = vsel %vm747_vm7, %v2153_v14, 0 }
0x1172   : > { %v7447_v7 = vpop.eup %7446 }
0x1173   : > { %v1734_v8 = vmul.f32 %v7447_v7, %v7443_v61  ;;  %v6338_v61 = vld [vmem:[%s8908_s7 + $0x5c] sm:$0xf] }
0x1174   : > { %v2219_v0 = vsel %vm818_vm6, %v6338_v61, 0 }
0x1175   : > { %v1783_v9 = vpack.c.bf16 %v1734_v8, %v1734_v8 }
0x1177   : > { %6830 = vmatmul.mubr.msk.bf16.vlgmr.msra.gmra.mxu1 %vm747_vm7, %v1783_v9 }
0x1178   : > { %6840 = vmatpush3.bf16.msra.mxu1 %v2059_v13  ;;  %6841 = vmatprep.mubr.msk.bf16.mxu1 %vm7803_vm0, %v7802_v1 }
0x1179   : > { %6851 = vmatprep.subr.bf16.mxu1 %v7802_v1 }
0x117f   : > { %6842 = vmatmul.mubr.msk.bf16.vlgmr.msra.gmra.mxu1 %vm747_vm7, %v2054_v15 }
0x1180   : > { %6852 = vmatpush3.bf16.xpose.msra.mxu1 %v2158_v16  ;;  %6853 = vmatprep.mubr.msk.bf16.mxu1 %vm7803_vm0, %v7802_v1 }
0x1181   : > { %6863 = vmatprep.subr.bf16.mxu1 %v7802_v1 }
0x1187   : > { %6854 = vmatmul.mubr.msk.bf16.vlgmr.msra.gmra.mxu1 %vm747_vm7, %v2151_v17 }
0x1188   : > { %6865 = vmatprep.mubr.msk.bf16.mxu1 %vm7803_vm0, %v7802_v1 }
0x1202   : > { %v1938_v18 = vpop.f32.mrf.mxu0 }
0x1204   : > { %v6825_v20 = vpop.f32.mrf.mxu0 }
0x1206   : > { %v1941_v49 = vpop.f32.mrf.mxu0 }
0x1208   : > { %v6826_v21 = vpop.f32.mrf.mxu0 }
0x1209   : > { %v6355_v21 = vld [vmem:[#allocation7 + $0xb] ss:$0 sm:$0xff] }
0x120a   : > { %v2034_v22 = vpop.f32.mrf.mxu0 }
0x120b   : > { %v2040_v23 = vmul.f32 0.35355338, %v2034_v22 }
0x120c   : > { %v6837_v24 = vpop.f32.mrf.mxu0 }
0x120d   : > { %v2041_v25 = vadd.f32 %v2040_v23, %v8038_v11 }
0x120e   : > { %v2037_v26 = vpop.f32.mrf.mxu0 }
0x120f   : > { %v2042_v27 = vsel %vm747_vm7, %v2041_v25, -inf }
0x1210   : > { %2043 = vmax.xlane.f32.xlu1 %v2042_v27  ;;  %v6838_v28 = vpop.f32.mrf.mxu0 }
0x1237   : > { %v1984_v29 = vpop.f32.mrf.mxu1 }
0x1238   : > { %v1985_v30 = vadd.f32 %v1984_v29, %v1938_v18 }
0x1239   : > { %v6831_v31 = vpop.f32.mrf.mxu1 }
0x123b   : > { %v1987_v32 = vpop.f32.mrf.mxu1 }
0x123d   : > { %v6832_v33 = vpop.f32.mrf.mxu1 }
0x123e   : > { %v7388_v33 = vld [vmem:[%s8908_s7 + $0x68] sm:$0xff]  }
0x123f   : > { %v2095_v34 = vpop.f32.mrf.mxu1 }
0x1240   : > { %v2102_v35 = vpack.c.bf16 %v2095_v34, %v2095_v34  ;;  %v7389_v34 = vld [vmem:[%s8908_s7 + $0x60] sm:$0xff]  }
0x1241   : > { %v6843_v36 = vpop.f32.mrf.mxu1 }
0x1242   : > { %v2107_v37 = vsel %vm818_vm6, %v2102_v35, 0  ;;  %v7390_v35 = vld [vmem:[%s8908_s7 + $0x78] sm:$0xff]  }
0x1243   : > { %v2098_v38 = vpop.f32.mrf.mxu1  ;;  %6846 = vmatpush3.bf16.msra.mxu0 %v2107_v37  ;;  %v2439_v36 = vsel %vm1511_vm8, %v7390_v35, 0 }
0x1244   : > { %6857 = vmatprep.subr.bf16.mxu0 %v7802_v1 }
0x1245   : > { %v6844_v39 = vpop.f32.mrf.mxu1 }
0x1247   : > { %v2194_v40 = vpop.f32.mrf.mxu1 }
0x1248   : > { %v2200_v42 = vmul.f32 0.35355338, %v2194_v40 }
0x1249   : > { %v6855_v43 = vpop.f32.mrf.mxu1 }
0x124a   : > { %v2201_v44 = vadd.f32 %v2200_v42, %v8038_v11 }
0x124b   : > { %v2197_v45 = vpop.f32.mrf.mxu1 }
0x124c   : > { %v2202_v46 = vsel %vm747_vm7, %v2201_v44, -inf }
0x124d   : > { %2203 = vmax.xlane.f32.xlu1 %v2202_v46  ;;  %v6856_v47 = vpop.f32.mrf.mxu1  ;;  %v6356_v46 = vld [vmem:[#allocation7 + $0xc] ss:$0 sm:$0xff] }
0x1299   : > { %v2044_v48 = vpop.xlane.xlu1 %2043 }
0x129a   : > { %v2045_v50 = vsub.f32 %v2041_v25, %v2044_v48 }
0x129c   : > { %v2046_v51 = vmul.f32 1.442695, %v2045_v50  ;;  %v6357_v50 = vld [vmem:[#allocation7 + $0xd] ss:$0 sm:$0xff] }
0x129e   : > { %7448 = vpow2.f32 %v2046_v51 }
0x12ab   : > { %v7449_v52 = vpop.eup %7448 }
0x12ac   : > { %v2048_v53 = vsel %vm747_vm7, %v7449_v52, 0.0 }
0x12ad   : > { %2049 = vadd.xlane.f32.xlu0 %v2048_v53 }
0x12c3   : > { %2213 = vrot.lane.b32.xlu0 %v8226_v10, %s8969_s29 }
0x12d6   : > { %v2204_v54 = vpop.xlane.xlu1 %2203 }
0x12d7   : > { %v2205_v55 = vsub.f32 %v2201_v44, %v2204_v54  ;;  %v2522_v54 = vld [vmem:[#allocation5 + $0x8] sm:$0xff] }
0x12d9   : > { %v2206_v56 = vmul.f32 1.442695, %v2205_v55 }
0x12db   : > { %7450 = vpow2.f32 %v2206_v56  ;;  %v2521_v56 = vld [vmem:[#allocation5] sm:$0xff] }
0x12e8   : > { %v7451_v57 = vpop.eup %7450 }
0x12e9   : > { %v2208_v58 = vsel %vm747_vm7, %v7451_v57, 0.0 }
0x12ea   : > { %2209 = vadd.xlane.f32.xlu1 %v2208_v58  ;;  %v7391_v58 = vld [vmem:[%s8908_s7 + $0x70] sm:$0xff]  }
0x1336   : > { %v2050_v59 = vpop.xlane.xlu0 %2049 }
0x1337   : > { %7452 = vrcp.f32 %v2050_v59  ;;  %v2436_v59 = vsel %vm1511_vm8, %v7391_v58, 0 }
0x133a   : > { %v2214_v10 = vpop.permute.xlu0 %2213 }
0x1344   : > { %v7453_v60 = vpop.eup %7452 }
0x1345   : > { %v2052_v62 = vmul.f32 %v7453_v60, %v7449_v52 }
0x1347   : > { %v2101_v63 = vpack.c.bf16 %v2052_v62, %v2052_v62 }
0x1349   : > { %6848 = vmatmul.mubr.msk.bf16.vlgmr.msra.gmra.mxu0 %vm747_vm7, %v2101_v63 }
0x134a   : > { %6858 = vmatpush3.bf16.msra.mxu0 %v2219_v0  ;;  %6859 = vmatprep.mubr.msk.bf16.mxu0 %vm7803_vm0, %v7802_v1 }
0x134b   : > { %6869 = vmatprep.subr.bf16.mxu0 %v7802_v1 }
0x1351   : > { %6860 = vmatmul.mubr.msk.bf16.vlgmr.msra.gmra.mxu0 %vm747_vm7, %v2214_v10 }
0x1352   : > { %6873 = vmatprep.mubr.msk.bf16.mxu0 %vm7803_vm0, %v7802_v1  ;;  %6870 = vmatpush3.bf16.msra.mxu0 %v7388_v33  ;;  %v6379_v33 = vld [vmem:[#allocation10 + $0x1] ss:$0 sm:$0xff] }
0x1353   : > { %6871 = vmatprep.subr.bf16.mxu0 %v7802_v1 }
0x1356   : > { %6872 = vmatpush3.bf16.msra.mxu0 %v7389_v34 }
0x1357   : > { %6885 = vmatprep.subr.mxu0 %v7802_v1 }
0x1373   : > { %v2210_v2 = vpop.xlane.xlu1 %2209 }
0x1374   : > { %7454 = vrcp.f32 %v2210_v2 }
0x1381   : > { %v7455_v7 = vpop.eup %7454 }
0x1382   : > { %v2212_v13 = vmul.f32 %v7455_v7, %v7451_v57 }
0x1384   : > { %v2261_v17 = vpack.c.bf16 %v2212_v13, %v2212_v13 }
0x1409   : > { %v2143_v3 = vpop.f32.mrf.mxu0 }
0x140a   : > { %v2149_v4 = vadd.f32 %v2143_v3, %v1985_v30 }
0x140b   : > { %v6849_v5 = vpop.f32.mrf.mxu0 }
0x140d   : > { %v2146_v6 = vpop.f32.mrf.mxu0 }
0x140e   : > { %v7556_v6 = vld [vmem:[%s8907_s6] sm:$0xff] }
0x140f   : > { %v6850_v19 = vpop.f32.mrf.mxu0 }
0x1411   : > { %v2255_v8 = vpop.f32.mrf.mxu0 }
0x1412   : > { %v2262_v9 = vpack.c.bf16 %v2255_v8, %v2255_v8 }
0x1413   : > { %v6861_v14 = vpop.f32.mrf.mxu0 }
0x1414   : > { %v2267_v15 = vsel %vm818_vm6, %v2262_v9, 0 }
0x1415   : > { %v2258_v16 = vpop.f32.mrf.mxu0  ;;  %6864 = vmatpush3.bf16.msra.mxu1 %v2267_v15 }
0x1416   : > { %6877 = vmatprep.subr.bf16.mxu1 %v7802_v1  ;;  %v7392_v16 = vld [vmem:[#allocation8 + $0x8] sm:$0xff]  }
0x1417   : > { %v6862_v18 = vpop.f32.mrf.mxu0 }
0x1418   : > { %6866 = vmatmul.mubr.msk.bf16.vlgmr.msra.gmra.mxu1 %vm747_vm7, %v2261_v17  ;;  %v7393_v17 = vld [vmem:[#allocation8] sm:$0xff]  }
0x1419   : > { %6881 = vmatprep.mubr.msk.bf16.mxu1 %vm7803_vm0, %v7802_v1  ;;  %6878 = vmatpush3.bf16.xpose.msra.mxu1 %v2439_v36 }
0x141a   : > { %6879 = vmatprep.subr.bf16.mxu1 %v7802_v1 }
0x1421   : > { %6880 = vmatpush3.bf16.xpose.msra.mxu1 %v2436_v59 }
0x1422   : > { %6900 = vmatprep.subr.bf16.mxu1 %v7802_v1 }
0x14d8   : > { %v2303_v20 = vpop.f32.mrf.mxu1 }
0x14d9   : > { %v2309_v49 = vadd.f32 %v2303_v20, %v2149_v4 }
0x14da   : > { %v6867_v22 = vpop.f32.mrf.mxu1 }
0x14db   : > { %v2310_v23 = vadd.f32 %v2309_v49, %v8204_v41  ;;  %v2520_v41 = vld [vmem:[%s535_s30] sm:$0xff]  ;;  %s8972_s30 = smov 120  }
0x14dc   : > { %v2306_v24 = vpop.f32.mrf.mxu1 }
0x14dd   : > { %v8331_v25 = vadd.f32 %v6355_v21, %v2310_v23 }
0x14de   : > { %v6868_v26 = vpop.f32.mrf.mxu1 }
0x14df   : > { %v2318_v27 = vsel %vm640_vm3, %v8331_v25, 0.0 }
0x14e0   : > { %2319 = vadd.xlane.f32.xlu1 %v2318_v27 }
0x1569   : > { %v2320_v28 = vpop.xlane.xlu1 %2319 }
0x156a   : > { %v2321_v29 = vmul.f32 0.03125, %v2320_v28 }
0x156c   : > { %v2322_v30 = vsub.f32 %v8331_v25, %v2321_v29 }
0x156e   : > { %v2323_v31 = vmul.f32 %v2322_v30, %v2322_v30  ;;  %v2341_v47 = vmul.f32 %v6356_v46, %v2322_v30 }
0x1570   : > { %v2324_v32 = vsel %vm640_vm3, %v2323_v31, 0.0  ;;  %v6378_v31 = vld [vmem:[#allocation10] ss:$0 sm:$0xff] }
0x1571   : > { %2325 = vadd.xlane.f32.xlu1 %v2324_v32 }
0x1582   : > { %2524 = vperm.xlu1 %7379, %v2520_v41  }
0x15fa   : > { %v2326_v37 = vpop.xlane.xlu1 %2325 }
0x15fb   : > { %v2327_v38 = vmul.f32 0.032258064, %v2326_v37  ;;  %v2642_v37 = vld [vmem:[#allocation8 + $0x10] sm:$0xf] }
0x15fd   : > { %7456 = vrsqrt.f32 %v2327_v38  ;;  %vm2330_vm13 = vcmp.eq.f32.partialorder %v2327_v38, inf  ;;  %v2333_v42 = vand.u32 2147483648, %v2327_v38  ;;  %vm2332_vm14 = vcmp.eq.f32.partialorder %v2327_v38, 0.0 }
0x15fe   : > { %v2525_v55 = vpop.permute.xlu1 %2524 }
0x15ff   : > { %vm2526_vm15 = vcmp.eq.s32.totalorder %v2525_v55, %v8041_v12  ;;  %v6366_v12 = vld [vmem:[#allocation7 + $0xe] ss:$0 sm:$0xff] }
0x1600   : > { %v6376_v57 = vsel %vm2526_vm15, 1.0, %v7802_v1 }
0x160a   : > { %v7457_v39 = vpop.eup %7456 }
0x160b   : > { %v2329_v40 = vmul.f32 %v7457_v39, %v2327_v38  ;;  %v6380_v39 = vld [vmem:[#allocation10 + $0x2] ss:$0 sm:$0xff] }
0x160d   : > { %v2331_v43 = vsel %vm2330_vm13, %v2327_v38, %v2329_v40  ;;  %v2776_v38 = vsel %vm818_vm6, %v2642_v37, 0 }
0x160e   : > { %v2334_v44 = vsel %vm2332_vm14, %v2333_v42, %v2331_v43 }
0x160f   : > { %v2335_v45 = vadd.f32 1e-06, %v2334_v44 }
0x1611   : > { %7458 = vrcp.f32 %v2335_v45 }
0x161e   : > { %v7459_v48 = vpop.eup %7458 }
0x161f   : > { %v2342_v51 = vmul.f32 %v7459_v48, %v2341_v47 }
0x1621   : > { %v2347_v52 = vadd.f32 %v6357_v50, %v2342_v51  ;;  %v2643_v51 = vld [vmem:[#allocation8 + $0x14] sm:$0xf] }
0x1623   : > { %v2360_v53 = vpack.c.bf16 %v2347_v52, %v2347_v52 }
0x1625   : > { %6874 = vmatmul.mubr.msk.bf16.vlgmr.msra.gmra.mxu0 %vm640_vm3, %v2360_v53  ;;  %v2889_v53 = vsel %vm818_vm6, %v2643_v51, 0 }
0x1626   : > { %6886 = vmatpush3.msra.mxu0 %v2522_v54  ;;  %6889 = vmatprep.mubr.msk.f32.mxu0 %vm7803_vm0, %v7802_v1 }
0x1627   : > { %6887 = vmatprep.subr.mxu0 %v7802_v1 }
0x1628   : > { %6888 = vmatpush3.msra.mxu0 %v2521_v56 }
0x1629   : > { %6892 = vmatprep.subr.bf16.mxu0 %v7802_v1 }
0x162d   : > { %6890 = vmatmul.mubr.msk.f32.vlgmr.msra.gmra.mxu0 %vm562_vm1, %v6376_v57 }
0x162e   : > { %6896 = vmatprep.mubr.msk.bf16.mxu0 %vm7803_vm0, %v7802_v1  ;;  %6893 = vmatpush3.bf16.msra.mxu0 %v7392_v16 }
0x162f   : > { %6894 = vmatprep.subr.bf16.mxu0 %v7802_v1 }
0x1632   : > { %6895 = vmatpush3.bf16.msra.mxu0 %v7393_v17 }
0x1633   : > { %6906 = vmatprep.subr.bf16.mxu0 %v7802_v1 }
0x16e5   : > { %v2414_v60 = vpop.f32.mrf.mxu0 }
0x16e6   : > { %v2415_v61 = vadd.f32 %v6366_v12, %v2414_v60  ;;  %v547_v12 = vld [vmem:[%s542_s17] sm:$0xff]  ;;  %s7717_s17 = sshll.u32 %s7815_s23, 4  ;;  %s7718_s17 = int_to_ptr.vmem [resolvable:$false] %s7717_s17 }
0x16e7   : > { %v6875_v62 = vpop.f32.mrf.mxu0 }
0x16e8   : > { %v2420_v63 = vmax.f32 %v2415_v61, 0.0 }
0x16e9   : > { %v2417_v0 = vpop.f32.mrf.mxu0 }
0x16ea   : > { %v2421_v10 = vpack.c.bf16 %v2420_v63, %v2420_v63 }
0x16eb   : > { %v6876_v2 = vpop.f32.mrf.mxu0 }
0x16ec   : > { %6882 = vmatmul.mubr.msk.bf16.vlgmr.msra.gmra.mxu1 %vm1511_vm8, %v2421_v10  ;;  %v6285_v10 = vadd.f32 -1.0, %v547_v12 }
0x16ed   : > { %v2598_v3 = vpop.f32.mrf.mxu0  ;;  %6902 = vmatprep.mubr.msk.bf16.mxu1 %vm7803_vm0, %v7802_v1 }
0x16ee   : > { %v2602_v4 = vmul.f32 5.656854, %v2598_v3 }
0x16ef   : > { %v6891_v5 = vpop.f32.mrf.mxu0 }
0x16f0   : > { %v8375_v7 = vadd.f32 %v7556_v6, %v2602_v4  ;;  %v8427_v6 = vmul.f32 1e+09, %v6285_v10 }
0x16f2   : > { %v2606_v19 = vsel %vm640_vm3, %v8375_v7, 0.0 }
0x16f3   : > { %2607 = vadd.xlane.f32.xlu0 %v2606_v19 }
0x177c   : > { %v2608_v8 = vpop.xlane.xlu0 %2607 }
0x177d   : > { %v2609_v9 = vmul.f32 0.03125, %v2608_v8 }
0x177f   : > { %v2610_v13 = vsub.f32 %v8375_v7, %v2609_v9 }
0x1781   : > { %v2611_v14 = vmul.f32 %v2610_v13, %v2610_v13  ;;  %v2629_v32 = vmul.f32 %v6378_v31, %v2610_v13 }
0x1783   : > { %v2612_v15 = vsel %vm640_vm3, %v2611_v14, 0.0 }
0x1784   : > { %2613 = vadd.xlane.f32.xlu1 %v2612_v15 }
0x17ac   : > { %v8383_v18 = vpop.f32.mrf.mxu1 }
0x17ae   : > { %v6883_v20 = vpop.f32.mrf.mxu1 }
0x17b0   : > { %v2478_v49 = vpop.f32.mrf.mxu1 }
0x17b2   : > { %v6884_v21 = vpop.f32.mrf.mxu1 }
0x180d   : > { %v2614_v22 = vpop.xlane.xlu1 %2613 }
0x180e   : > { %v2615_v23 = vmul.f32 0.032258064, %v2614_v22 }
0x1810   : > { %7460 = vrsqrt.f32 %v2615_v23  ;;  %vm2618_vm1 = vcmp.eq.f32.partialorder %v2615_v23, inf  ;;  %v2621_v27 = vand.u32 2147483648, %v2615_v23  ;;  %vm2620_vm2 = vcmp.eq.f32.partialorder %v2615_v23, 0.0 }
0x181d   : > { %v7461_v24 = vpop.eup %7460 }
0x181e   : > { %v2617_v26 = vmul.f32 %v7461_v24, %v2615_v23 }
0x1820   : > { %v2619_v28 = vsel %vm2618_vm1, %v2615_v23, %v2617_v26 }
0x1821   : > { %v2622_v29 = vsel %vm2620_vm2, %v2621_v27, %v2619_v28 }
0x1822   : > { %v2623_v30 = vadd.f32 1e-06, %v2622_v29 }
0x1824   : > { %7462 = vrcp.f32 %v2623_v30 }
0x1831   : > { %v7463_v41 = vpop.eup %7462 }
0x1832   : > { %v2630_v34 = vmul.f32 %v7463_v41, %v2629_v32 }
0x1834   : > { %v2635_v35 = vadd.f32 %v6379_v33, %v2630_v34 }
0x1836   : > { %v2647_v36 = vpack.c.bf16 %v2635_v35, %v2635_v35 }
0x1838   : > { %6897 = vmatmul.mubr.msk.bf16.vlgmr.msra.gmra.mxu0 %vm640_vm3, %v2647_v36 }
0x1839   : > { %6908 = vmatprep.mubr.msk.bf16.mxu0 %vm7803_vm0, %v7802_v1  ;;  %6907 = vmatpush3.bf16.msra.mxu0 %v2776_v38 }
0x183a   : > { %6918 = vmatprep.subr.bf16.mxu0 %v7802_v1 }
0x18f8   : > { %v2701_v40 = vpop.f32.mrf.mxu0 }
0x18f9   : > { %v2702_v42 = vadd.f32 %v6380_v39, %v2701_v40 }
0x18fa   : > { %v6898_v43 = vpop.f32.mrf.mxu0 }
0x18fb   : > { %v8390_v44 = vpack.c.bf16 %v2702_v42, %v2702_v42 }
0x18fc   : > { %v2704_v45 = vpop.f32.mrf.mxu0 }
0x18fd   : > { %2822 = vrot.lane.b32.xlu1 %v8390_v44, %s8970_s27  ;;  %2709 = vrot.lane.b32.xlu0 %v8390_v44, %s8971_s20 }
0x18fe   : > { %v6899_v46 = vpop.f32.mrf.mxu0 }
0x18ff   : > { %v2644_v46 = vld [vmem:[#allocation8 + $0x18] sm:$0xf] }
0x1901   : > { %2820 = vrot.lane.b32.xlu0 %v8390_v44, %s8972_s30 }
0x1905   : > { %2770 = vrot.lane.b32.xlu0 %v8390_v44, %s8973_s28 }
0x1909   : > { %2883 = vrot.lane.b32.xlu0 %v8390_v44, %s8974_s15 }
0x196f   : > { %v2710_v47 = vpop.permute.xlu0 %2709  ;;  %v2823_v52 = vpop.permute.xlu1 %2822 }
0x1970   : > { %v2715_v48 = vsel %vm747_vm7, %v2710_v47, 0  ;;  %v2828_v55 = vsel %vm747_vm7, %v2823_v52, 0 }
0x1971   : > { %6901 = vmatpush3.bf16.xpose.msra.mxu1 %v2715_v48 }
0x1972   : > { %6912 = vmatprep.subr.bf16.mxu1 %v7802_v1 }
0x1973   : > { %v2821_v50 = vpop.permute.xlu0 %2820 }
0x1977   : > { %v2771_v54 = vpop.permute.xlu0 %2770 }
0x1978   : > { %6903 = vmatmul.mubr.msk.bf16.vlgmr.msra.gmra.mxu1 %vm747_vm7, %v8390_v44  ;;  %6909 = vmatmul.mubr.msk.bf16.vlgmr.msra.gmra.mxu0 %vm747_vm7, %v2771_v54 }
0x1979   : > { %6913 = vmatpush3.bf16.xpose.msra.mxu1 %v2828_v55  ;;  %6919 = vmatpush3.bf16.msra.mxu0 %v2889_v53 }
0x197a   : > { %6914 = vmatprep.mubr.msk.bf16.mxu1 %vm7803_vm0, %v7802_v1  ;;  %6920 = vmatprep.mubr.msk.bf16.mxu0 %vm7803_vm0, %v7802_v1 }
0x197b   : > { %6930 = vmatprep.subr.bf16.mxu0 %v7802_v1  ;;  %6924 = vmatprep.subr.bf16.mxu1 %v7802_v1  ;;  %v2884_v56 = vpop.permute.xlu0 %2883 }
0x1980   : > { %6915 = vmatmul.mubr.msk.bf16.vlgmr.msra.gmra.mxu1 %vm747_vm7, %v2821_v50  ;;  %6921 = vmatmul.mubr.msk.bf16.vlgmr.msra.gmra.mxu0 %vm747_vm7, %v2884_v56  ;;  %v3094_v50 = vsel %vm818_vm6, %v2644_v46, 0 }
0x1981   : > { %6926 = vmatprep.mubr.msk.bf16.mxu1 %vm7803_vm0, %v7802_v1  ;;  %6932 = vmatprep.mubr.msk.bf16.mxu0 %vm7803_vm0, %v7802_v1 }
0x1a38   : > { %v2751_v57 = vpop.f32.mrf.mxu1  ;;  %v2812_v58 = vpop.f32.mrf.mxu0 }
0x1a39   : > { %v2819_v59 = vpack.c.bf16 %v2812_v58, %v2812_v58  ;;  %v2757_v22 = vmul.f32 0.35355338, %v2751_v57 }
0x1a3a   : > { %v6904_v60 = vpop.f32.mrf.mxu1  ;;  %v6910_v61 = vpop.f32.mrf.mxu0 }
0x1a3b   : > { %v2983_v62 = vsel %vm818_vm6, %v2819_v59, 0  ;;  %v2758_v23 = vadd.f32 %v2757_v22, %v8427_v6 }
0x1a3c   : > { %v2754_v63 = vpop.f32.mrf.mxu1  ;;  %v2815_v0 = vpop.f32.mrf.mxu0  ;;  %6931 = vmatpush3.bf16.msra.mxu0 %v2983_v62 }
0x1a3d   : > { %6942 = vmatprep.subr.bf16.mxu0 %v7802_v1  ;;  %v2759_v24 = vsel %vm747_vm7, %v2758_v23, -inf }
0x1a3e   : > { %v6905_v2 = vpop.f32.mrf.mxu1  ;;  %v6911_v3 = vpop.f32.mrf.mxu0 }
0x1a40   : > { %v2864_v4 = vpop.f32.mrf.mxu1  ;;  %v2925_v5 = vpop.f32.mrf.mxu0 }
0x1a41   : > { %v2870_v19 = vmul.f32 0.35355338, %v2864_v4  ;;  %v2932_v8 = vpack.c.bf16 %v2925_v5, %v2925_v5 }
0x1a42   : > { %v6916_v9 = vpop.f32.mrf.mxu1  ;;  %v6922_v13 = vpop.f32.mrf.mxu0 }
0x1a43   : > { %v2937_v14 = vsel %vm818_vm6, %v2932_v8, 0  ;;  %v2871_v15 = vadd.f32 %v2870_v19, %v8427_v6 }
0x1a44   : > { %v2867_v16 = vpop.f32.mrf.mxu1  ;;  %v2928_v17 = vpop.f32.mrf.mxu0  ;;  %6925 = vmatpush3.bf16.msra.mxu1 %v2937_v14 }
0x1a45   : > { %v2872_v20 = vsel %vm747_vm7, %v2871_v15, -inf  ;;  %6936 = vmatprep.subr.bf16.mxu1 %v7802_v1 }
0x1a46   : > { %v6923_v49 = vpop.f32.mrf.mxu0  ;;  %2873 = vmax.xlane.f32.xlu0 %v2872_v20  ;;  %v6917_v21 = vpop.f32.mrf.mxu1 }
0x1a5c   : > { %3027 = vrot.lane.b32.xlu0 %v8390_v44, %s8975_s18 }
0x1a7b   : > { %2760 = vmax.xlane.f32.xlu0 %v2759_v24 }
0x1a91   : > { %3088 = vrot.lane.b32.xlu0 %v8390_v44, %s8976_s19 }
0x1a95   : > { %3185 = vrot.lane.b32.xlu0 %v8390_v44, %s8966_s26 }
0x1acf   : > { %v2874_v26 = vpop.xlane.xlu0 %2873 }
0x1ad0   : > { %v2875_v27 = vsub.f32 %v2871_v15, %v2874_v26 }
0x1ad2   : > { %v2876_v28 = vmul.f32 1.442695, %v2875_v27 }
0x1ad3   : > { %v3028_v31 = vpop.permute.xlu0 %3027 }
0x1ad4   : > { %7464 = vpow2.f32 %v2876_v28  ;;  %v3033_v40 = vsel %vm747_vm7, %v3028_v31, 0 }
0x1ae1   : > { %v7465_v29 = vpop.eup %7464 }
0x1ae2   : > { %v2878_v30 = vsel %vm747_vm7, %v7465_v29, 0.0 }
0x1ae3   : > { %2879 = vadd.xlane.f32.xlu1 %v2878_v30 }
0x1af4   : > { %3025 = vrot.lane.b32.xlu1 %v8390_v44, %s8967_s14 }
0x1b04   : > { %v2761_v32 = vpop.xlane.xlu0 %2760 }
0x1b05   : > { %v2762_v41 = vsub.f32 %v2758_v23, %v2761_v32 }
0x1b07   : > { %v2763_v33 = vmul.f32 1.442695, %v2762_v41  ;;  %v2481_v41 = vadd.f32 %v8383_v18, %v8331_v25 }
0x1b08   : > { %v3089_v52 = vpop.permute.xlu0 %3088 }
0x1b09   : > { %7466 = vpow2.f32 %v2763_v33  ;;  %v6373_v33 = vld [vmem:[#allocation7 + $0xf] ss:$0 sm:$0xff] }
0x1b0c   : > { %v3186_v54 = vpop.permute.xlu0 %3185 }
0x1b16   : > { %v7467_v34 = vpop.eup %7466 }
0x1b17   : > { %v2765_v35 = vsel %vm747_vm7, %v7467_v34, 0.0 }
0x1b18   : > { %2766 = vadd.xlane.f32.xlu1 %v2765_v35 }
0x1b29   : > { %3187 = vrot.lane.b32.xlu1 %v8390_v44, %s8968_s16 }
0x1b6c   : > { %v2880_v36 = vpop.xlane.xlu1 %2879 }
0x1b6d   : > { %7468 = vrcp.f32 %v2880_v36  ;;  %v2486_v36 = vadd.f32 %v6373_v33, %v2481_v41  ;;  %v7396_v33 = vld [vmem:[#allocation8 + $0x28] sm:$0xff]  }
0x1b70   : > { %v3026_v42 = vpop.permute.xlu1 %3025 }
0x1b7a   : > { %v7469_v37 = vpop.eup %7468 }
0x1b7b   : > { %v2882_v38 = vmul.f32 %v7469_v37, %v7465_v29  ;;  %v2489_v37 = vsel %vm640_vm3, %v2486_v36, 0.0 }
0x1b7d   : > { %v2931_v39 = vpack.c.bf16 %v2882_v38, %v2882_v38 }
0x1b7f   : > { %6927 = vmatmul.mubr.msk.bf16.vlgmr.msra.gmra.mxu1 %vm747_vm7, %v2931_v39 }
0x1b80   : > { %6937 = vmatpush3.bf16.xpose.msra.mxu1 %v3033_v40  ;;  %6938 = vmatprep.mubr.msk.bf16.mxu1 %vm7803_vm0, %v7802_v1 }
0x1b81   : > { %6948 = vmatprep.subr.bf16.mxu1 %v7802_v1 }
0x1b87   : > { %6939 = vmatmul.mubr.msk.bf16.vlgmr.msra.gmra.mxu1 %vm747_vm7, %v3026_v42 }
0x1b88   : > { %6950 = vmatprep.mubr.msk.bf16.mxu1 %vm7803_vm0, %v7802_v1 }
0x1ba1   : > { %v2767_v43 = vpop.xlane.xlu1 %2766 }
0x1ba2   : > { %7470 = vrcp.f32 %v2767_v43 }
0x1ba5   : > { %v3188_v51 = vpop.permute.xlu1 %3187 }
0x1ba6   : > { %v3193_v53 = vsel %vm747_vm7, %v3188_v51, 0 }
0x1baf   : > { %v7471_v45 = vpop.eup %7470 }
0x1bb0   : > { %v2769_v47 = vmul.f32 %v7471_v45, %v7467_v34 }
0x1bb2   : > { %v2818_v48 = vpack.c.bf16 %v2769_v47, %v2769_v47 }
0x1bb4   : > { %6933 = vmatmul.mubr.msk.bf16.vlgmr.msra.gmra.mxu0 %vm747_vm7, %v2818_v48 }
0x1bb5   : > { %6943 = vmatpush3.bf16.msra.mxu0 %v3094_v50  ;;  %6944 = vmatprep.mubr.msk.bf16.mxu0 %vm7803_vm0, %v7802_v1 }
0x1bb6   : > { %6954 = vmatprep.subr.bf16.mxu0 %v7802_v1 }
0x1bbc   : > { %6945 = vmatmul.mubr.msk.bf16.vlgmr.msra.gmra.mxu0 %vm747_vm7, %v3089_v52 }
0x1bbd   : > { %6955 = vmatpush3.bf16.xpose.msra.mxu0 %v3193_v53  ;;  %6956 = vmatprep.mubr.msk.bf16.mxu0 %vm7803_vm0, %v7802_v1 }
0x1bbe   : > { %6966 = vmatprep.subr.bf16.mxu0 %v7802_v1 }
0x1bc4   : > { %6957 = vmatmul.mubr.msk.bf16.vlgmr.msra.gmra.mxu0 %vm747_vm7, %v3186_v54 }
0x1bc5   : > { %6968 = vmatprep.mubr.msk.bf16.mxu0 %vm7803_vm0, %v7802_v1 }
0x1c3f   : > { %v2973_v55 = vpop.f32.mrf.mxu1 }
0x1c41   : > { %v6928_v56 = vpop.f32.mrf.mxu1 }
0x1c43   : > { %v2976_v57 = vpop.f32.mrf.mxu1 }
0x1c45   : > { %v6929_v58 = vpop.f32.mrf.mxu1 }
0x1c47   : > { %v3069_v59 = vpop.f32.mrf.mxu1 }
0x1c48   : > { %v3075_v12 = vmul.f32 0.35355338, %v3069_v59 }
0x1c49   : > { %v6940_v60 = vpop.f32.mrf.mxu1 }
0x1c4a   : > { %v3076_v61 = vadd.f32 %v3075_v12, %v8427_v6 }
0x1c4b   : > { %v3072_v62 = vpop.f32.mrf.mxu1 }
0x1c4c   : > { %v3077_v63 = vsel %vm747_vm7, %v3076_v61, -inf }
0x1c4d   : > { %3078 = vmax.xlane.f32.xlu1 %v3077_v63  ;;  %v6941_v0 = vpop.f32.mrf.mxu1  ;;  %v6396_v63 = vld [vmem:[#allocation10 + $0x3] ss:$0 sm:$0xff] }
0x1c74   : > { %v3019_v10 = vpop.f32.mrf.mxu0 }
0x1c75   : > { %v3020_v2 = vadd.f32 %v3019_v10, %v2973_v55 }
0x1c76   : > { %v6934_v3 = vpop.f32.mrf.mxu0 }
0x1c78   : > { %v3022_v4 = vpop.f32.mrf.mxu0 }
0x1c7a   : > { %v6935_v5 = vpop.f32.mrf.mxu0 }
0x1c7c   : > { %v3130_v19 = vpop.f32.mrf.mxu0 }
0x1c7d   : > { %v3137_v8 = vpack.c.bf16 %v3130_v19, %v3130_v19 }
0x1c7e   : > { %v6946_v9 = vpop.f32.mrf.mxu0 }
0x1c7f   : > { %v3142_v13 = vsel %vm818_vm6, %v3137_v8, 0 }
0x1c80   : > { %v3133_v14 = vpop.f32.mrf.mxu0  ;;  %6949 = vmatpush3.bf16.msra.mxu1 %v3142_v13  ;;  %v7394_v13 = vld [vmem:[#allocation8 + $0x38] sm:$0xff]  }
0x1c81   : > { %6960 = vmatprep.subr.bf16.mxu1 %v7802_v1  ;;  %v7395_v14 = vld [vmem:[#allocation8 + $0x30] sm:$0xff]  }
0x1c82   : > { %v6947_v15 = vpop.f32.mrf.mxu0 }
0x1c84   : > { %v3229_v16 = vpop.f32.mrf.mxu0 }
0x1c85   : > { %v3235_v17 = vmul.f32 0.35355338, %v3229_v16 }
0x1c86   : > { %v6958_v20 = vpop.f32.mrf.mxu0 }
0x1c87   : > { %v3236_v49 = vadd.f32 %v3235_v17, %v8427_v6 }
0x1c88   : > { %v3232_v21 = vpop.f32.mrf.mxu0 }
0x1c89   : > { %v3237_v22 = vsel %vm747_vm7, %v3236_v49, -inf }
0x1c8a   : > { %v6959_v23 = vpop.f32.mrf.mxu0  ;;  %3238 = vmax.xlane.f32.xlu1 %v3237_v22 }
0x1cd6   : > { %v3079_v24 = vpop.xlane.xlu1 %3078 }
0x1cd7   : > { %v3080_v26 = vsub.f32 %v3076_v61, %v3079_v24 }
0x1cd9   : > { %v3081_v27 = vmul.f32 1.442695, %v3080_v26 }
0x1cdb   : > { %7472 = vpow2.f32 %v3081_v27 }
0x1ce8   : > { %v7473_v28 = vpop.eup %7472 }
0x1ce9   : > { %v3083_v29 = vsel %vm747_vm7, %v7473_v28, 0.0 }
0x1cea   : > { %3084 = vadd.xlane.f32.xlu0 %v3083_v29  ;;  %v6374_v29 = vld [vmem:[#allocation11] ss:$0 sm:$0xff] }
0x1d00   : > { %3248 = vrot.lane.b32.xlu0 %v8390_v44, %s8969_s29  ;;  %v2645_v44 = vld [vmem:[#allocation8 + $0x1c] sm:$0xf] }
0x1d01   : > { %v3254_v43 = vsel %vm818_vm6, %v2645_v44, 0 }
0x1d13   : > { %v3239_v30 = vpop.xlane.xlu1 %3238 }
0x1d14   : > { %v3240_v31 = vsub.f32 %v3236_v49, %v3239_v30 }
0x1d16   : > { %v3241_v32 = vmul.f32 1.442695, %v3240_v31 }
0x1d18   : > { %7474 = vpow2.f32 %v3241_v32  ;;  %v6375_v32 = vld [vmem:[#allocation11 + $0x1] ss:$0 sm:$0xff] }
0x1d25   : > { %v7475_v34 = vpop.eup %7474 }
0x1d26   : > { %v3243_v35 = vsel %vm747_vm7, %v7475_v34, 0.0 }
0x1d27   : > { %3244 = vadd.xlane.f32.xlu1 %v3243_v35  ;;  %v7397_v35 = vld [vmem:[#allocation8 + $0x20] sm:$0xff]  }
0x1d2b   : > { %2490 = vadd.xlane.f32.xlu1 %v2489_v37 }
0x1d73   : > { %v3085_v38 = vpop.xlane.xlu0 %3084 }
0x1d74   : > { %7476 = vrcp.f32 %v3085_v38 }
0x1d77   : > { %v3249_v25 = vpop.permute.xlu0 %3248 }
0x1d81   : > { %v7477_v39 = vpop.eup %7476 }
0x1d82   : > { %v3087_v40 = vmul.f32 %v7477_v39, %v7473_v28 }
0x1d84   : > { %v3136_v42 = vpack.c.bf16 %v3087_v40, %v3087_v40 }
0x1d86   : > { %6951 = vmatmul.mubr.msk.bf16.vlgmr.msra.gmra.mxu1 %vm747_vm7, %v3136_v42 }
0x1d87   : > { %6961 = vmatpush3.bf16.msra.mxu1 %v3254_v43  ;;  %6962 = vmatprep.mubr.msk.bf16.mxu1 %vm7803_vm0, %v7802_v1 }
0x1d88   : > { %6972 = vmatprep.subr.bf16.mxu1 %v7802_v1 }
0x1d8e   : > { %6963 = vmatmul.mubr.msk.bf16.vlgmr.msra.gmra.mxu1 %vm747_vm7, %v3249_v25 }
0x1d8f   : > { %6976 = vmatprep.mubr.msk.bf16.mxu1 %vm7803_vm0, %v7802_v1  ;;  %6973 = vmatpush3.bf16.msra.mxu1 %v7396_v33 }
0x1d90   : > { %6974 = vmatprep.subr.bf16.mxu1 %v7802_v1 }
0x1d93   : > { %6975 = vmatpush3.bf16.msra.mxu1 %v7397_v35 }
0x1d94   : > { %6988 = vmatprep.subr.bf16.mxu1 %v7802_v1 }
0x1db0   : > { %v3245_v18 = vpop.xlane.xlu1 %3244 }
0x1db1   : > { %7478 = vrcp.f32 %v3245_v18  ;;  %v6397_v18 = vld [vmem:[#allocation10 + $0x4] ss:$0 sm:$0xff] }
0x1db4   : > { %v2491_v12 = vpop.xlane.xlu1 %2490 }
0x1db5   : > { %v2492_v60 = vmul.f32 0.03125, %v2491_v12  ;;  %v3396_v12 = vld [vmem:[#allocation8 + $0x40] sm:$0xf] }
0x1db7   : > { %v2493_v10 = vsub.f32 %v2486_v36, %v2492_v60  ;;  %v3588_v60 = vsel %vm818_vm6, %v3396_v12, 0 }
0x1db9   : > { %v2494_v8 = vmul.f32 %v2493_v10, %v2493_v10  ;;  %v2512_v30 = vmul.f32 %v6374_v29, %v2493_v10 }
0x1dbb   : > { %v2495_v9 = vsel %vm640_vm3, %v2494_v8, 0.0 }
0x1dbe   : > { %v7479_v50 = vpop.eup %7478 }
0x1dbf   : > { %v3247_v54 = vmul.f32 %v7479_v50, %v7475_v34 }
0x1dc1   : > { %v3296_v58 = vpack.c.bf16 %v3247_v54, %v3247_v54 }
0x1e46   : > { %v3178_v45 = vpop.f32.mrf.mxu1 }
0x1e47   : > { %v3184_v46 = vadd.f32 %v3178_v45, %v3020_v2 }
0x1e48   : > { %v6952_v47 = vpop.f32.mrf.mxu1 }
0x1e49   : > { %v6398_v47 = vld [vmem:[#allocation10 + $0x5] ss:$0 sm:$0xff] }
0x1e4a   : > { %v3181_v48 = vpop.f32.mrf.mxu1 }
0x1e4c   : > { %v6953_v51 = vpop.f32.mrf.mxu1 }
0x1e4e   : > { %v3290_v52 = vpop.f32.mrf.mxu1 }
0x1e4f   : > { %v3297_v53 = vpack.c.bf16 %v3290_v52, %v3290_v52  ;;  %v6403_v52 = vld [vmem:[#allocation10 + $0x7] ss:$0 sm:$0xff] }
0x1e50   : > { %v6964_v55 = vpop.f32.mrf.mxu1 }
0x1e51   : > { %v3302_v56 = vsel %vm818_vm6, %v3297_v53, 0 }
0x1e52   : > { %v3293_v57 = vpop.f32.mrf.mxu1  ;;  %6967 = vmatpush3.bf16.msra.mxu0 %v3302_v56 }
0x1e53   : > { %6980 = vmatprep.subr.bf16.mxu0 %v7802_v1 }
0x1e54   : > { %v6965_v59 = vpop.f32.mrf.mxu1 }
0x1e55   : > { %6969 = vmatmul.mubr.msk.bf16.vlgmr.msra.gmra.mxu0 %vm747_vm7, %v3296_v58 }
0x1e56   : > { %6984 = vmatprep.mubr.msk.bf16.mxu0 %vm7803_vm0, %v7802_v1  ;;  %6981 = vmatpush3.bf16.msra.mxu0 %v7394_v13 }
0x1e57   : > { %6982 = vmatprep.subr.bf16.mxu0 %v7802_v1 }
0x1e5a   : > { %6983 = vmatpush3.bf16.msra.mxu0 %v7395_v14 }
0x1e5b   : > { %6994 = vmatprep.subr.bf16.mxu0 %v7802_v1 }
0x1f15   : > { %v3338_v61 = vpop.f32.mrf.mxu0 }
0x1f16   : > { %v3344_v62 = vadd.f32 %v3338_v61, %v3184_v46  ;;  %v6399_v61 = vld [vmem:[#allocation10 + $0x6] ss:$0 sm:$0xff] }
0x1f17   : > { %v6970_v0 = vpop.f32.mrf.mxu0 }
0x1f18   : > { %v3345_v2 = vadd.f32 %v3344_v62, %v8375_v7 }
0x1f19   : > { %v3341_v3 = vpop.f32.mrf.mxu0 }
0x1f1a   : > { %v8495_v4 = vadd.f32 %v6396_v63, %v3345_v2 }
0x1f1b   : > { %v6971_v5 = vpop.f32.mrf.mxu0 }
0x1f1c   : > { %v3353_v19 = vsel %vm640_vm3, %v8495_v4, 0.0 }
0x1f1d   : > { %3354 = vadd.xlane.f32.xlu1 %v3353_v19 }
0x1f21   : > { %2496 = vadd.xlane.f32.xlu1 %v2495_v9  ;;  %v3397_v9 = vld [vmem:[#allocation8 + $0x44] sm:$0xf] }
0x1f22   : > { %v3702_v13 = vsel %vm818_vm6, %v3397_v9, 0 }
0x1fa6   : > { %v3355_v7 = vpop.xlane.xlu1 %3354 }
0x1fa7   : > { %v3356_v15 = vmul.f32 0.03125, %v3355_v7 }
0x1fa9   : > { %v3357_v16 = vsub.f32 %v8495_v4, %v3356_v15 }
0x1faa   : > { %v2497_v17 = vpop.xlane.xlu1 %2496 }
0x1fab   : > { %v2498_v20 = vmul.f32 0.032258064, %v2497_v17  ;;  %v3358_v49 = vmul.f32 %v3357_v16, %v3357_v16  ;;  %v3376_v45 = vmul.f32 %v6397_v18, %v3357_v16 }
0x1fad   : > { %7480 = vrsqrt.f32 %v2498_v20  ;;  %v3359_v21 = vsel %vm640_vm3, %v3358_v49, 0.0  ;;  %vm2501_vm4 = vcmp.eq.f32.partialorder %v2498_v20, inf  ;;  %v2504_v24 = vand.u32 2147483648, %v2498_v20 }
0x1fae   : > { %3360 = vadd.xlane.f32.xlu0 %v3359_v21  ;;  %vm2503_vm5 = vcmp.eq.f32.partialorder %v2498_v20, 0.0 }
0x1fba   : > { %v7481_v22 = vpop.eup %7480 }
0x1fbb   : > { %v2500_v23 = vmul.f32 %v7481_v22, %v2498_v20 }
0x1fbd   : > { %v2502_v26 = vsel %vm2501_vm4, %v2498_v20, %v2500_v23 }
0x1fbe   : > { %v2505_v27 = vsel %vm2503_vm5, %v2504_v24, %v2502_v26 }
0x1fbf   : > { %v2506_v28 = vadd.f32 1e-06, %v2505_v27 }
0x1fc1   : > { %7482 = vrcp.f32 %v2506_v28 }
0x1fce   : > { %v7483_v31 = vpop.eup %7482 }
0x1fcf   : > { %v2513_v41 = vmul.f32 %v7483_v31, %v2512_v30 }
0x1fd1   : > { %v2518_v34 = vadd.f32 %v6375_v32, %v2513_v41 }
0x1fd3   : > { %v8505_v36 = vpack.c.bf16 %v2518_v34, %v2518_v34 }
0x1fd5   : > { %6985 = vmatmul.mubr.msk.bf16.vlgmr.msra.gmra.mxu0 %vm640_vm3, %v8505_v36 }
0x1fd6   : > { %6996 = vmatprep.mubr.msk.bf16.mxu0 %vm7803_vm0, %v7802_v1  ;;  %6995 = vmatpush3.bf16.msra.mxu0 %v3588_v60 }
0x1fd7   : > { %7006 = vmatprep.subr.bf16.mxu0 %v7802_v1 }
0x2037   : > { %v3361_v37 = vpop.xlane.xlu0 %3360 }
0x2038   : > { %v3362_v38 = vmul.f32 0.032258064, %v3361_v37 }
0x203a   : > { %7484 = vrsqrt.f32 %v3362_v38  ;;  %vm3365_vm9 = vcmp.eq.f32.partialorder %v3362_v38, inf  ;;  %v3368_v40 = vand.u32 2147483648, %v3362_v38  ;;  %vm3367_vm10 = vcmp.eq.f32.partialorder %v3362_v38, 0.0 }
0x2047   : > { %v7485_v39 = vpop.eup %7484 }
0x2048   : > { %v3364_v44 = vmul.f32 %v7485_v39, %v3362_v38 }
0x204a   : > { %v3366_v42 = vsel %vm3365_vm9, %v3362_v38, %v3364_v44 }
0x204b   : > { %v3369_v43 = vsel %vm3367_vm10, %v3368_v40, %v3366_v42 }
0x204c   : > { %v3370_v25 = vadd.f32 1e-06, %v3369_v43 }
0x204e   : > { %7486 = vrcp.f32 %v3370_v25 }
0x205b   : > { %v7487_v46 = vpop.eup %7486 }
0x205c   : > { %v3377_v48 = vmul.f32 %v7487_v46, %v3376_v45 }
0x205e   : > { %v3382_v50 = vadd.f32 %v6398_v47, %v3377_v48 }
0x2060   : > { %v3401_v51 = vpack.c.bf16 %v3382_v50, %v3382_v50 }
0x2062   : > { %6977 = vmatmul.mubr.msk.bf16.vlgmr.msra.gmra.mxu1 %vm640_vm3, %v3401_v51 }
0x2063   : > { %6990 = vmatprep.mubr.msk.bf16.mxu1 %vm7803_vm0, %v7802_v1 }
0x2095   : > { %v3514_v53 = vpop.f32.mrf.mxu0 }
0x2096   : > { %v3515_v54 = vadd.f32 %v6403_v52, %v3514_v53 }
0x2097   : > { %v6986_v55 = vpop.f32.mrf.mxu0 }
0x2098   : > { %v8515_v56 = vpack.c.bf16 %v3515_v54, %v3515_v54 }
0x2099   : > { %v3517_v57 = vpop.f32.mrf.mxu0 }
0x209a   : > { %3635 = vrot.lane.b32.xlu1 %v8515_v56, %s8972_s30  ;;  %v3526_v58 = vsel %vm747_vm7, %v8515_v56, 0 }
0x209b   : > { %v6987_v59 = vpop.f32.mrf.mxu0  ;;  %6989 = vmatpush3.bf16.xpose.msra.mxu1 %v3526_v58 }
0x209c   : > { %7000 = vmatprep.subr.bf16.mxu1 %v7802_v1 }
0x210c   : > { %v3636_v0 = vpop.permute.xlu1 %3635 }
0x210d   : > { %v3641_v5 = vsel %vm747_vm7, %v3636_v0, 0 }
0x2122   : > { %v3455_v62 = vpop.f32.mrf.mxu1 }
0x2123   : > { %v3456_v63 = vadd.f32 %v6399_v61, %v3455_v62 }
0x2124   : > { %v6978_v10 = vpop.f32.mrf.mxu1 }
0x2125   : > { %v8524_v2 = vpack.c.bf16 %v3456_v63, %v3456_v63 }
0x2126   : > { %v3458_v3 = vpop.f32.mrf.mxu1 }
0x2127   : > { %3633 = vrot.lane.b32.xlu1 %v8524_v2, %s8972_s30  ;;  %6991 = vmatmul.mubr.msk.bf16.vlgmr.msra.gmra.mxu1 %vm747_vm7, %v8524_v2 }
0x2128   : > { %7001 = vmatpush3.bf16.xpose.msra.mxu1 %v3641_v5  ;;  %v6979_v19 = vpop.f32.mrf.mxu1  ;;  %7002 = vmatprep.mubr.msk.bf16.mxu1 %vm7803_vm0, %v7802_v1 }
0x2129   : > { %7012 = vmatprep.subr.bf16.mxu1 %v7802_v1 }
0x212b   : > { %3582 = vrot.lane.b32.xlu1 %v8515_v56, %s8971_s20 }
0x212f   : > { %3696 = vrot.lane.b32.xlu1 %v8515_v56, %s8970_s27 }
0x2199   : > { %v3634_v8 = vpop.permute.xlu1 %3633 }
0x219a   : > { %7003 = vmatmul.mubr.msk.bf16.vlgmr.msra.gmra.mxu1 %vm747_vm7, %v3634_v8 }
0x219b   : > { %7014 = vmatprep.mubr.msk.bf16.mxu1 %vm7803_vm0, %v7802_v1 }
0x219d   : > { %v3583_v14 = vpop.permute.xlu1 %3582 }
0x219e   : > { %6997 = vmatmul.mubr.msk.bf16.vlgmr.msra.gmra.mxu0 %vm747_vm7, %v3583_v14 }
0x219f   : > { %7007 = vmatpush3.bf16.msra.mxu0 %v3702_v13  ;;  %7008 = vmatprep.mubr.msk.bf16.mxu0 %vm7803_vm0, %v7802_v1 }
0x21a0   : > { %7018 = vmatprep.subr.bf16.mxu0 %v7802_v1 }
0x21a1   : > { %v3697_v7 = vpop.permute.xlu1 %3696 }
0x21a6   : > { %7009 = vmatmul.mubr.msk.bf16.vlgmr.msra.gmra.mxu0 %vm747_vm7, %v3697_v7  ;;  %v3398_v7 = vld [vmem:[#allocation8 + $0x48] sm:$0xf] }
0x21a7   : > { %7020 = vmatprep.mubr.msk.bf16.mxu0 %vm7803_vm0, %v7802_v1 }
0x21e7   : > { %v3562_v15 = vpop.f32.mrf.mxu1 }
0x21e8   : > { %v3568_v18 = vmul.f32 0.35355338, %v3562_v15 }
0x21e9   : > { %v6992_v16 = vpop.f32.mrf.mxu1 }
0x21ea   : > { %v3569_v45 = vadd.f32 %v3568_v18, %v8038_v11  ;;  %v3907_v16 = vsel %vm818_vm6, %v3398_v7, 0 }
0x21eb   : > { %v3565_v17 = vpop.f32.mrf.mxu1 }
0x21ec   : > { %v3570_v46 = vsel %vm747_vm7, %v3569_v45, -inf }
0x21ed   : > { %v6993_v20 = vpop.f32.mrf.mxu1 }
0x225a   : > { %v3677_v49 = vpop.f32.mrf.mxu1 }
0x225b   : > { %v3683_v21 = vmul.f32 0.35355338, %v3677_v49 }
0x225c   : > { %v7004_v22 = vpop.f32.mrf.mxu1 }
0x225d   : > { %v3684_v23 = vadd.f32 %v3683_v21, %v8038_v11 }
0x225e   : > { %v3624_v24 = vpop.f32.mrf.mxu0  ;;  %v3680_v26 = vpop.f32.mrf.mxu1 }
0x225f   : > { %v3631_v27 = vpack.c.bf16 %v3624_v24, %v3624_v24  ;;  %v3685_v28 = vsel %vm747_vm7, %v3684_v23, -inf }
0x2260   : > { %v6998_v29 = vpop.f32.mrf.mxu0  ;;  %3686 = vmax.xlane.f32.xlu1 %v3685_v28  ;;  %v7005_v30 = vpop.f32.mrf.mxu1 }
0x2261   : > { %v3796_v31 = vsel %vm818_vm6, %v3631_v27, 0 }
0x2262   : > { %v3627_v32 = vpop.f32.mrf.mxu0  ;;  %7019 = vmatpush3.bf16.msra.mxu0 %v3796_v31 }
0x2263   : > { %7030 = vmatprep.subr.bf16.mxu0 %v7802_v1 }
0x2264   : > { %v6999_v41 = vpop.f32.mrf.mxu0 }
0x2266   : > { %v3738_v33 = vpop.f32.mrf.mxu0 }
0x2267   : > { %v3745_v34 = vpack.c.bf16 %v3738_v33, %v3738_v33 }
0x2268   : > { %v7010_v35 = vpop.f32.mrf.mxu0 }
0x2269   : > { %v3750_v37 = vsel %vm818_vm6, %v3745_v34, 0 }
0x226a   : > { %v3741_v38 = vpop.f32.mrf.mxu0  ;;  %7013 = vmatpush3.bf16.msra.mxu1 %v3750_v37 }
0x226b   : > { %7024 = vmatprep.subr.bf16.mxu1 %v7802_v1 }
0x226c   : > { %v7011_v39 = vpop.f32.mrf.mxu0 }
0x22e9   : > { %v3687_v44 = vpop.xlane.xlu1 %3686 }
0x22ea   : > { %v3688_v40 = vsub.f32 %v3684_v23, %v3687_v44 }
0x22ec   : > { %v3689_v42 = vmul.f32 1.442695, %v3688_v40 }
0x22ee   : > { %7488 = vpow2.f32 %v3689_v42 }
0x22fb   : > { %v7489_v43 = vpop.eup %7488 }
0x22fc   : > { %v3691_v25 = vsel %vm747_vm7, %v7489_v43, 0.0 }
0x22fd   : > { %3692 = vadd.xlane.f32.xlu0 %v3691_v25 }
0x2313   : > { %3840 = vrot.lane.b32.xlu0 %v8515_v56, %s8967_s14 }
0x2317   : > { %3838 = vrot.lane.b32.xlu0 %v8524_v2, %s8967_s14 }
0x2336   : > { %3571 = vmax.xlane.f32.xlu0 %v3570_v46 }
0x2386   : > { %v3693_v47 = vpop.xlane.xlu0 %3692 }
0x2387   : > { %7490 = vrcp.f32 %v3693_v47 }
0x238a   : > { %v3841_v51 = vpop.permute.xlu0 %3840 }
0x238b   : > { %v3846_v53 = vsel %vm747_vm7, %v3841_v51, 0 }
0x238e   : > { %v3839_v54 = vpop.permute.xlu0 %3838 }
0x2394   : > { %v7491_v48 = vpop.eup %7490 }
0x2395   : > { %v3695_v50 = vmul.f32 %v7491_v48, %v7489_v43 }
0x2397   : > { %v3744_v52 = vpack.c.bf16 %v3695_v50, %v3695_v50 }
0x2399   : > { %7015 = vmatmul.mubr.msk.bf16.vlgmr.msra.gmra.mxu1 %vm747_vm7, %v3744_v52 }
0x239a   : > { %7025 = vmatpush3.bf16.xpose.msra.mxu1 %v3846_v53  ;;  %7026 = vmatprep.mubr.msk.bf16.mxu1 %vm7803_vm0, %v7802_v1 }
0x239b   : > { %7036 = vmatprep.subr.bf16.mxu1 %v7802_v1 }
0x23a1   : > { %7027 = vmatmul.mubr.msk.bf16.vlgmr.msra.gmra.mxu1 %vm747_vm7, %v3839_v54 }
0x23a2   : > { %7038 = vmatprep.mubr.msk.bf16.mxu1 %vm7803_vm0, %v7802_v1 }
0x23bf   : > { %v3572_v55 = vpop.xlane.xlu0 %3571 }
0x23c0   : > { %v3573_v57 = vsub.f32 %v3569_v45, %v3572_v55  ;;  %v3399_v45 = vld [vmem:[#allocation8 + $0x4c] sm:$0xf] }
0x23c1   : > { %v4067_v48 = vsel %vm818_vm6, %v3399_v45, 0 }
0x23c2   : > { %v3574_v58 = vmul.f32 1.442695, %v3573_v57 }
0x23c4   : > { %7492 = vpow2.f32 %v3574_v58 }
0x23d1   : > { %v7493_v59 = vpop.eup %7492 }
0x23d2   : > { %v3576_v12 = vsel %vm747_vm7, %v7493_v59, 0.0 }
0x23d3   : > { %3577 = vadd.xlane.f32.xlu1 %v3576_v12 }
0x23e4   : > { %3901 = vrot.lane.b32.xlu1 %v8515_v56, %s8975_s18 }
0x23e8   : > { %4000 = vrot.lane.b32.xlu1 %v8515_v56, %s8966_s26 }
0x23ec   : > { %3998 = vrot.lane.b32.xlu1 %v8524_v2, %s8966_s26 }
0x2459   : > { %v8577_v60 = vpop.f32.mrf.mxu1 }
0x245b   : > { %v7016_v61 = vpop.f32.mrf.mxu1 }
0x245c   : > { %v3578_v62 = vpop.xlane.xlu1 %3577 }
0x245d   : > { %7494 = vrcp.f32 %v3578_v62  ;;  %v3789_v63 = vpop.f32.mrf.mxu1 }
0x245f   : > { %v7017_v0 = vpop.f32.mrf.mxu1 }
0x2460   : > { %v3902_v17 = vpop.permute.xlu1 %3901 }
0x2461   : > { %v3882_v10 = vpop.f32.mrf.mxu1 }
0x2462   : > { %v3888_v3 = vmul.f32 0.35355338, %v3882_v10 }
0x2463   : > { %v7028_v5 = vpop.f32.mrf.mxu1 }
0x2464   : > { %v3889_v19 = vadd.f32 %v3888_v3, %v8038_v11  ;;  %v4001_v20 = vpop.permute.xlu1 %4000 }
0x2465   : > { %v3885_v8 = vpop.f32.mrf.mxu1  ;;  %v4006_v49 = vsel %vm747_vm7, %v4001_v20, 0 }
0x2466   : > { %v3890_v9 = vsel %vm747_vm7, %v3889_v19, -inf }
0x2467   : > { %3891 = vmax.xlane.f32.xlu0 %v3890_v9  ;;  %v7029_v13 = vpop.f32.mrf.mxu1 }
0x2468   : > { %v3999_v21 = vpop.permute.xlu1 %3998 }
0x246a   : > { %v7495_v14 = vpop.eup %7494 }
0x246b   : > { %v3580_v2 = vmul.f32 %v7495_v14, %v7493_v59 }
0x246d   : > { %v3630_v15 = vpack.c.bf16 %v3580_v2, %v3580_v2  ;;  %v6419_v2 = vld [vmem:[#allocation10 + $0x8] ss:$0 sm:$0xff] }
0x246f   : > { %7021 = vmatmul.mubr.msk.bf16.vlgmr.msra.gmra.mxu0 %vm747_vm7, %v3630_v15 }
0x2470   : > { %7031 = vmatpush3.bf16.msra.mxu0 %v3907_v16  ;;  %7032 = vmatprep.mubr.msk.bf16.mxu0 %vm7803_vm0, %v7802_v1 }
0x2471   : > { %7042 = vmatprep.subr.bf16.mxu0 %v7802_v1 }
0x2477   : > { %7033 = vmatmul.mubr.msk.bf16.vlgmr.msra.gmra.mxu0 %vm747_vm7, %v3902_v17 }
0x2478   : > { %7043 = vmatpush3.bf16.xpose.msra.mxu0 %v4006_v49  ;;  %7044 = vmatprep.mubr.msk.bf16.mxu0 %vm7803_vm0, %v7802_v1 }
0x2479   : > { %7054 = vmatprep.subr.bf16.mxu0 %v7802_v1 }
0x247d   : > { %4061 = vrot.lane.b32.xlu0 %v8515_v56, %s8968_s16 }
0x247f   : > { %7045 = vmatmul.mubr.msk.bf16.vlgmr.msra.gmra.mxu0 %vm747_vm7, %v3999_v21 }
0x2480   : > { %7056 = vmatprep.mubr.msk.bf16.mxu0 %vm7803_vm0, %v7802_v1 }
0x24f0   : > { %v3892_v22 = vpop.xlane.xlu0 %3891 }
0x24f1   : > { %v3893_v23 = vsub.f32 %v3889_v19, %v3892_v22 }
0x24f3   : > { %v3894_v24 = vmul.f32 1.442695, %v3893_v23 }
0x24f4   : > { %v4062_v50 = vpop.permute.xlu0 %4061 }
0x24f5   : > { %7496 = vpow2.f32 %v3894_v24 }
0x2502   : > { %v7497_v26 = vpop.eup %7496 }
0x2503   : > { %v3896_v27 = vsel %vm747_vm7, %v7497_v26, 0.0 }
0x2504   : > { %3897 = vadd.xlane.f32.xlu1 %v3896_v27 }
0x252f   : > { %v3832_v28 = vpop.f32.mrf.mxu0 }
0x2530   : > { %v3833_v57 = vadd.f32 %v3832_v28, %v8577_v60  ;;  %v7398_v28 = vld [vmem:[#allocation8 + $0x58] sm:$0xff]  }
0x2531   : > { %v7022_v29 = vpop.f32.mrf.mxu0 }
0x2532   : > { %v7399_v29 = vld [vmem:[#allocation8 + $0x50] sm:$0xff]  }
0x2533   : > { %v3835_v30 = vpop.f32.mrf.mxu0 }
0x2535   : > { %v7023_v31 = vpop.f32.mrf.mxu0 }
0x2537   : > { %v3943_v32 = vpop.f32.mrf.mxu0 }
0x2538   : > { %v3950_v56 = vpack.c.bf16 %v3943_v32, %v3943_v32 }
0x2539   : > { %v7034_v41 = vpop.f32.mrf.mxu0 }
0x253a   : > { %v3955_v33 = vsel %vm818_vm6, %v3950_v56, 0 }
0x253b   : > { %v3946_v34 = vpop.f32.mrf.mxu0  ;;  %7037 = vmatpush3.bf16.msra.mxu1 %v3955_v33 }
0x253c   : > { %7048 = vmatprep.subr.bf16.mxu1 %v7802_v1 }
0x253d   : > { %v7035_v35 = vpop.f32.mrf.mxu0 }
0x253f   : > { %v4042_v37 = vpop.f32.mrf.mxu0 }
0x2540   : > { %v4048_v38 = vmul.f32 0.35355338, %v4042_v37 }
0x2541   : > { %v7046_v39 = vpop.f32.mrf.mxu0 }
0x2542   : > { %v4049_v44 = vadd.f32 %v4048_v38, %v8038_v11  ;;  %v6420_v38 = vld [vmem:[#allocation10 + $0x9] ss:$0 sm:$0xff] }
0x2543   : > { %v4045_v40 = vpop.f32.mrf.mxu0 }
0x2544   : > { %v4050_v42 = vsel %vm747_vm7, %v4049_v44, -inf  ;;  %v6421_v40 = vld [vmem:[#allocation10 + $0xa] ss:$0 sm:$0xff] }
0x2545   : > { %v7047_v43 = vpop.f32.mrf.mxu0  ;;  %4051 = vmax.xlane.f32.xlu0 %v4050_v42 }
0x258d   : > { %v3898_v25 = vpop.xlane.xlu1 %3897 }
0x258e   : > { %7498 = vrcp.f32 %v3898_v25 }
0x259b   : > { %v7499_v18 = vpop.eup %7498 }
0x259c   : > { %v3900_v46 = vmul.f32 %v7499_v18, %v7497_v26  ;;  %v7401_v18 = vld [vmem:[#allocation8 + $0x60] sm:$0xff]  }
0x259d   : > { %v4284_v45 = vsel %vm1511_vm8, %v7401_v18, 0 }
0x259e   : > { %v3949_v47 = vpack.c.bf16 %v3900_v46, %v3900_v46  ;;  %v6422_v46 = vld [vmem:[#allocation10 + $0xb] ss:$0 sm:$0xff] }
0x25a0   : > { %7039 = vmatmul.mubr.msk.bf16.vlgmr.msra.gmra.mxu1 %vm747_vm7, %v3949_v47 }
0x25a1   : > { %7049 = vmatpush3.bf16.msra.mxu1 %v4067_v48  ;;  %7050 = vmatprep.mubr.msk.bf16.mxu1 %vm7803_vm0, %v7802_v1 }
0x25a2   : > { %7060 = vmatprep.subr.bf16.mxu1 %v7802_v1 }
0x25a8   : > { %7051 = vmatmul.mubr.msk.bf16.vlgmr.msra.gmra.mxu1 %vm747_vm7, %v4062_v50 }
0x25a9   : > { %7064 = vmatprep.mubr.msk.bf16.mxu1 %vm7803_vm0, %v7802_v1  ;;  %7061 = vmatpush3.bf16.msra.mxu1 %v7398_v28 }
0x25aa   : > { %7062 = vmatprep.subr.bf16.mxu1 %v7802_v1 }
0x25ad   : > { %7063 = vmatpush3.bf16.msra.mxu1 %v7399_v29  ;;  %v6432_v29 = vld [vmem:[#allocation10 + $0x12] ss:$0 sm:$0xff] }
0x25ae   : > { %7076 = vmatprep.subr.bf16.mxu1 %v7802_v1 }
0x25ce   : > { %v4052_v51 = vpop.xlane.xlu0 %4051 }
0x25cf   : > { %v4053_v52 = vsub.f32 %v4049_v44, %v4052_v51 }
0x25d1   : > { %v4054_v53 = vmul.f32 1.442695, %v4053_v52 }
0x25d3   : > { %7500 = vpow2.f32 %v4054_v53 }
0x25e0   : > { %v7501_v54 = vpop.eup %7500 }
0x25e1   : > { %v4056_v55 = vsel %vm747_vm7, %v7501_v54, 0.0 }
0x25e2   : > { %4057 = vadd.xlane.f32.xlu1 %v4056_v55  ;;  %v6429_v55 = vld [vmem:[#allocation10 + $0xc] ss:$0 sm:$0xff] }
0x2660   : > { %v3991_v58 = vpop.f32.mrf.mxu1 }
0x2661   : > { %v3997_v59 = vadd.f32 %v3991_v58, %v3833_v57 }
0x2662   : > { %v7040_v12 = vpop.f32.mrf.mxu1 }
0x2664   : > { %v3994_v61 = vpop.f32.mrf.mxu1 }
0x2666   : > { %v7041_v62 = vpop.f32.mrf.mxu1 }
0x2668   : > { %v4103_v63 = vpop.f32.mrf.mxu1 }
0x2669   : > { %v4110_v0 = vpack.c.bf16 %v4103_v63, %v4103_v63 }
0x266a   : > { %v7052_v10 = vpop.f32.mrf.mxu1 }
0x266b   : > { %v4115_v3 = vsel %vm818_vm6, %v4110_v0, 0  ;;  %v4058_v5 = vpop.xlane.xlu1 %4057 }
0x266c   : > { %7502 = vrcp.f32 %v4058_v5  ;;  %v4106_v19 = vpop.f32.mrf.mxu1  ;;  %7055 = vmatpush3.bf16.msra.mxu0 %v4115_v3 }
0x266d   : > { %7068 = vmatprep.subr.bf16.mxu0 %v7802_v1 }
0x266e   : > { %v7053_v8 = vpop.f32.mrf.mxu1 }
0x266f   : > { %v7402_v8 = vld [vmem:[#allocation8 + $0x78] sm:$0xff]  }
0x2679   : > { %v7503_v9 = vpop.eup %7502 }
0x267a   : > { %v4060_v13 = vmul.f32 %v7503_v9, %v7501_v54  ;;  %v7403_v9 = vld [vmem:[#allocation8 + $0x70] sm:$0xff]  }
0x267c   : > { %v4109_v60 = vpack.c.bf16 %v4060_v13, %v4060_v13 }
0x267e   : > { %7057 = vmatmul.mubr.msk.bf16.vlgmr.msra.gmra.mxu0 %vm747_vm7, %v4109_v60 }
0x267f   : > { %7072 = vmatprep.mubr.msk.bf16.mxu0 %vm7803_vm0, %v7802_v1 }
0x273e   : > { %v4151_v14 = vpop.f32.mrf.mxu0 }
0x273f   : > { %v4157_v7 = vadd.f32 %v4151_v14, %v3997_v59 }
0x2740   : > { %v7058_v15 = vpop.f32.mrf.mxu0 }
0x2741   : > { %v4158_v16 = vadd.f32 %v4157_v7, %v8495_v4  ;;  %v7400_v4 = vld [vmem:[#allocation8 + $0x68] sm:$0xff]  }
0x2742   : > { %v4154_v17 = vpop.f32.mrf.mxu0  ;;  %v4287_v30 = vsel %vm1511_vm8, %v7400_v4, 0 }
0x2743   : > { %v4163_v20 = vadd.f32 %v6419_v2, %v4158_v16  ;;  %7069 = vmatpush3.bf16.xpose.msra.mxu0 %v4287_v30 }
0x2744   : > { %v7059_v49 = vpop.f32.mrf.mxu0  ;;  %7070 = vmatprep.subr.bf16.mxu0 %v7802_v1 }
0x2745   : > { %v4166_v21 = vsel %vm640_vm3, %v4163_v20, 0.0 }
0x2746   : > { %4167 = vadd.xlane.f32.xlu1 %v4166_v21 }
0x274b   : > { %7071 = vmatpush3.bf16.xpose.msra.mxu0 %v4284_v45 }
0x274c   : > { %7090 = vmatprep.subr.bf16.mxu0 %v7802_v1 }
0x27cf   : > { %v4168_v22 = vpop.xlane.xlu1 %4167 }
0x27d0   : > { %v4169_v23 = vmul.f32 0.03125, %v4168_v22  ;;  %v6431_v22 = vld [vmem:[#allocation10 + $0x11] ss:$0 sm:$0xff] }
0x27d2   : > { %v4170_v24 = vsub.f32 %v4163_v20, %v4169_v23 }
0x27d4   : > { %v4171_v26 = vmul.f32 %v4170_v24, %v4170_v24  ;;  %v4189_v39 = vmul.f32 %v6420_v38, %v4170_v24 }
0x27d6   : > { %v4172_v27 = vsel %vm640_vm3, %v4171_v26, 0.0 }
0x27d7   : > { %4173 = vadd.xlane.f32.xlu1 %v4172_v27  ;;  %v4375_v27 = vld [vmem:[#allocation8 + $0x80] sm:$0xf] }
0x27d8   : > { %v4509_v28 = vsel %vm818_vm6, %v4375_v27, 0 }
0x2860   : > { %v4174_v31 = vpop.xlane.xlu1 %4173 }
0x2861   : > { %v4175_v32 = vmul.f32 0.032258064, %v4174_v31 }
0x2863   : > { %7504 = vrsqrt.f32 %v4175_v32  ;;  %vm4178_vm11 = vcmp.eq.f32.partialorder %v4175_v32, inf  ;;  %v4181_v33 = vand.u32 2147483648, %v4175_v32  ;;  %vm4180_vm12 = vcmp.eq.f32.partialorder %v4175_v32, 0.0 }
0x2870   : > { %v7505_v56 = vpop.eup %7504 }
0x2871   : > { %v4177_v41 = vmul.f32 %v7505_v56, %v4175_v32 }
0x2873   : > { %v4179_v34 = vsel %vm4178_vm11, %v4175_v32, %v4177_v41 }
0x2874   : > { %v4182_v35 = vsel %vm4180_vm12, %v4181_v33, %v4179_v34 }
0x2875   : > { %v4183_v37 = vadd.f32 1e-06, %v4182_v35  ;;  %v4376_v35 = vld [vmem:[#allocation8 + $0x84] sm:$0xf] }
0x2876   : > { %v4622_v38 = vsel %vm818_vm6, %v4376_v35, 0 }
0x2877   : > { %7506 = vrcp.f32 %v4183_v37 }
0x2884   : > { %v7507_v44 = vpop.eup %7506 }
0x2885   : > { %v4190_v42 = vmul.f32 %v7507_v44, %v4189_v39 }
0x2887   : > { %v4195_v43 = vadd.f32 %v6421_v40, %v4190_v42 }
0x2889   : > { %v4208_v25 = vpack.c.bf16 %v4195_v43, %v4195_v43 }
0x288b   : > { %7065 = vmatmul.mubr.msk.bf16.vlgmr.msra.gmra.mxu1 %vm640_vm3, %v4208_v25 }
0x288c   : > { %7080 = vmatprep.mubr.msk.bf16.mxu1 %vm7803_vm0, %v7802_v1  ;;  %7077 = vmatpush3.bf16.msra.mxu1 %v7402_v8 }
0x288d   : > { %7078 = vmatprep.subr.bf16.mxu1 %v7802_v1 }
0x2890   : > { %7079 = vmatpush3.bf16.msra.mxu1 %v7403_v9 }
0x2891   : > { %7084 = vmatprep.subr.bf16.mxu1 %v7802_v1 }
0x294b   : > { %v4262_v47 = vpop.f32.mrf.mxu1 }
0x294c   : > { %v4263_v48 = vadd.f32 %v6422_v46, %v4262_v47 }
0x294d   : > { %v7066_v50 = vpop.f32.mrf.mxu1 }
0x294e   : > { %v4268_v51 = vmax.f32 %v4263_v48, 0.0 }
0x294f   : > { %v4265_v52 = vpop.f32.mrf.mxu1 }
0x2950   : > { %v4269_v53 = vpack.c.bf16 %v4268_v51, %v4268_v51 }
0x2951   : > { %v7067_v54 = vpop.f32.mrf.mxu1 }
0x2952   : > { %7073 = vmatmul.mubr.msk.bf16.vlgmr.msra.gmra.mxu0 %vm1511_vm8, %v4269_v53 }
0x2953   : > { %7092 = vmatprep.mubr.msk.bf16.mxu0 %vm7803_vm0, %v7802_v1  ;;  %7091 = vmatpush3.bf16.msra.mxu0 %v4509_v28 }
0x2954   : > { %7102 = vmatprep.subr.bf16.mxu0 %v7802_v1 }
0x2a12   : > { %v4323_v57 = vpop.f32.mrf.mxu0 }
0x2a13   : > { %v4329_v58 = vadd.f32 %v4323_v57, %v4163_v20  ;;  %v6430_v20 = vld [vmem:[#allocation10 + $0x10] ss:$0 sm:$0xff] }
0x2a14   : > { %v7074_v59 = vpop.f32.mrf.mxu0 }
0x2a15   : > { %v8631_v12 = vadd.f32 %v6429_v55, %v4329_v58 }
0x2a16   : > { %v4326_v61 = vpop.f32.mrf.mxu0 }
0x2a17   : > { %v4338_v62 = vsel %vm640_vm3, %v8631_v12, 0.0 }
0x2a18   : > { %4339 = vadd.xlane.f32.xlu1 %v4338_v62  ;;  %v7075_v63 = vpop.f32.mrf.mxu0 }
0x2aa1   : > { %v4340_v0 = vpop.xlane.xlu1 %4339 }
0x2aa2   : > { %v4341_v10 = vmul.f32 0.03125, %v4340_v0 }
0x2aa4   : > { %v4342_v3 = vsub.f32 %v8631_v12, %v4341_v10 }
0x2aa6   : > { %v4343_v5 = vmul.f32 %v4342_v3, %v4342_v3  ;;  %v4361_v49 = vmul.f32 %v6430_v20, %v4342_v3 }
0x2aa8   : > { %v4344_v19 = vsel %vm640_vm3, %v4343_v5, 0.0 }
0x2aa9   : > { %4345 = vadd.xlane.f32.xlu1 %v4344_v19 }
0x2b32   : > { %v4346_v13 = vpop.xlane.xlu1 %4345 }
0x2b33   : > { %v4347_v60 = vmul.f32 0.032258064, %v4346_v13 }
0x2b35   : > { %7508 = vrsqrt.f32 %v4347_v60  ;;  %vm4350_vm13 = vcmp.eq.f32.partialorder %v4347_v60, inf  ;;  %v4353_v2 = vand.u32 2147483648, %v4347_v60  ;;  %vm4352_vm14 = vcmp.eq.f32.partialorder %v4347_v60, 0.0 }
0x2b42   : > { %v7509_v14 = vpop.eup %7508 }
0x2b43   : > { %v4349_v7 = vmul.f32 %v7509_v14, %v4347_v60 }
0x2b45   : > { %v4351_v15 = vsel %vm4350_vm13, %v4347_v60, %v4349_v7 }
0x2b46   : > { %v4354_v16 = vsel %vm4352_vm14, %v4353_v2, %v4351_v15 }
0x2b47   : > { %v4355_v17 = vadd.f32 1e-06, %v4354_v16 }
0x2b49   : > { %7510 = vrcp.f32 %v4355_v17 }
0x2b56   : > { %v7511_v21 = vpop.eup %7510 }
0x2b57   : > { %v4362_v23 = vmul.f32 %v7511_v21, %v4361_v49 }
0x2b59   : > { %v4367_v24 = vadd.f32 %v6431_v22, %v4362_v23 }
0x2b5b   : > { %v4380_v26 = vpack.c.bf16 %v4367_v24, %v4367_v24 }
0x2b5d   : > { %7081 = vmatmul.mubr.msk.bf16.vlgmr.msra.gmra.mxu1 %vm640_vm3, %v4380_v26 }
0x2b5e   : > { %7086 = vmatprep.mubr.msk.bf16.mxu1 %vm7803_vm0, %v7802_v1 }
0x2c1d   : > { %v4434_v4 = vpop.f32.mrf.mxu1 }
0x2c1e   : > { %v4435_v30 = vadd.f32 %v6432_v29, %v4434_v4 }
0x2c1f   : > { %v7082_v31 = vpop.f32.mrf.mxu1 }
0x2c20   : > { %v8644_v32 = vpack.c.bf16 %v4435_v30, %v4435_v30  ;;  %v4377_v30 = vld [vmem:[#allocation8 + $0x88] sm:$0xf] }
0x2c21   : > { %v4437_v56 = vpop.f32.mrf.mxu1 }
0x2c22   : > { %4555 = vrot.lane.b32.xlu1 %v8644_v32, %s8970_s27  ;;  %4442 = vrot.lane.b32.xlu0 %v8644_v32, %s8971_s20 }
0x2c23   : > { %v7083_v41 = vpop.f32.mrf.mxu1 }
0x2c24   : > { %v4827_v41 = vsel %vm818_vm6, %v4377_v30, 0 }
0x2c26   : > { %4553 = vrot.lane.b32.xlu1 %v8644_v32, %s8972_s30  ;;  %4503 = vrot.lane.b32.xlu0 %v8644_v32, %s8973_s28 }
0x2c2a   : > { %4616 = vrot.lane.b32.xlu1 %v8644_v32, %s8974_s15 }
0x2c94   : > { %v4556_v33 = vpop.permute.xlu1 %4555  ;;  %v4443_v34 = vpop.permute.xlu0 %4442 }
0x2c95   : > { %v4448_v37 = vsel %vm747_vm7, %v4443_v34, 0  ;;  %v4561_v40 = vsel %vm747_vm7, %v4556_v33, 0 }
0x2c96   : > { %7085 = vmatpush3.bf16.xpose.msra.mxu1 %v4448_v37 }
0x2c97   : > { %7096 = vmatprep.subr.bf16.mxu1 %v7802_v1 }
0x2c98   : > { %v4504_v39 = vpop.permute.xlu0 %4503  ;;  %v4554_v44 = vpop.permute.xlu1 %4553 }
0x2c99   : > { %7093 = vmatmul.mubr.msk.bf16.vlgmr.msra.gmra.mxu0 %vm747_vm7, %v4504_v39 }
0x2c9a   : > { %7103 = vmatpush3.bf16.msra.mxu0 %v4622_v38  ;;  %7104 = vmatprep.mubr.msk.bf16.mxu0 %vm7803_vm0, %v7802_v1 }
0x2c9b   : > { %7114 = vmatprep.subr.bf16.mxu0 %v7802_v1 }
0x2c9c   : > { %v4617_v42 = vpop.permute.xlu1 %4616 }
0x2c9d   : > { %7087 = vmatmul.mubr.msk.bf16.vlgmr.msra.gmra.mxu1 %vm747_vm7, %v8644_v32 }
0x2c9e   : > { %7097 = vmatpush3.bf16.xpose.msra.mxu1 %v4561_v40  ;;  %7098 = vmatprep.mubr.msk.bf16.mxu1 %vm7803_vm0, %v7802_v1 }
0x2c9f   : > { %7108 = vmatprep.subr.bf16.mxu1 %v7802_v1 }
0x2ca1   : > { %7105 = vmatmul.mubr.msk.bf16.vlgmr.msra.gmra.mxu0 %vm747_vm7, %v4617_v42 }
0x2ca2   : > { %7116 = vmatprep.mubr.msk.bf16.mxu0 %vm7803_vm0, %v7802_v1 }
0x2ca5   : > { %7099 = vmatmul.mubr.msk.bf16.vlgmr.msra.gmra.mxu1 %vm747_vm7, %v4554_v44 }
0x2ca6   : > { %7110 = vmatprep.mubr.msk.bf16.mxu1 %vm7803_vm0, %v7802_v1 }
0x2d59   : > { %v4545_v43 = vpop.f32.mrf.mxu0 }
0x2d5a   : > { %v4552_v25 = vpack.c.bf16 %v4545_v43, %v4545_v43 }
0x2d5b   : > { %v7094_v18 = vpop.f32.mrf.mxu0 }
0x2d5c   : > { %v4716_v45 = vsel %vm818_vm6, %v4552_v25, 0 }
0x2d5d   : > { %v4484_v46 = vpop.f32.mrf.mxu1  ;;  %v4548_v47 = vpop.f32.mrf.mxu0  ;;  %7115 = vmatpush3.bf16.msra.mxu0 %v4716_v45 }
0x2d5e   : > { %7126 = vmatprep.subr.bf16.mxu0 %v7802_v1  ;;  %v4490_v19 = vmul.f32 0.35355338, %v4484_v46 }
0x2d5f   : > { %v7088_v48 = vpop.f32.mrf.mxu1  ;;  %v7095_v50 = vpop.f32.mrf.mxu0 }
0x2d60   : > { %v4491_v8 = vadd.f32 %v4490_v19, %v8427_v6 }
0x2d61   : > { %v4487_v51 = vpop.f32.mrf.mxu1  ;;  %v4658_v52 = vpop.f32.mrf.mxu0 }
0x2d62   : > { %v4665_v53 = vpack.c.bf16 %v4658_v52, %v4658_v52  ;;  %v4492_v9 = vsel %vm747_vm7, %v4491_v8, -inf }
0x2d63   : > { %v7089_v54 = vpop.f32.mrf.mxu1  ;;  %v7106_v55 = vpop.f32.mrf.mxu0 }
0x2d64   : > { %v4670_v57 = vsel %vm818_vm6, %v4665_v53, 0 }
0x2d65   : > { %v4597_v58 = vpop.f32.mrf.mxu1  ;;  %v4661_v59 = vpop.f32.mrf.mxu0  ;;  %7109 = vmatpush3.bf16.msra.mxu1 %v4670_v57 }
0x2d66   : > { %v4603_v61 = vmul.f32 0.35355338, %v4597_v58  ;;  %7120 = vmatprep.subr.bf16.mxu1 %v7802_v1 }
0x2d67   : > { %v7100_v62 = vpop.f32.mrf.mxu1  ;;  %v7107_v63 = vpop.f32.mrf.mxu0 }
0x2d68   : > { %v4604_v0 = vadd.f32 %v4603_v61, %v8427_v6 }
0x2d69   : > { %v4600_v10 = vpop.f32.mrf.mxu1 }
0x2d6a   : > { %v4605_v3 = vsel %vm747_vm7, %v4604_v0, -inf }
0x2d6b   : > { %4606 = vmax.xlane.f32.xlu0 %v4605_v3  ;;  %v7101_v5 = vpop.f32.mrf.mxu1 }
0x2d81   : > { %4760 = vrot.lane.b32.xlu0 %v8644_v32, %s8975_s18 }
0x2da0   : > { %4493 = vmax.xlane.f32.xlu0 %v4492_v9 }
0x2db6   : > { %4821 = vrot.lane.b32.xlu0 %v8644_v32, %s8976_s19 }
0x2dba   : > { %4918 = vrot.lane.b32.xlu0 %v8644_v32, %s8966_s26 }
0x2df4   : > { %v4607_v13 = vpop.xlane.xlu0 %4606 }
0x2df5   : > { %v4608_v60 = vsub.f32 %v4604_v0, %v4607_v13 }
0x2df7   : > { %v4609_v14 = vmul.f32 1.442695, %v4608_v60 }
0x2df8   : > { %v4761_v15 = vpop.permute.xlu0 %4760 }
0x2df9   : > { %7512 = vpow2.f32 %v4609_v14  ;;  %v4766_v27 = vsel %vm747_vm7, %v4761_v15, 0 }
0x2e06   : > { %v7513_v7 = vpop.eup %7512 }
0x2e07   : > { %v4611_v2 = vsel %vm747_vm7, %v7513_v7, 0.0 }
0x2e08   : > { %4612 = vadd.xlane.f32.xlu1 %v4611_v2 }
0x2e19   : > { %4758 = vrot.lane.b32.xlu1 %v8644_v32, %s8967_s14 }
0x2e29   : > { %v4494_v16 = vpop.xlane.xlu0 %4493 }
0x2e2a   : > { %v4495_v17 = vsub.f32 %v4491_v8, %v4494_v16 }
0x2e2c   : > { %v4496_v20 = vmul.f32 1.442695, %v4495_v17 }
0x2e2d   : > { %v4822_v34 = vpop.permute.xlu0 %4821 }
0x2e2e   : > { %7514 = vpow2.f32 %v4496_v20 }
0x2e31   : > { %v4919_v37 = vpop.permute.xlu0 %4918 }
0x2e3b   : > { %v7515_v49 = vpop.eup %7514 }
0x2e3c   : > { %v4498_v21 = vsel %vm747_vm7, %v7515_v49, 0.0 }
0x2e3d   : > { %4499 = vadd.xlane.f32.xlu1 %v4498_v21 }
0x2e4e   : > { %4920 = vrot.lane.b32.xlu1 %v8644_v32, %s8968_s16 }
0x2e91   : > { %v4613_v22 = vpop.xlane.xlu1 %4612 }
0x2e92   : > { %7516 = vrcp.f32 %v4613_v22 }
0x2e95   : > { %v4759_v28 = vpop.permute.xlu1 %4758 }
0x2e9f   : > { %v7517_v23 = vpop.eup %7516 }
0x2ea0   : > { %v4615_v24 = vmul.f32 %v7517_v23, %v7513_v7 }
0x2ea2   : > { %v4664_v26 = vpack.c.bf16 %v4615_v24, %v4615_v24 }
0x2ea4   : > { %7111 = vmatmul.mubr.msk.bf16.vlgmr.msra.gmra.mxu1 %vm747_vm7, %v4664_v26 }
0x2ea5   : > { %7121 = vmatpush3.bf16.xpose.msra.mxu1 %v4766_v27  ;;  %7122 = vmatprep.mubr.msk.bf16.mxu1 %vm7803_vm0, %v7802_v1 }
0x2ea6   : > { %7132 = vmatprep.subr.bf16.mxu1 %v7802_v1 }
0x2eac   : > { %7123 = vmatmul.mubr.msk.bf16.vlgmr.msra.gmra.mxu1 %vm747_vm7, %v4759_v28 }
0x2ead   : > { %7134 = vmatprep.mubr.msk.bf16.mxu1 %vm7803_vm0, %v7802_v1 }
0x2ec6   : > { %v4500_v29 = vpop.xlane.xlu1 %4499 }
0x2ec7   : > { %7518 = vrcp.f32 %v4500_v29 }
0x2eca   : > { %v4921_v33 = vpop.permute.xlu1 %4920 }
0x2ecb   : > { %v4926_v35 = vsel %vm747_vm7, %v4921_v33, 0 }
0x2ed4   : > { %v7519_v4 = vpop.eup %7518 }
0x2ed5   : > { %v4502_v31 = vmul.f32 %v7519_v4, %v7515_v49  ;;  %v4378_v49 = vld [vmem:[#allocation8 + $0x8c] sm:$0xf] }
0x2ed6   : > { %v4987_v23 = vsel %vm818_vm6, %v4378_v49, 0 }
0x2ed7   : > { %v4551_v56 = vpack.c.bf16 %v4502_v31, %v4502_v31 }
0x2ed9   : > { %7117 = vmatmul.mubr.msk.bf16.vlgmr.msra.gmra.mxu0 %vm747_vm7, %v4551_v56 }
0x2eda   : > { %7127 = vmatpush3.bf16.msra.mxu0 %v4827_v41  ;;  %7128 = vmatprep.mubr.msk.bf16.mxu0 %vm7803_vm0, %v7802_v1 }
0x2edb   : > { %7138 = vmatprep.subr.bf16.mxu0 %v7802_v1 }
0x2ee1   : > { %7129 = vmatmul.mubr.msk.bf16.vlgmr.msra.gmra.mxu0 %vm747_vm7, %v4822_v34 }
0x2ee2   : > { %7139 = vmatpush3.bf16.xpose.msra.mxu0 %v4926_v35  ;;  %7140 = vmatprep.mubr.msk.bf16.mxu0 %vm7803_vm0, %v7802_v1 }
0x2ee3   : > { %7150 = vmatprep.subr.bf16.mxu0 %v7802_v1 }
0x2ee9   : > { %7141 = vmatmul.mubr.msk.bf16.vlgmr.msra.gmra.mxu0 %vm747_vm7, %v4919_v37  ;;  %v7404_v37 = vld [vmem:[#allocation8 + $0xa8] sm:$0xff]  }
0x2eea   : > { %7152 = vmatprep.mubr.msk.bf16.mxu0 %vm7803_vm0, %v7802_v1 }
0x2f64   : > { %v4706_v38 = vpop.f32.mrf.mxu1 }
0x2f66   : > { %v7112_v39 = vpop.f32.mrf.mxu1 }
0x2f68   : > { %v4709_v44 = vpop.f32.mrf.mxu1 }
0x2f69   : > { %v7405_v44 = vld [vmem:[#allocation8 + $0xa0] sm:$0xff]  }
0x2f6a   : > { %v7113_v40 = vpop.f32.mrf.mxu1 }
0x2f6c   : > { %v4802_v42 = vpop.f32.mrf.mxu1 }
0x2f6d   : > { %v4808_v43 = vmul.f32 0.35355338, %v4802_v42 }
0x2f6e   : > { %v7124_v25 = vpop.f32.mrf.mxu1 }
0x2f6f   : > { %v4809_v18 = vadd.f32 %v4808_v43, %v8427_v6  ;;  %v6448_v43 = vld [vmem:[#allocation10 + $0x13] ss:$0 sm:$0xff] }
0x2f70   : > { %v4805_v45 = vpop.f32.mrf.mxu1 }
0x2f71   : > { %v4810_v46 = vsel %vm747_vm7, %v4809_v18, -inf }
0x2f72   : > { %4811 = vmax.xlane.f32.xlu1 %v4810_v46  ;;  %v7125_v47 = vpop.f32.mrf.mxu1 }
0x2f99   : > { %v4752_v48 = vpop.f32.mrf.mxu0 }
0x2f9a   : > { %v4753_v50 = vadd.f32 %v4752_v48, %v4706_v38 }
0x2f9b   : > { %v7118_v51 = vpop.f32.mrf.mxu0 }
0x2f9d   : > { %v4755_v52 = vpop.f32.mrf.mxu0 }
0x2f9f   : > { %v7119_v53 = vpop.f32.mrf.mxu0 }
0x2fa1   : > { %v4863_v54 = vpop.f32.mrf.mxu0 }
0x2fa2   : > { %v4870_v55 = vpack.c.bf16 %v4863_v54, %v4863_v54 }
0x2fa3   : > { %v7130_v57 = vpop.f32.mrf.mxu0 }
0x2fa4   : > { %v4875_v58 = vsel %vm818_vm6, %v4870_v55, 0 }
0x2fa5   : > { %v4866_v59 = vpop.f32.mrf.mxu0  ;;  %7133 = vmatpush3.bf16.msra.mxu1 %v4875_v58 }
0x2fa6   : > { %7144 = vmatprep.subr.bf16.mxu1 %v7802_v1 }
0x2fa7   : > { %v7131_v61 = vpop.f32.mrf.mxu0 }
0x2fa9   : > { %v4962_v62 = vpop.f32.mrf.mxu0 }
0x2faa   : > { %v4968_v63 = vmul.f32 0.35355338, %v4962_v62  ;;  %v7406_v62 = vld [vmem:[#allocation8 + $0x98] sm:$0xff]  }
0x2fab   : > { %v7142_v0 = vpop.f32.mrf.mxu0 }
0x2fac   : > { %v4969_v10 = vadd.f32 %v4968_v63, %v8427_v6  ;;  %v7407_v63 = vld [vmem:[#allocation8 + $0x90] sm:$0xff]  }
0x2fad   : > { %v4965_v3 = vpop.f32.mrf.mxu0 }
0x2fae   : > { %v4970_v5 = vsel %vm747_vm7, %v4969_v10, -inf }
0x2faf   : > { %v7143_v19 = vpop.f32.mrf.mxu0  ;;  %4971 = vmax.xlane.f32.xlu1 %v4970_v5 }
0x2ffb   : > { %v4812_v8 = vpop.xlane.xlu1 %4811 }
0x2ffc   : > { %v4813_v9 = vsub.f32 %v4809_v18, %v4812_v8 }
0x2ffe   : > { %v4814_v13 = vmul.f32 1.442695, %v4813_v9 }
0x3000   : > { %7520 = vpow2.f32 %v4814_v13 }
0x300d   : > { %v7521_v60 = vpop.eup %7520 }
0x300e   : > { %v4816_v14 = vsel %vm747_vm7, %v7521_v60, 0.0 }
0x300f   : > { %4817 = vadd.xlane.f32.xlu0 %v4816_v14 }
0x3025   : > { %4981 = vrot.lane.b32.xlu0 %v8644_v32, %s8969_s29 }
0x3038   : > { %v4972_v7 = vpop.xlane.xlu1 %4971 }
0x3039   : > { %v4973_v2 = vsub.f32 %v4969_v10, %v4972_v7 }
0x303b   : > { %v4974_v15 = vmul.f32 1.442695, %v4973_v2  ;;  %v6450_v2 = vld [vmem:[#allocation10 + $0x15] ss:$0 sm:$0xff] }
0x303d   : > { %7522 = vpow2.f32 %v4974_v15 }
0x304a   : > { %v7523_v6 = vpop.eup %7522 }
0x304b   : > { %v4976_v16 = vsel %vm747_vm7, %v7523_v6, 0.0 }
0x304c   : > { %4977 = vadd.xlane.f32.xlu1 %v4976_v16 }
0x3098   : > { %v4818_v17 = vpop.xlane.xlu0 %4817 }
0x3099   : > { %7524 = vrcp.f32 %v4818_v17 }
0x309c   : > { %v4982_v32 = vpop.permute.xlu0 %4981 }
0x30a6   : > { %v7525_v20 = vpop.eup %7524 }
0x30a7   : > { %v4820_v21 = vmul.f32 %v7525_v20, %v7521_v60  ;;  %v6449_v60 = vld [vmem:[#allocation10 + $0x14] ss:$0 sm:$0xff]  ;;  %v5129_v20 = vld [vmem:[#allocation8 + $0xb0] sm:$0xf] }
0x30a8   : > { %v5318_v49 = vsel %vm818_vm6, %v5129_v20, 0 }
0x30a9   : > { %v4869_v22 = vpack.c.bf16 %v4820_v21, %v4820_v21  ;;  %v6451_v21 = vld [vmem:[#allocation10 + $0x16] ss:$0 sm:$0xff] }
0x30ab   : > { %7135 = vmatmul.mubr.msk.bf16.vlgmr.msra.gmra.mxu1 %vm747_vm7, %v4869_v22 }
0x30ac   : > { %7145 = vmatpush3.bf16.msra.mxu1 %v4987_v23  ;;  %7146 = vmatprep.mubr.msk.bf16.mxu1 %vm7803_vm0, %v7802_v1 }
0x30ad   : > { %7156 = vmatprep.subr.bf16.mxu1 %v7802_v1 }
0x30b3   : > { %7147 = vmatmul.mubr.msk.bf16.vlgmr.msra.gmra.mxu1 %vm747_vm7, %v4982_v32 }
0x30b4   : > { %7160 = vmatprep.mubr.msk.bf16.mxu1 %vm7803_vm0, %v7802_v1  ;;  %7157 = vmatpush3.bf16.msra.mxu1 %v7406_v62 }
0x30b5   : > { %7158 = vmatprep.subr.bf16.mxu1 %v7802_v1 }
0x30b8   : > { %7159 = vmatpush3.bf16.msra.mxu1 %v7407_v63 }
0x30b9   : > { %7172 = vmatprep.subr.bf16.mxu1 %v7802_v1 }
0x30d5   : > { %v4978_v24 = vpop.xlane.xlu1 %4977 }
0x30d6   : > { %7526 = vrcp.f32 %v4978_v24 }
0x30e3   : > { %v7527_v4 = vpop.eup %7526 }
0x30e4   : > { %v4980_v56 = vmul.f32 %v7527_v4, %v7523_v6 }
0x30e6   : > { %v5029_v38 = vpack.c.bf16 %v4980_v56, %v4980_v56 }
0x316b   : > { %v4911_v26 = vpop.f32.mrf.mxu1 }
0x316c   : > { %v4917_v27 = vadd.f32 %v4911_v26, %v4753_v50 }
0x316d   : > { %v7136_v28 = vpop.f32.mrf.mxu1 }
0x316f   : > { %v4914_v29 = vpop.f32.mrf.mxu1 }
0x3171   : > { %v7137_v30 = vpop.f32.mrf.mxu1 }
0x3172   : > { %v5130_v30 = vld [vmem:[#allocation8 + $0xb4] sm:$0xf] }
0x3173   : > { %v5023_v31 = vpop.f32.mrf.mxu1 }
0x3174   : > { %v5030_v41 = vpack.c.bf16 %v5023_v31, %v5023_v31  ;;  %v5432_v31 = vsel %vm818_vm6, %v5130_v30, 0 }
0x3175   : > { %v7148_v33 = vpop.f32.mrf.mxu1 }
0x3176   : > { %v5035_v34 = vsel %vm818_vm6, %v5030_v41, 0 }
0x3177   : > { %v5026_v35 = vpop.f32.mrf.mxu1  ;;  %7151 = vmatpush3.bf16.msra.mxu0 %v5035_v34 }
0x3178   : > { %7164 = vmatprep.subr.bf16.mxu0 %v7802_v1 }
0x3179   : > { %v7149_v39 = vpop.f32.mrf.mxu1 }
0x317a   : > { %7153 = vmatmul.mubr.msk.bf16.vlgmr.msra.gmra.mxu0 %vm747_vm7, %v5029_v38 }
0x317b   : > { %7165 = vmatpush3.bf16.msra.mxu0 %v7404_v37  ;;  %7168 = vmatprep.mubr.msk.bf16.mxu0 %vm7803_vm0, %v7802_v1 }
0x317c   : > { %7166 = vmatprep.subr.bf16.mxu0 %v7802_v1 }
0x317f   : > { %7167 = vmatpush3.bf16.msra.mxu0 %v7405_v44 }
0x3180   : > { %7178 = vmatprep.subr.bf16.mxu0 %v7802_v1 }
0x3182   : > { %7169 = vmatmul.mubr.msk.bf16.vlgmr.msra.gmra.mxu0 %vm640_vm3, %v8505_v36 }
0x3183   : > { %7180 = vmatprep.mubr.msk.bf16.mxu0 %vm7803_vm0, %v7802_v1  ;;  %7179 = vmatpush3.bf16.msra.mxu0 %v5318_v49  ;;  %v5131_v49 = vld [vmem:[#allocation8 + $0xb8] sm:$0xf] }
0x3184   : > { %7190 = vmatprep.subr.bf16.mxu0 %v7802_v1 }
0x323a   : > { %v5071_v40 = vpop.f32.mrf.mxu0 }
0x323b   : > { %v5077_v42 = vadd.f32 %v5071_v40, %v4917_v27 }
0x323c   : > { %v7154_v25 = vpop.f32.mrf.mxu0 }
0x323d   : > { %v5078_v18 = vadd.f32 %v5077_v42, %v8631_v12  ;;  %v6455_v12 = vld [vmem:[#allocation10 + $0x17] ss:$0 sm:$0xff] }
0x323e   : > { %v5074_v45 = vpop.f32.mrf.mxu0 }
0x323f   : > { %v8746_v46 = vadd.f32 %v6448_v43, %v5078_v18 }
0x3240   : > { %v7155_v47 = vpop.f32.mrf.mxu0 }
0x3241   : > { %v5086_v48 = vsel %vm640_vm3, %v8746_v46, 0.0 }
0x3242   : > { %5087 = vadd.xlane.f32.xlu1 %v5086_v48  ;;  %v5244_v50 = vpop.f32.mrf.mxu0 }
0x3243   : > { %v5245_v59 = vadd.f32 %v6455_v12, %v5244_v50 }
0x3244   : > { %v7170_v51 = vpop.f32.mrf.mxu0 }
0x3245   : > { %v8752_v61 = vpack.c.bf16 %v5245_v59, %v5245_v59 }
0x3246   : > { %v5247_v36 = vpop.f32.mrf.mxu0 }
0x3247   : > { %v5256_v17 = vsel %vm747_vm7, %v8752_v61, 0 }
0x3248   : > { %v7171_v52 = vpop.f32.mrf.mxu0 }
0x32cb   : > { %v5088_v53 = vpop.xlane.xlu1 %5087 }
0x32cc   : > { %v5089_v54 = vmul.f32 0.03125, %v5088_v53 }
0x32ce   : > { %v5090_v55 = vsub.f32 %v8746_v46, %v5089_v54 }
0x32d0   : > { %v5091_v57 = vmul.f32 %v5090_v55, %v5090_v55  ;;  %v5109_v14 = vmul.f32 %v6449_v60, %v5090_v55 }
0x32d2   : > { %v5092_v58 = vsel %vm640_vm3, %v5091_v57, 0.0 }
0x32d3   : > { %5093 = vadd.xlane.f32.xlu1 %v5092_v58 }
0x32e4   : > { %5365 = vrot.lane.b32.xlu1 %v8752_v61, %s8972_s30 }
0x335c   : > { %v5094_v0 = vpop.xlane.xlu1 %5093 }
0x335d   : > { %v5095_v10 = vmul.f32 0.032258064, %v5094_v0 }
0x335f   : > { %7528 = vrsqrt.f32 %v5095_v10  ;;  %vm5098_vm15 = vcmp.eq.f32.partialorder %v5095_v10, inf  ;;  %v5101_v19 = vand.u32 2147483648, %v5095_v10  ;;  %vm5100_vm1 = vcmp.eq.f32.partialorder %v5095_v10, 0.0 }
0x3360   : > { %v5366_v32 = vpop.permute.xlu1 %5365 }
0x3361   : > { %v5371_v28 = vsel %vm747_vm7, %v5366_v32, 0 }
0x336c   : > { %v7529_v3 = vpop.eup %7528 }
0x336d   : > { %v5097_v5 = vmul.f32 %v7529_v3, %v5095_v10 }
0x336f   : > { %v5099_v8 = vsel %vm5098_vm15, %v5095_v10, %v5097_v5 }
0x3370   : > { %v5102_v9 = vsel %vm5100_vm1, %v5101_v19, %v5099_v8 }
0x3371   : > { %v5103_v13 = vadd.f32 1e-06, %v5102_v9 }
0x3373   : > { %7530 = vrcp.f32 %v5103_v13 }
0x3380   : > { %v7531_v7 = vpop.eup %7530 }
0x3381   : > { %v5110_v15 = vmul.f32 %v7531_v7, %v5109_v14 }
0x3383   : > { %v5115_v6 = vadd.f32 %v6450_v2, %v5110_v15 }
0x3385   : > { %v5134_v16 = vpack.c.bf16 %v5115_v6, %v5115_v6 }
0x3387   : > { %7161 = vmatmul.mubr.msk.bf16.vlgmr.msra.gmra.mxu1 %vm640_vm3, %v5134_v16 }
0x3388   : > { %7173 = vmatpush3.bf16.xpose.msra.mxu1 %v5256_v17  ;;  %7174 = vmatprep.mubr.msk.bf16.mxu1 %vm7803_vm0, %v7802_v1 }
0x3389   : > { %7184 = vmatprep.subr.bf16.mxu1 %v7802_v1 }
0x3447   : > { %v5188_v22 = vpop.f32.mrf.mxu1 }
0x3448   : > { %v5189_v23 = vadd.f32 %v6451_v21, %v5188_v22 }
0x3449   : > { %v7162_v24 = vpop.f32.mrf.mxu1 }
0x344a   : > { %v8766_v26 = vpack.c.bf16 %v5189_v23, %v5189_v23  ;;  %v5637_v23 = vsel %vm818_vm6, %v5131_v49, 0 }
0x344b   : > { %v5191_v27 = vpop.f32.mrf.mxu1 }
0x344c   : > { %5363 = vrot.lane.b32.xlu0 %v8766_v26, %s8972_s30  ;;  %7175 = vmatmul.mubr.msk.bf16.vlgmr.msra.gmra.mxu1 %vm747_vm7, %v8766_v26 }
0x344d   : > { %7185 = vmatpush3.bf16.xpose.msra.mxu1 %v5371_v28  ;;  %v7163_v29 = vpop.f32.mrf.mxu1  ;;  %7186 = vmatprep.mubr.msk.bf16.mxu1 %vm7803_vm0, %v7802_v1 }
0x344e   : > { %7196 = vmatprep.subr.bf16.mxu1 %v7802_v1 }
0x3450   : > { %5312 = vrot.lane.b32.xlu0 %v8752_v61, %s8971_s20 }
0x3454   : > { %5426 = vrot.lane.b32.xlu0 %v8752_v61, %s8970_s27 }
0x34be   : > { %v5364_v4 = vpop.permute.xlu0 %5363 }
0x34bf   : > { %7187 = vmatmul.mubr.msk.bf16.vlgmr.msra.gmra.mxu1 %vm747_vm7, %v5364_v4 }
0x34c0   : > { %7198 = vmatprep.mubr.msk.bf16.mxu1 %vm7803_vm0, %v7802_v1 }
0x34c2   : > { %v5313_v56 = vpop.permute.xlu0 %5312 }
0x34c3   : > { %7181 = vmatmul.mubr.msk.bf16.vlgmr.msra.gmra.mxu0 %vm747_vm7, %v5313_v56 }
0x34c4   : > { %7191 = vmatpush3.bf16.msra.mxu0 %v5432_v31  ;;  %7192 = vmatprep.mubr.msk.bf16.mxu0 %vm7803_vm0, %v7802_v1 }
0x34c5   : > { %7202 = vmatprep.subr.bf16.mxu0 %v7802_v1 }
0x34c6   : > { %v5427_v41 = vpop.permute.xlu0 %5426 }
0x34cb   : > { %7193 = vmatmul.mubr.msk.bf16.vlgmr.msra.gmra.mxu0 %vm747_vm7, %v5427_v41 }
0x34cc   : > { %7204 = vmatprep.mubr.msk.bf16.mxu0 %vm7803_vm0, %v7802_v1 }
0x350c   : > { %v5292_v33 = vpop.f32.mrf.mxu1 }
0x350d   : > { %v5298_v58 = vmul.f32 0.35355338, %v5292_v33 }
0x350e   : > { %v7176_v34 = vpop.f32.mrf.mxu1 }
0x350f   : > { %v5299_v12 = vadd.f32 %v5298_v58, %v8038_v11 }
0x3510   : > { %v5295_v35 = vpop.f32.mrf.mxu1 }
0x3511   : > { %v5300_v59 = vsel %vm747_vm7, %v5299_v12, -inf }
0x3512   : > { %v7177_v37 = vpop.f32.mrf.mxu1 }
0x357f   : > { %v5407_v38 = vpop.f32.mrf.mxu1 }
0x3580   : > { %v5413_v39 = vmul.f32 0.35355338, %v5407_v38 }
0x3581   : > { %v7188_v44 = vpop.f32.mrf.mxu1 }
0x3582   : > { %v5414_v40 = vadd.f32 %v5413_v39, %v8038_v11 }
0x3583   : > { %v5354_v42 = vpop.f32.mrf.mxu0  ;;  %v5410_v43 = vpop.f32.mrf.mxu1 }
0x3584   : > { %v5361_v25 = vpack.c.bf16 %v5354_v42, %v5354_v42  ;;  %v5415_v18 = vsel %vm747_vm7, %v5414_v40, -inf }
0x3585   : > { %v7182_v45 = vpop.f32.mrf.mxu0  ;;  %5416 = vmax.xlane.f32.xlu0 %v5415_v18  ;;  %v7189_v47 = vpop.f32.mrf.mxu1 }
0x3586   : > { %v5526_v48 = vsel %vm818_vm6, %v5361_v25, 0 }
0x3587   : > { %v5357_v50 = vpop.f32.mrf.mxu0  ;;  %7203 = vmatpush3.bf16.msra.mxu0 %v5526_v48 }
0x3588   : > { %7214 = vmatprep.subr.bf16.mxu0 %v7802_v1 }
0x3589   : > { %v7183_v51 = vpop.f32.mrf.mxu0 }
0x358b   : > { %v5468_v36 = vpop.f32.mrf.mxu0 }
0x358c   : > { %v5475_v52 = vpack.c.bf16 %v5468_v36, %v5468_v36 }
0x358d   : > { %v7194_v53 = vpop.f32.mrf.mxu0 }
0x358e   : > { %v5480_v54 = vsel %vm818_vm6, %v5475_v52, 0 }
0x358f   : > { %v5471_v55 = vpop.f32.mrf.mxu0  ;;  %7197 = vmatpush3.bf16.msra.mxu1 %v5480_v54 }
0x3590   : > { %7208 = vmatprep.subr.bf16.mxu1 %v7802_v1 }
0x3591   : > { %v7195_v57 = vpop.f32.mrf.mxu0 }
0x359b   : > { %5570 = vrot.lane.b32.xlu0 %v8752_v61, %s8967_s14 }
0x35ba   : > { %5301 = vmax.xlane.f32.xlu0 %v5300_v59 }
0x35d0   : > { %5631 = vrot.lane.b32.xlu0 %v8752_v61, %s8975_s18 }
0x35d4   : > { %5728 = vrot.lane.b32.xlu0 %v8766_v26, %s8966_s26 }
0x360e   : > { %v5417_v62 = vpop.xlane.xlu0 %5416 }
0x360f   : > { %v5418_v63 = vsub.f32 %v5414_v40, %v5417_v62 }
0x3611   : > { %v5419_v0 = vmul.f32 1.442695, %v5418_v63 }
0x3612   : > { %v5571_v5 = vpop.permute.xlu0 %5570 }
0x3613   : > { %7532 = vpow2.f32 %v5419_v0  ;;  %v5576_v6 = vsel %vm747_vm7, %v5571_v5, 0 }
0x3620   : > { %v7533_v10 = vpop.eup %7532 }
0x3621   : > { %v5421_v3 = vsel %vm747_vm7, %v7533_v10, 0.0 }
0x3622   : > { %5422 = vadd.xlane.f32.xlu1 %v5421_v3 }
0x3633   : > { %5568 = vrot.lane.b32.xlu1 %v8766_v26, %s8967_s14 }
0x3643   : > { %v5302_v19 = vpop.xlane.xlu0 %5301 }
0x3644   : > { %v5303_v8 = vsub.f32 %v5299_v12, %v5302_v19 }
0x3646   : > { %v5304_v9 = vmul.f32 1.442695, %v5303_v8  ;;  %v5132_v8 = vld [vmem:[#allocation8 + $0xbc] sm:$0xf] }
0x3647   : > { %v5632_v24 = vpop.permute.xlu0 %5631 }
0x3648   : > { %7534 = vpow2.f32 %v5304_v9 }
0x364b   : > { %v5729_v27 = vpop.permute.xlu0 %5728 }
0x3655   : > { %v7535_v13 = vpop.eup %7534 }
0x3656   : > { %v5306_v60 = vsel %vm747_vm7, %v7535_v13, 0.0 }
0x3657   : > { %5307 = vadd.xlane.f32.xlu1 %v5306_v60  ;;  %v5797_v60 = vsel %vm818_vm6, %v5132_v8, 0 }
0x3668   : > { %5730 = vrot.lane.b32.xlu1 %v8752_v61, %s8966_s26  ;;  %s525_s26 = sand.u32 1, %s7781_s22  }
0x3669   : > { %s6280_s14 = sshll.u32 %s525_s26, 3  ;;  %s6099_s15 = scalar_lea.sflag [#allocation4], %s525_s26 }
0x366a   : > { %s527_s29 = scalar_lea.vmem [#allocation13], %s6280_s14 }
0x366b   : > { %s6112_s27 = sshll.u32 %s527_s29, 4  ;;  %s6113_s27 = int_to_ptr.vmem [resolvable:$true] %s6112_s27 }
0x366c   : > { %s7713_s21 = scalar_lea.vmem %s6113_s27, 128  ;;  %p7720_p3 = scmp.lt.s32.totalorder %s6113_s27, %s7718_s17 }
0x366d   : > { %p7714_p6 = scmp.ne.s32.totalorder %s6113_s27, %s7713_s21 }
0x366f   : > { %p7715_p9 = pnand %p7714_p6, %p7919_p5 }
0x3671   : > { %p7716_p2 = pneg %p7715_p9 }
0x36ab   : > { %v5423_v14 = vpop.xlane.xlu1 %5422 }
0x36ac   : > { %7536 = vrcp.f32 %v5423_v14 }
0x36af   : > { %v5569_v16 = vpop.permute.xlu1 %5568 }
0x36b9   : > { %v7537_v7 = vpop.eup %7536 }
0x36ba   : > { %v5425_v2 = vmul.f32 %v7537_v7, %v7533_v10 }
0x36bc   : > { %v5474_v15 = vpack.c.bf16 %v5425_v2, %v5425_v2 }
0x36be   : > { %7199 = vmatmul.mubr.msk.bf16.vlgmr.msra.gmra.mxu1 %vm747_vm7, %v5474_v15 }
0x36bf   : > { %7209 = vmatpush3.bf16.xpose.msra.mxu1 %v5576_v6  ;;  %7210 = vmatprep.mubr.msk.bf16.mxu1 %vm7803_vm0, %v7802_v1 }
0x36c0   : > { %7220 = vmatprep.subr.bf16.mxu1 %v7802_v1 }
0x36c6   : > { %7211 = vmatmul.mubr.msk.bf16.vlgmr.msra.gmra.mxu1 %vm747_vm7, %v5569_v16 }
0x36c7   : > { %7222 = vmatprep.mubr.msk.bf16.mxu1 %vm7803_vm0, %v7802_v1 }
0x36e0   : > { %v5308_v17 = vpop.xlane.xlu1 %5307 }
0x36e1   : > { %7538 = vrcp.f32 %v5308_v17 }
0x36e4   : > { %v5731_v32 = vpop.permute.xlu1 %5730 }
0x36e5   : > { %v5736_v26 = vsel %vm747_vm7, %v5731_v32, 0 }
0x36ee   : > { %v7539_v20 = vpop.eup %7538 }
0x36ef   : > { %v5310_v21 = vmul.f32 %v7539_v20, %v7535_v13 }
0x36f1   : > { %v5360_v22 = vpack.c.bf16 %v5310_v21, %v5310_v21 }
0x36f3   : > { %7205 = vmatmul.mubr.msk.bf16.vlgmr.msra.gmra.mxu0 %vm747_vm7, %v5360_v22 }
0x36f4   : > { %7215 = vmatpush3.bf16.msra.mxu0 %v5637_v23  ;;  %7216 = vmatprep.mubr.msk.bf16.mxu0 %vm7803_vm0, %v7802_v1 }
0x36f5   : > { %7226 = vmatprep.subr.bf16.mxu0 %v7802_v1 }
0x36fb   : > { %7217 = vmatmul.mubr.msk.bf16.vlgmr.msra.gmra.mxu0 %vm747_vm7, %v5632_v24 }
0x36fc   : > { %7227 = vmatpush3.bf16.xpose.msra.mxu0 %v5736_v26  ;;  %7228 = vmatprep.mubr.msk.bf16.mxu0 %vm7803_vm0, %v7802_v1 }
0x36fd   : > { %7238 = vmatprep.subr.bf16.mxu0 %v7802_v1 }
0x3703   : > { %7229 = vmatmul.mubr.msk.bf16.vlgmr.msra.gmra.mxu0 %vm747_vm7, %v5729_v27 }
0x3704   : > { %7240 = vmatprep.mubr.msk.bf16.mxu0 %vm7803_vm0, %v7802_v1 }
0x377e   : > { %v5516_v28 = vpop.f32.mrf.mxu1 }
0x3780   : > { %v7200_v29 = vpop.f32.mrf.mxu1 }
0x3781   : > { %v6471_v29 = vld [vmem:[#allocation10 + $0x18] ss:$0 sm:$0xff] }
0x3782   : > { %v5519_v4 = vpop.f32.mrf.mxu1 }
0x3784   : > { %v7201_v30 = vpop.f32.mrf.mxu1 }
0x3786   : > { %v5612_v31 = vpop.f32.mrf.mxu1 }
0x3787   : > { %v5618_v56 = vmul.f32 0.35355338, %v5612_v31 }
0x3788   : > { %v7212_v41 = vpop.f32.mrf.mxu1 }
0x3789   : > { %v5619_v33 = vadd.f32 %v5618_v56, %v8038_v11 }
0x378a   : > { %v5615_v34 = vpop.f32.mrf.mxu1 }
0x378b   : > { %v5620_v35 = vsel %vm747_vm7, %v5619_v33, -inf }
0x378c   : > { %5621 = vmax.xlane.f32.xlu1 %v5620_v35  ;;  %v7213_v37 = vpop.f32.mrf.mxu1 }
0x37b3   : > { %v5562_v38 = vpop.f32.mrf.mxu0 }
0x37b4   : > { %v5563_v39 = vadd.f32 %v5562_v38, %v5516_v28 }
0x37b5   : > { %v7206_v44 = vpop.f32.mrf.mxu0 }
0x37b6   : > { %v7408_v44 = vld [vmem:[#allocation8 + $0xc8] sm:$0xff]  }
0x37b7   : > { %v5565_v40 = vpop.f32.mrf.mxu0 }
0x37b8   : > { %v7409_v40 = vld [vmem:[#allocation8 + $0xc0] sm:$0xff]  }
0x37b9   : > { %v7207_v42 = vpop.f32.mrf.mxu0 }
0x37bb   : > { %v5673_v43 = vpop.f32.mrf.mxu0 }
0x37bc   : > { %v5680_v25 = vpack.c.bf16 %v5673_v43, %v5673_v43 }
0x37bd   : > { %v7218_v18 = vpop.f32.mrf.mxu0 }
0x37be   : > { %v5685_v45 = vsel %vm818_vm6, %v5680_v25, 0 }
0x37bf   : > { %v5676_v47 = vpop.f32.mrf.mxu0  ;;  %7221 = vmatpush3.bf16.msra.mxu1 %v5685_v45 }
0x37c0   : > { %7232 = vmatprep.subr.bf16.mxu1 %v7802_v1 }
0x37c1   : > { %v7219_v48 = vpop.f32.mrf.mxu0 }
0x37c3   : > { %v5772_v50 = vpop.f32.mrf.mxu0 }
0x37c4   : > { %v5778_v51 = vmul.f32 0.35355338, %v5772_v50 }
0x37c5   : > { %v7230_v36 = vpop.f32.mrf.mxu0 }
0x37c6   : > { %v5779_v52 = vadd.f32 %v5778_v51, %v8038_v11  ;;  %v6472_v36 = vld [vmem:[#allocation10 + $0x19] ss:$0 sm:$0xff] }
0x37c7   : > { %v5775_v53 = vpop.f32.mrf.mxu0 }
0x37c8   : > { %v5780_v54 = vsel %vm747_vm7, %v5779_v52, -inf }
0x37c9   : > { %v7231_v55 = vpop.f32.mrf.mxu0  ;;  %5781 = vmax.xlane.f32.xlu1 %v5780_v54  ;;  %v6473_v54 = vld [vmem:[#allocation10 + $0x1a] ss:$0 sm:$0xff] }
0x3815   : > { %v5622_v57 = vpop.xlane.xlu1 %5621 }
0x3816   : > { %v5623_v58 = vsub.f32 %v5619_v33, %v5622_v57 }
0x3818   : > { %v5624_v12 = vmul.f32 1.442695, %v5623_v58 }
0x381a   : > { %7540 = vpow2.f32 %v5624_v12 }
0x3827   : > { %v7541_v59 = vpop.eup %7540 }
0x3828   : > { %v5626_v62 = vsel %vm747_vm7, %v7541_v59, 0.0 }
0x3829   : > { %5627 = vadd.xlane.f32.xlu0 %v5626_v62 }
0x383f   : > { %5791 = vrot.lane.b32.xlu0 %v8752_v61, %s8968_s16  ;;  %s6485_s16 = sshll.u32 %s7902_s25, 7  ;;  %s7719_s25 = scalar_lea.vmem %s7718_s17, 256 }
0x3840   : > { %s6110_s28 = scalar_lea.hbm %s8913_s12, %s6485_s16  ;;  %p7721_p4 = scmp.lt.s32.totalorder %s7719_s25, %s7713_s21 }
0x3842   : > { %p7722_p13 = por %p7721_p4, %p7720_p3 }
0x3844   : > { %p7723_p7 = pnand %p7722_p13, %p7716_p2 }
0x3852   : > { %v5782_v63 = vpop.xlane.xlu1 %5781 }
0x3853   : > { %v5783_v0 = vsub.f32 %v5779_v52, %v5782_v63 }
0x3855   : > { %v5784_v10 = vmul.f32 1.442695, %v5783_v0 }
0x3857   : > { %7542 = vpow2.f32 %v5784_v10 }
0x3864   : > { %v7543_v11 = vpop.eup %7542 }
0x3865   : > { %v5786_v3 = vsel %vm747_vm7, %v7543_v11, 0.0 }
0x3866   : > { %5787 = vadd.xlane.f32.xlu1 %v5786_v3 }
0x38b2   : > { %v5628_v5 = vpop.xlane.xlu0 %5627 }
0x38b3   : > { %7544 = vrcp.f32 %v5628_v5 }
0x38b6   : > { %v5792_v61 = vpop.permute.xlu0 %5791 }
0x38c0   : > { %v7545_v19 = vpop.eup %7544 }
0x38c1   : > { %v5630_v9 = vmul.f32 %v7545_v19, %v7541_v59  ;;  %v6474_v59 = vld [vmem:[#allocation10 + $0x1b] ss:$0 sm:$0xff]  ;;  %v6481_v19 = vld [vmem:[#allocation10 + $0x1c] ss:$0 sm:$0xff] }
0x38c3   : > { %v5679_v13 = vpack.c.bf16 %v5630_v9, %v5630_v9 }
0x38c5   : > { %7223 = vmatmul.mubr.msk.bf16.vlgmr.msra.gmra.mxu1 %vm747_vm7, %v5679_v13 }
0x38c6   : > { %7233 = vmatpush3.bf16.msra.mxu1 %v5797_v60  ;;  %7234 = vmatprep.mubr.msk.bf16.mxu1 %vm7803_vm0, %v7802_v1 }
0x38c7   : > { %7244 = vmatprep.subr.bf16.mxu1 %v7802_v1 }
0x38cd   : > { %7235 = vmatmul.mubr.msk.bf16.vlgmr.msra.gmra.mxu1 %vm747_vm7, %v5792_v61 }
0x38ce   : > { %7248 = vmatprep.mubr.msk.bf16.mxu1 %vm7803_vm0, %v7802_v1  ;;  %7245 = vmatpush3.bf16.msra.mxu1 %v7408_v44 }
0x38cf   : > { %7246 = vmatprep.subr.bf16.mxu1 %v7802_v1 }
0x38d2   : > { %7247 = vmatpush3.bf16.msra.mxu1 %v7409_v40 }
0x38ef   : > { %v5788_v14 = vpop.xlane.xlu1 %5787 }
0x38f0   : > { %7546 = vrcp.f32 %v5788_v14 }
0x38fd   : > { %v7547_v16 = vpop.eup %7546 }
0x38fe   : > { %v5790_v49 = vmul.f32 %v7547_v16, %v7543_v11 }
0x3900   : > { %v5839_v24 = vpack.c.bf16 %v5790_v49, %v5790_v49 }
0x3985   : > { %v5721_v7 = vpop.f32.mrf.mxu1 }
0x3986   : > { %v5727_v2 = vadd.f32 %v5721_v7, %v5563_v39 }
0x3987   : > { %v7224_v15 = vpop.f32.mrf.mxu1 }
0x3989   : > { %v5724_v6 = vpop.f32.mrf.mxu1 }
0x398b   : > { %v7225_v17 = vpop.f32.mrf.mxu1 }
0x398d   : > { %v5833_v20 = vpop.f32.mrf.mxu1 }
0x398e   : > { %v5840_v21 = vpack.c.bf16 %v5833_v20, %v5833_v20 }
0x398f   : > { %v7236_v22 = vpop.f32.mrf.mxu1 }
0x3990   : > { %v5845_v23 = vsel %vm818_vm6, %v5840_v21, 0 }
0x3991   : > { %v5836_v32 = vpop.f32.mrf.mxu1  ;;  %7239 = vmatpush3.bf16.msra.mxu0 %v5845_v23 }
0x3992   : > { %7252 = vmatprep.subr.bf16.mxu0 %v7802_v1 }
0x3993   : > { %v7237_v26 = vpop.f32.mrf.mxu1 }
0x3994   : > { %7241 = vmatmul.mubr.msk.bf16.vlgmr.msra.gmra.mxu0 %vm747_vm7, %v5839_v24 }
0x3995   : > { %7256 = vmatprep.mubr.msk.bf16.mxu0 %vm7803_vm0, %v7802_v1 }
0x3a54   : > { %v5881_v27 = vpop.f32.mrf.mxu0 }
0x3a55   : > { %v5887_v28 = vadd.f32 %v5881_v27, %v5727_v2  ;;  %v6482_v27 = vld [vmem:[#allocation11 + $0x2] ss:$0 sm:$0xff] }
0x3a56   : > { %v7242_v4 = vpop.f32.mrf.mxu0 }
0x3a57   : > { %v5888_v30 = vadd.f32 %v5887_v28, %v8746_v46  ;;  %v7410_v46 = vld [vmem:[#allocation8 + $0xd8] sm:$0xff]   ;;  %v6483_v4 = vld [vmem:[#allocation11 + $0x3] ss:$0 sm:$0xff] }
0x3a58   : > { %v5884_v31 = vpop.f32.mrf.mxu0  ;;  %v6017_v42 = vsel %vm1511_vm8, %v7410_v46, 0 }
0x3a59   : > { %v5893_v56 = vadd.f32 %v6471_v29, %v5888_v30  ;;  %7253 = vmatpush3.bf16.xpose.msra.mxu0 %v6017_v42 }
0x3a5a   : > { %v7243_v41 = vpop.f32.mrf.mxu0  ;;  %7254 = vmatprep.subr.bf16.mxu0 %v7802_v1  ;;  %v7411_v1 = vld [vmem:[#allocation8 + $0xd0] sm:$0xff]  }
0x3a5b   : > { %v5896_v33 = vsel %vm640_vm3, %v5893_v56, 0.0  ;;  %v6014_v12 = vsel %vm1511_vm8, %v7411_v1, 0 }
0x3a5c   : > { %5897 = vadd.xlane.f32.xlu1 %v5896_v33 }
0x3a61   : > { %7255 = vmatpush3.bf16.xpose.msra.mxu0 %v6014_v12 }
0x3ae5   : > { %v5898_v34 = vpop.xlane.xlu1 %5897 }
0x3ae6   : > { %v5899_v35 = vmul.f32 0.03125, %v5898_v34 }
0x3ae8   : > { %v5900_v37 = vsub.f32 %v5893_v56, %v5899_v35 }
0x3aea   : > { %v5901_v38 = vmul.f32 %v5900_v37, %v5900_v37  ;;  %v5919_v52 = vmul.f32 %v6472_v36, %v5900_v37 }
0x3aec   : > { %v5902_v39 = vsel %vm640_vm3, %v5901_v38, 0.0 }
0x3aed   : > { %5903 = vadd.xlane.f32.xlu1 %v5902_v39 }
0x3b76   : > { %v5904_v43 = vpop.xlane.xlu1 %5903 }
0x3b77   : > { %v5905_v25 = vmul.f32 0.032258064, %v5904_v43 }
0x3b79   : > { %7548 = vrsqrt.f32 %v5905_v25  ;;  %vm5908_vm0 = vcmp.eq.f32.partialorder %v5905_v25, inf  ;;  %v5911_v47 = vand.u32 2147483648, %v5905_v25  ;;  %vm5910_vm6 = vcmp.eq.f32.partialorder %v5905_v25, 0.0 }
0x3b86   : > { %v7549_v18 = vpop.eup %7548 }
0x3b87   : > { %v5907_v45 = vmul.f32 %v7549_v18, %v5905_v25 }
0x3b89   : > { %v5909_v48 = vsel %vm5908_vm0, %v5905_v25, %v5907_v45 }
0x3b8a   : > { %v5912_v50 = vsel %vm5910_vm6, %v5911_v47, %v5909_v48 }
0x3b8b   : > { %v5913_v51 = vadd.f32 1e-06, %v5912_v50 }
0x3b8d   : > { %7550 = vrcp.f32 %v5913_v51 }
0x3b9a   : > { %v7551_v53 = vpop.eup %7550 }
0x3b9b   : > { %v5920_v55 = vmul.f32 %v7551_v53, %v5919_v52 }
0x3b9d   : > { %v5925_v57 = vadd.f32 %v6473_v54, %v5920_v55 }
0x3b9f   : > { %v5938_v58 = vpack.c.bf16 %v5925_v57, %v5925_v57 }
0x3ba1   : > { %7249 = vmatmul.mubr.msk.bf16.vlgmr.msra.gmra.mxu1 %vm640_vm3, %v5938_v58 }
0x3c61   : > { %v5992_v62 = vpop.f32.mrf.mxu1 }
0x3c62   : > { %v5993_v63 = vadd.f32 %v6474_v59, %v5992_v62 }
0x3c63   : > { %v7250_v0 = vpop.f32.mrf.mxu1 }
0x3c64   : > { %v5998_v10 = vmax.f32 %v5993_v63, 0.0 }
0x3c65   : > { %v5995_v11 = vpop.f32.mrf.mxu1 }
0x3c66   : > { %v5999_v3 = vpack.c.bf16 %v5998_v10, %v5998_v10 }
0x3c67   : > { %v7251_v5 = vpop.f32.mrf.mxu1 }
0x3c68   : > { %7257 = vmatmul.mubr.msk.bf16.vlgmr.msra.gmra.mxu0 %vm1511_vm8, %v5999_v3 }
0x3d28   : > { %v6053_v8 = vpop.f32.mrf.mxu0 }
0x3d29   : > { %v6059_v9 = vadd.f32 %v6053_v8, %v5893_v56 }
0x3d2a   : > { %v7258_v13 = vpop.f32.mrf.mxu0 }
0x3d2b   : > { %v6064_v60 = vadd.f32 %v6481_v19, %v6059_v9 }
0x3d2c   : > { %v6056_v61 = vpop.f32.mrf.mxu0 }
0x3d2d   : > { %v6067_v14 = vsel %vm640_vm3, %v6064_v60, 0.0 }
0x3d2e   : > { %6068 = vadd.xlane.f32.xlu1 %v6067_v14  ;;  %v7259_v7 = vpop.f32.mrf.mxu0 }
0x3db7   : > { %v6069_v2 = vpop.xlane.xlu1 %6068 }
0x3db8   : > { %v6070_v15 = vmul.f32 0.03125, %v6069_v2 }
0x3dba   : > { %v6071_v6 = vsub.f32 %v6064_v60, %v6070_v15 }
0x3dbc   : > { %v6072_v16 = vmul.f32 %v6071_v6, %v6071_v6  ;;  %v6090_v28 = vmul.f32 %v6482_v27, %v6071_v6 }
0x3dbe   : > { %v6073_v17 = vsel %vm640_vm3, %v6072_v16, 0.0 }
0x3dbf   : > { %6074 = vadd.xlane.f32.xlu1 %v6073_v17 }
0x3e48   : > { %v6075_v20 = vpop.xlane.xlu1 %6074 }
0x3e49   : > { %v6076_v49 = vmul.f32 0.032258064, %v6075_v20 }
0x3e4b   : > { %7552 = vrsqrt.f32 %v6076_v49  ;;  %vm6079_vm7 = vcmp.eq.f32.partialorder %v6076_v49, inf  ;;  %v6082_v23 = vand.u32 2147483648, %v6076_v49  ;;  %vm6081_vm8 = vcmp.eq.f32.partialorder %v6076_v49, 0.0 }
0x3e58   : > { %v7553_v21 = vpop.eup %7552 }
0x3e59   : > { %v6078_v22 = vmul.f32 %v7553_v21, %v6076_v49 }
0x3e5b   : > { %v6080_v32 = vsel %vm6079_vm7, %v6076_v49, %v6078_v22 }
0x3e5c   : > { %v6083_v24 = vsel %vm6081_vm8, %v6082_v23, %v6080_v32 }
0x3e5d   : > { %v6084_v26 = vadd.f32 1e-06, %v6083_v24 }
0x3e5f   : > { %7554 = vrcp.f32 %v6084_v26 }
0x3e6c   : > { %v7555_v29 = vpop.eup %7554 }
0x3e6d   : > { %v6091_v30 = vmul.f32 %v7555_v29, %v6090_v28 }
0x3e6f   : > { %v6096_v31 = vadd.f32 %v6483_v4, %v6091_v30 }
0x3e71   : > { %6097 = vst.msk [vmem:[%s527_s29] sm:$0xff] %vm640_vm3, %v6096_v31 }
0x3e72   : > { %7726 = shalt.err (!%p7723_p7)
}
0x3e73   : > { %s7727_s18 = scalar_lea.hbm %s6110_s28, 128  ;;  %s7731_s14 = scalar_lea.hbm %s8913_s12, 256 }
0x3e74   : > { %p7728_p8 = scmp.ne.s32.totalorder %s6110_s28, %s7727_s18  ;;  %p7732_p10 = scmp.lt.s32.totalorder %s6110_s28, %s8913_s12 }
0x3e75   : > { %p7733_p1 = scmp.lt.s32.totalorder %s7731_s14, %s7727_s18 }
0x3e76   : > { %p7729_p11 = pnand %p7728_p8, %p7919_p5 }
0x3e77   : > { %p7734_p0 = por %p7733_p1, %p7732_p10 }
0x3e78   : > { %p7730_p12 = pneg %p7729_p11 }
0x3e7a   : > { %p7735_p6 = pnand %p7734_p0, %p7730_p12 }
0x3e7c   : > { %7738 = shalt.err (!%p7735_p6)
}
0x3e7d   : > { %7284 = dma.vmem_to_hbm [thread:$0]  (%p7919_p5), %s6113_s27, 128, %s6110_s28, %s6099_s15  }
0x3e7e PF: > { %s8977_s20 = sld [smem:[#allocation19_spill]]  ;;  %p7321_p9 = scmp.ge.s32.totalorder %s7789_s24, 2 }
0x3e7f   : > { %s8978_s30 = sld [smem:[#allocation23_spill]] }
0x3e84   : > { %s6124_s21 = sand.u32 1, %s8977_s20  }
0x3e85   : > { %p8979_p2 = scmp.ne.s32.totalorder %s8978_s30, 0  ;;  %s6125_s23 = scalar_lea.sflag [#allocation4], %s6124_s21 }
0x3e87   : > { %p7306_p3 = pnand %p7321_p9, %p8979_p2 }
0x3e89   : > { %p7307_p4 = pneg %p7306_p3 }
0x3e8b   : > { %7772 = dma.done.wait (%p7307_p4), %s6125_s23, 128  }
0x3e8c   : > { %7774 = vsyncadd (%p7307_p4), %s6125_s23, 4294967168  ;;  %s8980_s24 = sld [smem:[#allocation21_spill]]  ;;  %s8983_s21 = smov %s7781_s22 }
0x3e8d   : > { %s8981_s17 = sld [smem:[#allocation20_spill]] }
0x3e8e   : > { %s8982_s23 = sld [smem:[#allocation22_spill]] }
0x3e92   : > { %p26_p13 = scmp.ge.s32.totalorder %s8980_s24, 4  }
0x3e93   : > { %s8984_s22 = smov %s8981_s17 }
0x3e94   :  { %28 = sbr.rel (!%p26_p13) target bundleno = 7 (0x7), region = 159 }
0x3e99   :  { %6130 = vsyncpa [#allocation3], 1 }
0x3e9a   :  { %6132 = vsyncpa [#allocation3 + $0x1], 1 }
0x3e9b   :  { %6133 = vsyncpa [#allocation6], 1 }
0x3e9c   :  { %6134 = vsyncpa [#allocation9], 1 }
0x3e9d   :  { %6135 = vsyncpa [#allocation12], 1 }
0x3e9e   :  { %6136 = vsyncpa [#allocation4], 1 }
0x3e9f   :  { %6138 = vsyncpa [#allocation4 + $0x1], 1 }

</bundles_post_ra>
